<compile_context>
chip_gen: v7x
topology: tpu7x:2x2x1
jax: 0.10.0
libtpu: 0.0.40
codegen_flags: <defaults>
</compile_context>

<pallas_src>
import functools

import jax
import jax.numpy as jnp
from jax import lax
from jax.experimental import pallas as pl
from jax.experimental.pallas import tpu as pltpu


NOUT_PAD = 128  # lane-dense padded width for the final Linear output


# ------------------------------ Fused kernel -------------------------------- #

def _nn_kernel(x_ref, cw_ref, scale_ref, shift_ref, wih_ref, bih_ref,
               whh_ref, bhh_ref, fcw_ref, fcb_ref, out_ref, xg_s, h_s, *,
               batch, width, hidden):
    # x_ref:     (W*B, 200)      bf16  time-major flat input rows r = w*B + b
    # cw_ref:    (3, 200, NFILT) bf16  cw[kw, h, f] = conv_w[f, 0, h, kw]
    # scale_ref: (1, NFILT)      f32   folded BN scale
    # shift_ref: (1, NFILT)      f32   folded BN shift
    # wih_ref:   (NFILT, 3H)     bf16  GRU W_ih^T   (gate order r, z, n)
    # bih_ref:   (1, 3H)         f32   GRU b_ih
    # whh_ref:   (H, 3H)         bf16  GRU W_hh^T
    # bhh_ref:   (1, 3H)         f32   GRU b_hh
    # fcw_ref:   (H, 128)        bf16  fc weight^T, zero-padded to 128 lanes
    # fcb_ref:   (1, 128)        f32   fc bias, zero-padded
    # out_ref:   (W*B, 128)      f32   time-major logits (lane-dense)
    # xg_s:      (W*B, 3H)       f32   VMEM scratch: input gates
    # h_s:       (W*B, H)        f32   VMEM scratch: per-step hidden states
    b = batch
    h_dim = hidden
    bw = b * width
    three_h = 3 * h_dim

    x = x_ref[...]                                                   # (BW, 200)

    # --- Conv(200,3): three K=200 matmuls over the SAME activation tile ------
    y0 = jnp.dot(x, cw_ref[0], preferred_element_type=jnp.float32)   # (BW, NFILT)
    y1 = jnp.dot(x, cw_ref[1], preferred_element_type=jnp.float32)
    y2 = jnp.dot(x, cw_ref[2], preferred_element_type=jnp.float32)

    # conv[r = w*B + b] = y0[r-B] + y1[r] + y2[r+B], zero padding at width edges.
    # Both rolls use non-negative shifts (shift=B and shift=BW-B ≡ -B).
    row = lax.broadcasted_iota(jnp.int32, y1.shape, 0)
    y0s = jnp.where(row < b, 0.0, pltpu.roll(y0, shift=b, axis=0))
    y2s = jnp.where(row >= bw - b, 0.0, pltpu.roll(y2, shift=bw - b, axis=0))
    acc = y0s + y1 + y2s

    # --- folded inference BatchNorm + ReLU -----------------------------------
    feat = jnp.maximum(acc * scale_ref[...] + shift_ref[...], 0.0)   # (BW, NFILT)

    # --- GRU input gates for ALL timesteps/batches in one matmul -------------
    xg = jnp.dot(feat.astype(jnp.bfloat16), wih_ref[...],
                 preferred_element_type=jnp.float32) + bih_ref[...]  # (BW, 3H)
    xg_s[...] = xg

    # --- GRU recurrence (serial over time) -----------------------------------
    # Bias broadcast hoisted out of the loop (JAX does not CSE broadcast_in_dim).
    bhh = jnp.broadcast_to(bhh_ref[...], (b, three_h))
    h = jnp.zeros((b, h_dim), jnp.float32)

    # W is small & static: fully unrolled static loop (== fori_loop unroll=True);
    # per-step state lives in VMEM scratches so vreg live ranges stay small.
    # TODO(synk): partial-unroll lax.fori_loop once W grows large.
    for t in range(width):
        s = t * b
        xg_t = xg_s[pl.ds(s, b), :]                                  # (B, 3H)
        hg = jnp.dot(h.astype(jnp.bfloat16), whh_ref[...],
                     preferred_element_type=jnp.float32) + bhh       # (B, 3H)
        # Fused r/z gates: one sigmoid over (B, 2H), then slice.
        rz = jax.nn.sigmoid(xg_t[:, :2 * h_dim] + hg[:, :2 * h_dim])
        r = rz[:, :h_dim]
        z = rz[:, h_dim:]
        n = jnp.tanh(xg_t[:, 2 * h_dim:] + r * hg[:, 2 * h_dim:])
        h = (1.0 - z) * n + z * h
        h_s[pl.ds(s, b), :] = h

    # --- final Linear, hoisted out of the time loop ---------------------------
    # dropout(p=0.5) is identity in eval mode.
    fcb = jnp.broadcast_to(fcb_ref[...], (bw, NOUT_PAD))
    out_ref[...] = jnp.dot(h_s[...].astype(jnp.bfloat16), fcw_ref[...],
                           preferred_element_type=jnp.float32) + fcb


def nn_fused(x_tm, cw, bn_scale, bn_shift, wih_t, b_ih, whh_t, b_hh,
             fcw_pad, fcb_pad, *, batch, width, hidden):
    bw = batch * width
    three_h = 3 * hidden
    nfilt = cw.shape[2]
    kernel = functools.partial(_nn_kernel, batch=batch, width=width,
                               hidden=hidden)
    return pl.pallas_call(
        kernel,
        out_shape=jax.ShapeDtypeStruct((bw, NOUT_PAD), jnp.float32),
        grid=(1,),
        in_specs=[
            pl.BlockSpec((bw, 200), lambda i: (0, 0)),
            pl.BlockSpec((3, 200, nfilt), lambda i: (0, 0, 0)),
            pl.BlockSpec((1, nfilt), lambda i: (0, 0)),
            pl.BlockSpec((1, nfilt), lambda i: (0, 0)),
            pl.BlockSpec((nfilt, three_h), lambda i: (0, 0)),
            pl.BlockSpec((1, three_h), lambda i: (0, 0)),
            pl.BlockSpec((hidden, three_h), lambda i: (0, 0)),
            pl.BlockSpec((1, three_h), lambda i: (0, 0)),
            pl.BlockSpec((hidden, NOUT_PAD), lambda i: (0, 0)),
            pl.BlockSpec((1, NOUT_PAD), lambda i: (0, 0)),
        ],
        out_specs=pl.BlockSpec((bw, NOUT_PAD), lambda i: (0, 0)),
        scratch_shapes=[
            pltpu.VMEM((bw, three_h), jnp.float32),   # xg (input gates)
            pltpu.VMEM((bw, hidden), jnp.float32),    # per-step hidden states
        ],
        compiler_params=pltpu.CompilerParams(
            dimension_semantics=("arbitrary",)),
    )(x_tm, cw, bn_scale, bn_shift, wih_t, b_ih, whh_t, b_hh, fcw_pad, fcb_pad)


# -------------------------- Parameters & forward ---------------------------- #

def init_params(key, nfilt, nout, hidden):
    ks = jax.random.split(key, 11)

    def u(k, shape, scale=0.1):
        return (jax.random.uniform(k, shape, jnp.float32) - 0.5) * 2.0 * scale

    return dict(
        conv_w=u(ks[0], (nfilt, 1, 200, 3)),        # Conv2d weight (no bias)
        bn_gamma=1.0 + u(ks[1], (nfilt,)),
        bn_beta=u(ks[2], (nfilt,)),
        bn_mean=u(ks[3], (nfilt,)),
        bn_var=0.5 + jax.random.uniform(ks[4], (nfilt,), jnp.float32),
        w_ih=u(ks[5], (3 * hidden, nfilt)),          # GRU weight_ih_l0 (r,z,n)
        w_hh=u(ks[6], (3 * hidden, hidden)),         # GRU weight_hh_l0
        b_ih=u(ks[7], (3 * hidden,)),
        b_hh=u(ks[8], (3 * hidden,)),
        fc_w=u(ks[9], (nout, hidden)),               # Linear weight
        fc_b=u(ks[10], (nout,)),
    )


@functools.partial(jax.jit, static_argnames=("nfilt", "nout", "hidden"))
def nn_forward(params, x, *, nfilt, nout, hidden):
    b, c, h, w = x.shape
    assert c == 1 and h == 200, "conv kernel height is 200 -> input H must be 200"
    assert nout <= NOUT_PAD, "final Linear output wider than NOUT_PAD"
    three_h = 3 * hidden

    # NCHW -> time-major flat rows (r = w*B + b): one tiny fused transpose+cast.
    x_tm = x[:, 0].transpose(2, 0, 1).reshape(w * b, 200).astype(jnp.bfloat16)

    # Conv weight as (3, 200, NFILT); folded inference BatchNorm scale/shift.
    cw = params["conv_w"][:, 0].transpose(2, 1, 0).astype(jnp.bfloat16)
    eps = 1e-5
    bn_scale_v = params["bn_gamma"] / jnp.sqrt(params["bn_var"] + eps)
    bn_shift_v = params["bn_beta"] - params["bn_mean"] * bn_scale_v
    bn_scale = bn_scale_v.reshape(1, nfilt)
    bn_shift = bn_shift_v.reshape(1, nfilt)

    wih_t = params["w_ih"].T.astype(jnp.bfloat16)                      # (NFILT, 3H)
    b_ih = params["b_ih"].reshape(1, three_h)
    whh_t = params["w_hh"].T.astype(jnp.bfloat16)                      # (H, 3H)
    b_hh = params["b_hh"].reshape(1, three_h)
    fcw_pad = jnp.pad(params["fc_w"].T, ((0, 0), (0, NOUT_PAD - nout)))
    fcw_pad = fcw_pad.astype(jnp.bfloat16)                             # (H, 128)
    fcb_pad = jnp.pad(params["fc_b"], (0, NOUT_PAD - nout)).reshape(1, NOUT_PAD)

    # Fully fused conv + BN + ReLU + GRU + fc in a single pallas_call.
    out2d = nn_fused(x_tm, cw, bn_scale, bn_shift, wih_t, b_ih,
                     whh_t, b_hh, fcw_pad, fcb_pad,
                     batch=b, width=w, hidden=hidden)                  # (W*B, 128)

    # Time-major (W, B, 128) -> (B, W, NOUT).
    return out2d.reshape(w, b, NOUT_PAD).transpose(1, 0, 2)[:, :, :nout]


# ----------------------------------- main ----------------------------------- #

if __name__ == "__main__":
    NFILT, NOUT, HIDDEN = 256, 4, 128   # module defaults (hidden fixed by GRU)
    B, W = 2, 16                        # conv kernel height 200 fixes input H=200

    key = jax.random.PRNGKey(0)
    k_params, k_x = jax.random.split(key)
    params = init_params(k_params, NFILT, NOUT, HIDDEN)
    x = jax.random.normal(k_x, (B, 1, 200, W), dtype=jnp.float32)

    y = nn_forward(params, x, nfilt=NFILT, nout=NOUT, hidden=HIDDEN)
    y = jax.block_until_ready(y)
    assert y.shape == (B, W, NOUT), y.shape
    assert bool(jnp.all(jnp.isfinite(y))), "non-finite output"
    print("KERNEL_OK")
</pallas_src>

<mosaic_0001>
module attributes {stable_mosaic.version = 11 : i64} {
  func.func @_nn_kernel(%arg0: i32, %arg1: memref<32x200xbf16, #tpu.memory_space<vmem>>, %arg2: memref<3x200x256xbf16, #tpu.memory_space<vmem>>, %arg3: memref<1x256xf32, #tpu.memory_space<vmem>>, %arg4: memref<1x256xf32, #tpu.memory_space<vmem>>, %arg5: memref<256x384xbf16, #tpu.memory_space<vmem>>, %arg6: memref<1x384xf32, #tpu.memory_space<vmem>>, %arg7: memref<128x384xbf16, #tpu.memory_space<vmem>>, %arg8: memref<1x384xf32, #tpu.memory_space<vmem>>, %arg9: memref<128x128xbf16, #tpu.memory_space<vmem>>, %arg10: memref<1x128xf32, #tpu.memory_space<vmem>>, %arg11: memref<32x128xf32, #tpu.memory_space<vmem>>, %arg12: memref<32x384xf32, #tpu.memory_space<vmem>>, %arg13: memref<32x128xf32, #tpu.memory_space<vmem>>) attributes {dimension_semantics = [#tpu.dimension_semantics<arbitrary>], iteration_bounds = array<i64: 1>, scalar_prefetch = 0 : i64, scratch_operands = 2 : i64, tpu.core_type = #tpu.core_type<tc>, window_params = [{pipeline_mode = #tpu.pipeline_mode<synchronous>, transform_indices = @transform_0, window_bounds = array<i64: 32, 200>}, {pipeline_mode = #tpu.pipeline_mode<synchronous>, transform_indices = @transform_1, window_bounds = array<i64: 3, 200, 256>}, {pipeline_mode = #tpu.pipeline_mode<synchronous>, transform_indices = @transform_2, window_bounds = array<i64: 1, 256>}, {pipeline_mode = #tpu.pipeline_mode<synchronous>, transform_indices = @transform_3, window_bounds = array<i64: 1, 256>}, {pipeline_mode = #tpu.pipeline_mode<synchronous>, transform_indices = @transform_4, window_bounds = array<i64: 256, 384>}, {pipeline_mode = #tpu.pipeline_mode<synchronous>, transform_indices = @transform_5, window_bounds = array<i64: 1, 384>}, {pipeline_mode = #tpu.pipeline_mode<synchronous>, transform_indices = @transform_6, window_bounds = array<i64: 128, 384>}, {pipeline_mode = #tpu.pipeline_mode<synchronous>, transform_indices = @transform_7, window_bounds = array<i64: 1, 384>}, {pipeline_mode = #tpu.pipeline_mode<synchronous>, transform_indices = @transform_8, window_bounds = array<i64: 128, 128>}, {pipeline_mode = #tpu.pipeline_mode<synchronous>, transform_indices = @transform_9, window_bounds = array<i64: 1, 128>}, {pipeline_mode = #tpu.pipeline_mode<synchronous>, transform_indices = @transform_10, window_bounds = array<i64: 32, 128>}]} {
    %c0 = arith.constant 0 : index
    %c0_0 = arith.constant 0 : index
    %0 = vector.load %arg1[%c0, %c0_0] : memref<32x200xbf16, #tpu.memory_space<vmem>>, vector<32x200xbf16>
    %c0_1 = arith.constant 0 : index
    %c0_2 = arith.constant 0 : index
    %c0_3 = arith.constant 0 : index
    %1 = vector.load %arg2[%c0_1, %c0_2, %c0_3] : memref<3x200x256xbf16, #tpu.memory_space<vmem>>, vector<1x200x256xbf16>
    %2 = vector.shape_cast %1 : vector<1x200x256xbf16> to vector<200x256xbf16>
    %cst = arith.constant dense<0.000000e+00> : vector<32x256xf32>
    %3 = tpu.matmul %0, %2, %cst {dimension_numbers = #tpu.dot_dimension_numbers<[1], [0], [0], [1], [0, 0, 1, 1], [], []>} : vector<32x200xbf16>, vector<200x256xbf16>, vector<32x256xf32> -> vector<32x256xf32>
    %c1 = arith.constant 1 : index
    %c0_4 = arith.constant 0 : index
    %c0_5 = arith.constant 0 : index
    %4 = vector.load %arg2[%c1, %c0_4, %c0_5] : memref<3x200x256xbf16, #tpu.memory_space<vmem>>, vector<1x200x256xbf16>
    %5 = vector.shape_cast %4 : vector<1x200x256xbf16> to vector<200x256xbf16>
    %cst_6 = arith.constant dense<0.000000e+00> : vector<32x256xf32>
    %6 = tpu.matmul %0, %5, %cst_6 {dimension_numbers = #tpu.dot_dimension_numbers<[1], [0], [0], [1], [0, 0, 1, 1], [], []>} : vector<32x200xbf16>, vector<200x256xbf16>, vector<32x256xf32> -> vector<32x256xf32>
    %c2 = arith.constant 2 : index
    %c0_7 = arith.constant 0 : index
    %c0_8 = arith.constant 0 : index
    %7 = vector.load %arg2[%c2, %c0_7, %c0_8] : memref<3x200x256xbf16, #tpu.memory_space<vmem>>, vector<1x200x256xbf16>
    %8 = vector.shape_cast %7 : vector<1x200x256xbf16> to vector<200x256xbf16>
    %cst_9 = arith.constant dense<0.000000e+00> : vector<32x256xf32>
    %9 = tpu.matmul %0, %8, %cst_9 {dimension_numbers = #tpu.dot_dimension_numbers<[1], [0], [0], [1], [0, 0, 1, 1], [], []>} : vector<32x200xbf16>, vector<200x256xbf16>, vector<32x256xf32> -> vector<32x256xf32>
    %10 = tpu.iota {dimensions = array<i32: 0>} : vector<32x256xi32>
    %c2_i32 = arith.constant 2 : i32
    %11 = vector.broadcast %c2_i32 : i32 to vector<32x256xi32>
    %12 = arith.cmpi slt, %10, %11 : vector<32x256xi32>
    %c2_i32_10 = arith.constant 2 : i32
    %13 = tpu.dynamic_rotate %3 by %c2_i32_10 dim 0 : vector<32x256xf32>, i32 -> vector<32x256xf32>
    %cst_11 = arith.constant 0.000000e+00 : f32
    %14 = vector.broadcast %cst_11 : f32 to vector<32x256xf32>
    %15 = arith.select %12, %14, %13 : vector<32x256xi1>, vector<32x256xf32>
    %c30_i32 = arith.constant 30 : i32
    %16 = vector.broadcast %c30_i32 : i32 to vector<32x256xi32>
    %17 = arith.cmpi sge, %10, %16 : vector<32x256xi32>
    %c30_i32_12 = arith.constant 30 : i32
    %18 = tpu.dynamic_rotate %9 by %c30_i32_12 dim 0 : vector<32x256xf32>, i32 -> vector<32x256xf32>
    %cst_13 = arith.constant 0.000000e+00 : f32
    %19 = vector.broadcast %cst_13 : f32 to vector<32x256xf32>
    %20 = arith.select %17, %19, %18 : vector<32x256xi1>, vector<32x256xf32>
    %21 = arith.addf %15, %6 : vector<32x256xf32>
    %22 = arith.addf %21, %20 : vector<32x256xf32>
    %c0_14 = arith.constant 0 : index
    %c0_15 = arith.constant 0 : index
    %23 = vector.load %arg3[%c0_14, %c0_15] : memref<1x256xf32, #tpu.memory_space<vmem>>, vector<1x256xf32>
    %24 = vector.broadcast %23 : vector<1x256xf32> to vector<32x256xf32>
    %25 = arith.mulf %22, %24 : vector<32x256xf32>
    %c0_16 = arith.constant 0 : index
    %c0_17 = arith.constant 0 : index
    %26 = vector.load %arg4[%c0_16, %c0_17] : memref<1x256xf32, #tpu.memory_space<vmem>>, vector<1x256xf32>
    %27 = vector.broadcast %26 : vector<1x256xf32> to vector<32x256xf32>
    %28 = arith.addf %25, %27 : vector<32x256xf32>
    %cst_18 = arith.constant 0.000000e+00 : f32
    %29 = vector.broadcast %cst_18 : f32 to vector<32x256xf32>
    %30 = arith.maximumf %28, %29 : vector<32x256xf32>
    %31 = arith.truncf %30 : vector<32x256xf32> to vector<32x256xbf16>
    %c0_19 = arith.constant 0 : index
    %c0_20 = arith.constant 0 : index
    %32 = vector.load %arg5[%c0_19, %c0_20] : memref<256x384xbf16, #tpu.memory_space<vmem>>, vector<256x384xbf16>
    %cst_21 = arith.constant dense<0.000000e+00> : vector<32x384xf32>
    %33 = tpu.matmul %31, %32, %cst_21 {dimension_numbers = #tpu.dot_dimension_numbers<[1], [0], [0], [1], [0, 0, 1, 1], [], []>} : vector<32x256xbf16>, vector<256x384xbf16>, vector<32x384xf32> -> vector<32x384xf32>
    %c0_22 = arith.constant 0 : index
    %c0_23 = arith.constant 0 : index
    %34 = vector.load %arg6[%c0_22, %c0_23] : memref<1x384xf32, #tpu.memory_space<vmem>>, vector<1x384xf32>
    %35 = vector.broadcast %34 : vector<1x384xf32> to vector<32x384xf32>
    %36 = arith.addf %33, %35 : vector<32x384xf32>
    %c0_24 = arith.constant 0 : index
    %c0_25 = arith.constant 0 : index
    %37 = vector.load %arg12[%c0_24, %c0_25] : memref<32x384xf32, #tpu.memory_space<vmem>>, vector<32x384xf32>
    tpu.vector_store %arg12[%c0_24, %c0_25], %36 {strides = array<i32>} : memref<32x384xf32, #tpu.memory_space<vmem>>, vector<32x384xf32>,
    %c0_26 = arith.constant 0 : index
    %c0_27 = arith.constant 0 : index
    %38 = vector.load %arg8[%c0_26, %c0_27] : memref<1x384xf32, #tpu.memory_space<vmem>>, vector<1x384xf32>
    %39 = vector.shape_cast %38 : vector<1x384xf32> to vector<1x384xf32>
    %40 = vector.broadcast %39 : vector<1x384xf32> to vector<2x384xf32>
    %cst_28 = arith.constant 0.000000e+00 : f32
    %41 = vector.broadcast %cst_28 : f32 to vector<2x128xf32>
    %c0_29 = arith.constant 0 : index
    %c0_30 = arith.constant 0 : index
    %42 = vector.load %arg12[%c0_29, %c0_30] : memref<32x384xf32, #tpu.memory_space<vmem>>, vector<2x384xf32>
    %43 = arith.truncf %41 : vector<2x128xf32> to vector<2x128xbf16>
    %c0_31 = arith.constant 0 : index
    %c0_32 = arith.constant 0 : index
    %44 = vector.load %arg7[%c0_31, %c0_32] : memref<128x384xbf16, #tpu.memory_space<vmem>>, vector<128x384xbf16>
    %cst_33 = arith.constant dense<0.000000e+00> : vector<2x384xf32>
    %45 = tpu.matmul %43, %44, %cst_33 {dimension_numbers = #tpu.dot_dimension_numbers<[1], [0], [0], [1], [0, 0, 1, 1], [], []>} : vector<2x128xbf16>, vector<128x384xbf16>, vector<2x384xf32> -> vector<2x384xf32>
    %46 = arith.addf %45, %40 : vector<2x384xf32>
    %47 = vector.extract_strided_slice %42 {offsets = [0, 0], sizes = [2, 256], strides = [1, 1]} : vector<2x384xf32> to vector<2x256xf32>
    %48 = vector.extract_strided_slice %46 {offsets = [0, 0], sizes = [2, 256], strides = [1, 1]} : vector<2x384xf32> to vector<2x256xf32>
    %49 = arith.addf %47, %48 : vector<2x256xf32>
    %50 = arith.negf %49 : vector<2x256xf32>
    %51 = math.exp %50 : vector<2x256xf32>
    %cst_34 = arith.constant 1.000000e+00 : f32
    %52 = vector.broadcast %cst_34 : f32 to vector<2x256xf32>
    %53 = arith.addf %52, %51 : vector<2x256xf32>
    %54 = arith.divf %52, %53 : vector<2x256xf32>
    %55 = vector.extract_strided_slice %54 {offsets = [0, 0], sizes = [2, 128], strides = [1, 1]} : vector<2x256xf32> to vector<2x128xf32>
    %56 = vector.extract_strided_slice %54 {offsets = [0, 128], sizes = [2, 128], strides = [1, 1]} : vector<2x256xf32> to vector<2x128xf32>
    %57 = vector.extract_strided_slice %42 {offsets = [0, 256], sizes = [2, 128], strides = [1, 1]} : vector<2x384xf32> to vector<2x128xf32>
    %58 = vector.extract_strided_slice %46 {offsets = [0, 256], sizes = [2, 128], strides = [1, 1]} : vector<2x384xf32> to vector<2x128xf32>
    %59 = arith.mulf %55, %58 : vector<2x128xf32>
    %60 = arith.addf %57, %59 : vector<2x128xf32>
    %61 = math.tanh %60 : vector<2x128xf32>
    %cst_35 = arith.constant 1.000000e+00 : f32
    %62 = vector.broadcast %cst_35 : f32 to vector<2x128xf32>
    %63 = arith.subf %62, %56 : vector<2x128xf32>
    %64 = arith.mulf %63, %61 : vector<2x128xf32>
    %65 = arith.mulf %56, %41 : vector<2x128xf32>
    %66 = arith.addf %64, %65 : vector<2x128xf32>
    %c0_36 = arith.constant 0 : index
    %c0_37 = arith.constant 0 : index
    %67 = vector.load %arg13[%c0_36, %c0_37] : memref<32x128xf32, #tpu.memory_space<vmem>>, vector<2x128xf32>
    tpu.vector_store %arg13[%c0_36, %c0_37], %66 {strides = array<i32>} : memref<32x128xf32, #tpu.memory_space<vmem>>, vector<2x128xf32>,
    %c2_38 = arith.constant 2 : index
    %c0_39 = arith.constant 0 : index
    %68 = vector.load %arg12[%c2_38, %c0_39] : memref<32x384xf32, #tpu.memory_space<vmem>>, vector<2x384xf32>
    %69 = arith.truncf %66 : vector<2x128xf32> to vector<2x128xbf16>
    %c0_40 = arith.constant 0 : index
    %c0_41 = arith.constant 0 : index
    %70 = vector.load %arg7[%c0_40, %c0_41] : memref<128x384xbf16, #tpu.memory_space<vmem>>, vector<128x384xbf16>
    %cst_42 = arith.constant dense<0.000000e+00> : vector<2x384xf32>
    %71 = tpu.matmul %69, %70, %cst_42 {dimension_numbers = #tpu.dot_dimension_numbers<[1], [0], [0], [1], [0, 0, 1, 1], [], []>} : vector<2x128xbf16>, vector<128x384xbf16>, vector<2x384xf32> -> vector<2x384xf32>
    %72 = arith.addf %71, %40 : vector<2x384xf32>
    %73 = vector.extract_strided_slice %68 {offsets = [0, 0], sizes = [2, 256], strides = [1, 1]} : vector<2x384xf32> to vector<2x256xf32>
    %74 = vector.extract_strided_slice %72 {offsets = [0, 0], sizes = [2, 256], strides = [1, 1]} : vector<2x384xf32> to vector<2x256xf32>
    %75 = arith.addf %73, %74 : vector<2x256xf32>
    %76 = arith.negf %75 : vector<2x256xf32>
    %77 = math.exp %76 : vector<2x256xf32>
    %cst_43 = arith.constant 1.000000e+00 : f32
    %78 = vector.broadcast %cst_43 : f32 to vector<2x256xf32>
    %79 = arith.addf %78, %77 : vector<2x256xf32>
    %80 = arith.divf %78, %79 : vector<2x256xf32>
    %81 = vector.extract_strided_slice %80 {offsets = [0, 0], sizes = [2, 128], strides = [1, 1]} : vector<2x256xf32> to vector<2x128xf32>
    %82 = vector.extract_strided_slice %80 {offsets = [0, 128], sizes = [2, 128], strides = [1, 1]} : vector<2x256xf32> to vector<2x128xf32>
    %83 = vector.extract_strided_slice %68 {offsets = [0, 256], sizes = [2, 128], strides = [1, 1]} : vector<2x384xf32> to vector<2x128xf32>
    %84 = vector.extract_strided_slice %72 {offsets = [0, 256], sizes = [2, 128], strides = [1, 1]} : vector<2x384xf32> to vector<2x128xf32>
    %85 = arith.mulf %81, %84 : vector<2x128xf32>
    %86 = arith.addf %83, %85 : vector<2x128xf32>
    %87 = math.tanh %86 : vector<2x128xf32>
    %cst_44 = arith.constant 1.000000e+00 : f32
    %88 = vector.broadcast %cst_44 : f32 to vector<2x128xf32>
    %89 = arith.subf %88, %82 : vector<2x128xf32>
    %90 = arith.mulf %89, %87 : vector<2x128xf32>
    %91 = arith.mulf %82, %66 : vector<2x128xf32>
    %92 = arith.addf %90, %91 : vector<2x128xf32>
    %c2_45 = arith.constant 2 : index
    %c0_46 = arith.constant 0 : index
    %93 = vector.load %arg13[%c2_45, %c0_46] : memref<32x128xf32, #tpu.memory_space<vmem>>, vector<2x128xf32>
    tpu.vector_store %arg13[%c2_45, %c0_46], %92 {strides = array<i32>} : memref<32x128xf32, #tpu.memory_space<vmem>>, vector<2x128xf32>,
    %c4 = arith.constant 4 : index
    %c0_47 = arith.constant 0 : index
    %94 = vector.load %arg12[%c4, %c0_47] : memref<32x384xf32, #tpu.memory_space<vmem>>, vector<2x384xf32>
    %95 = arith.truncf %92 : vector<2x128xf32> to vector<2x128xbf16>
    %c0_48 = arith.constant 0 : index
    %c0_49 = arith.constant 0 : index
    %96 = vector.load %arg7[%c0_48, %c0_49] : memref<128x384xbf16, #tpu.memory_space<vmem>>, vector<128x384xbf16>
    %cst_50 = arith.constant dense<0.000000e+00> : vector<2x384xf32>
    %97 = tpu.matmul %95, %96, %cst_50 {dimension_numbers = #tpu.dot_dimension_numbers<[1], [0], [0], [1], [0, 0, 1, 1], [], []>} : vector<2x128xbf16>, vector<128x384xbf16>, vector<2x384xf32> -> vector<2x384xf32>
    %98 = arith.addf %97, %40 : vector<2x384xf32>
    %99 = vector.extract_strided_slice %94 {offsets = [0, 0], sizes = [2, 256], strides = [1, 1]} : vector<2x384xf32> to vector<2x256xf32>
    %100 = vector.extract_strided_slice %98 {offsets = [0, 0], sizes = [2, 256], strides = [1, 1]} : vector<2x384xf32> to vector<2x256xf32>
    %101 = arith.addf %99, %100 : vector<2x256xf32>
    %102 = arith.negf %101 : vector<2x256xf32>
    %103 = math.exp %102 : vector<2x256xf32>
    %cst_51 = arith.constant 1.000000e+00 : f32
    %104 = vector.broadcast %cst_51 : f32 to vector<2x256xf32>
    %105 = arith.addf %104, %103 : vector<2x256xf32>
    %106 = arith.divf %104, %105 : vector<2x256xf32>
    %107 = vector.extract_strided_slice %106 {offsets = [0, 0], sizes = [2, 128], strides = [1, 1]} : vector<2x256xf32> to vector<2x128xf32>
    %108 = vector.extract_strided_slice %106 {offsets = [0, 128], sizes = [2, 128], strides = [1, 1]} : vector<2x256xf32> to vector<2x128xf32>
    %109 = vector.extract_strided_slice %94 {offsets = [0, 256], sizes = [2, 128], strides = [1, 1]} : vector<2x384xf32> to vector<2x128xf32>
    %110 = vector.extract_strided_slice %98 {offsets = [0, 256], sizes = [2, 128], strides = [1, 1]} : vector<2x384xf32> to vector<2x128xf32>
    %111 = arith.mulf %107, %110 : vector<2x128xf32>
    %112 = arith.addf %109, %111 : vector<2x128xf32>
    %113 = math.tanh %112 : vector<2x128xf32>
    %cst_52 = arith.constant 1.000000e+00 : f32
    %114 = vector.broadcast %cst_52 : f32 to vector<2x128xf32>
    %115 = arith.subf %114, %108 : vector<2x128xf32>
    %116 = arith.mulf %115, %113 : vector<2x128xf32>
    %117 = arith.mulf %108, %92 : vector<2x128xf32>
    %118 = arith.addf %116, %117 : vector<2x128xf32>
    %c4_53 = arith.constant 4 : index
    %c0_54 = arith.constant 0 : index
    %119 = vector.load %arg13[%c4_53, %c0_54] : memref<32x128xf32, #tpu.memory_space<vmem>>, vector<2x128xf32>
    tpu.vector_store %arg13[%c4_53, %c0_54], %118 {strides = array<i32>} : memref<32x128xf32, #tpu.memory_space<vmem>>, vector<2x128xf32>,
    %c6 = arith.constant 6 : index
    %c0_55 = arith.constant 0 : index
    %120 = vector.load %arg12[%c6, %c0_55] : memref<32x384xf32, #tpu.memory_space<vmem>>, vector<2x384xf32>
    %121 = arith.truncf %118 : vector<2x128xf32> to vector<2x128xbf16>
    %c0_56 = arith.constant 0 : index
    %c0_57 = arith.constant 0 : index
    %122 = vector.load %arg7[%c0_56, %c0_57] : memref<128x384xbf16, #tpu.memory_space<vmem>>, vector<128x384xbf16>
    %cst_58 = arith.constant dense<0.000000e+00> : vector<2x384xf32>
    %123 = tpu.matmul %121, %122, %cst_58 {dimension_numbers = #tpu.dot_dimension_numbers<[1], [0], [0], [1], [0, 0, 1, 1], [], []>} : vector<2x128xbf16>, vector<128x384xbf16>, vector<2x384xf32> -> vector<2x384xf32>
    %124 = arith.addf %123, %40 : vector<2x384xf32>
    %125 = vector.extract_strided_slice %120 {offsets = [0, 0], sizes = [2, 256], strides = [1, 1]} : vector<2x384xf32> to vector<2x256xf32>
    %126 = vector.extract_strided_slice %124 {offsets = [0, 0], sizes = [2, 256], strides = [1, 1]} : vector<2x384xf32> to vector<2x256xf32>
    %127 = arith.addf %125, %126 : vector<2x256xf32>
    %128 = arith.negf %127 : vector<2x256xf32>
    %129 = math.exp %128 : vector<2x256xf32>
    %cst_59 = arith.constant 1.000000e+00 : f32
    %130 = vector.broadcast %cst_59 : f32 to vector<2x256xf32>
    %131 = arith.addf %130, %129 : vector<2x256xf32>
    %132 = arith.divf %130, %131 : vector<2x256xf32>
    %133 = vector.extract_strided_slice %132 {offsets = [0, 0], sizes = [2, 128], strides = [1, 1]} : vector<2x256xf32> to vector<2x128xf32>
    %134 = vector.extract_strided_slice %132 {offsets = [0, 128], sizes = [2, 128], strides = [1, 1]} : vector<2x256xf32> to vector<2x128xf32>
    %135 = vector.extract_strided_slice %120 {offsets = [0, 256], sizes = [2, 128], strides = [1, 1]} : vector<2x384xf32> to vector<2x128xf32>
    %136 = vector.extract_strided_slice %124 {offsets = [0, 256], sizes = [2, 128], strides = [1, 1]} : vector<2x384xf32> to vector<2x128xf32>
    %137 = arith.mulf %133, %136 : vector<2x128xf32>
    %138 = arith.addf %135, %137 : vector<2x128xf32>
    %139 = math.tanh %138 : vector<2x128xf32>
    %cst_60 = arith.constant 1.000000e+00 : f32
    %140 = vector.broadcast %cst_60 : f32 to vector<2x128xf32>
    %141 = arith.subf %140, %134 : vector<2x128xf32>
    %142 = arith.mulf %141, %139 : vector<2x128xf32>
    %143 = arith.mulf %134, %118 : vector<2x128xf32>
    %144 = arith.addf %142, %143 : vector<2x128xf32>
    %c6_61 = arith.constant 6 : index
    %c0_62 = arith.constant 0 : index
    %145 = vector.load %arg13[%c6_61, %c0_62] : memref<32x128xf32, #tpu.memory_space<vmem>>, vector<2x128xf32>
    tpu.vector_store %arg13[%c6_61, %c0_62], %144 {strides = array<i32>} : memref<32x128xf32, #tpu.memory_space<vmem>>, vector<2x128xf32>,
    %c8 = arith.constant 8 : index
    %c0_63 = arith.constant 0 : index
    %146 = vector.load %arg12[%c8, %c0_63] : memref<32x384xf32, #tpu.memory_space<vmem>>, vector<2x384xf32>
    %147 = arith.truncf %144 : vector<2x128xf32> to vector<2x128xbf16>
    %c0_64 = arith.constant 0 : index
    %c0_65 = arith.constant 0 : index
    %148 = vector.load %arg7[%c0_64, %c0_65] : memref<128x384xbf16, #tpu.memory_space<vmem>>, vector<128x384xbf16>
    %cst_66 = arith.constant dense<0.000000e+00> : vector<2x384xf32>
    %149 = tpu.matmul %147, %148, %cst_66 {dimension_numbers = #tpu.dot_dimension_numbers<[1], [0], [0], [1], [0, 0, 1, 1], [], []>} : vector<2x128xbf16>, vector<128x384xbf16>, vector<2x384xf32> -> vector<2x384xf32>
    %150 = arith.addf %149, %40 : vector<2x384xf32>
    %151 = vector.extract_strided_slice %146 {offsets = [0, 0], sizes = [2, 256], strides = [1, 1]} : vector<2x384xf32> to vector<2x256xf32>
    %152 = vector.extract_strided_slice %150 {offsets = [0, 0], sizes = [2, 256], strides = [1, 1]} : vector<2x384xf32> to vector<2x256xf32>
    %153 = arith.addf %151, %152 : vector<2x256xf32>
    %154 = arith.negf %153 : vector<2x256xf32>
    %155 = math.exp %154 : vector<2x256xf32>
    %cst_67 = arith.constant 1.000000e+00 : f32
    %156 = vector.broadcast %cst_67 : f32 to vector<2x256xf32>
    %157 = arith.addf %156, %155 : vector<2x256xf32>
    %158 = arith.divf %156, %157 : vector<2x256xf32>
    %159 = vector.extract_strided_slice %158 {offsets = [0, 0], sizes = [2, 128], strides = [1, 1]} : vector<2x256xf32> to vector<2x128xf32>
    %160 = vector.extract_strided_slice %158 {offsets = [0, 128], sizes = [2, 128], strides = [1, 1]} : vector<2x256xf32> to vector<2x128xf32>
    %161 = vector.extract_strided_slice %146 {offsets = [0, 256], sizes = [2, 128], strides = [1, 1]} : vector<2x384xf32> to vector<2x128xf32>
    %162 = vector.extract_strided_slice %150 {offsets = [0, 256], sizes = [2, 128], strides = [1, 1]} : vector<2x384xf32> to vector<2x128xf32>
    %163 = arith.mulf %159, %162 : vector<2x128xf32>
    %164 = arith.addf %161, %163 : vector<2x128xf32>
    %165 = math.tanh %164 : vector<2x128xf32>
    %cst_68 = arith.constant 1.000000e+00 : f32
    %166 = vector.broadcast %cst_68 : f32 to vector<2x128xf32>
    %167 = arith.subf %166, %160 : vector<2x128xf32>
    %168 = arith.mulf %167, %165 : vector<2x128xf32>
    %169 = arith.mulf %160, %144 : vector<2x128xf32>
    %170 = arith.addf %168, %169 : vector<2x128xf32>
    %c8_69 = arith.constant 8 : index
    %c0_70 = arith.constant 0 : index
    %171 = vector.load %arg13[%c8_69, %c0_70] : memref<32x128xf32, #tpu.memory_space<vmem>>, vector<2x128xf32>
    tpu.vector_store %arg13[%c8_69, %c0_70], %170 {strides = array<i32>} : memref<32x128xf32, #tpu.memory_space<vmem>>, vector<2x128xf32>,
    %c10 = arith.constant 10 : index
    %c0_71 = arith.constant 0 : index
    %172 = vector.load %arg12[%c10, %c0_71] : memref<32x384xf32, #tpu.memory_space<vmem>>, vector<2x384xf32>
    %173 = arith.truncf %170 : vector<2x128xf32> to vector<2x128xbf16>
    %c0_72 = arith.constant 0 : index
    %c0_73 = arith.constant 0 : index
    %174 = vector.load %arg7[%c0_72, %c0_73] : memref<128x384xbf16, #tpu.memory_space<vmem>>, vector<128x384xbf16>
    %cst_74 = arith.constant dense<0.000000e+00> : vector<2x384xf32>
    %175 = tpu.matmul %173, %174, %cst_74 {dimension_numbers = #tpu.dot_dimension_numbers<[1], [0], [0], [1], [0, 0, 1, 1], [], []>} : vector<2x128xbf16>, vector<128x384xbf16>, vector<2x384xf32> -> vector<2x384xf32>
    %176 = arith.addf %175, %40 : vector<2x384xf32>
    %177 = vector.extract_strided_slice %172 {offsets = [0, 0], sizes = [2, 256], strides = [1, 1]} : vector<2x384xf32> to vector<2x256xf32>
    %178 = vector.extract_strided_slice %176 {offsets = [0, 0], sizes = [2, 256], strides = [1, 1]} : vector<2x384xf32> to vector<2x256xf32>
    %179 = arith.addf %177, %178 : vector<2x256xf32>
    %180 = arith.negf %179 : vector<2x256xf32>
    %181 = math.exp %180 : vector<2x256xf32>
    %cst_75 = arith.constant 1.000000e+00 : f32
    %182 = vector.broadcast %cst_75 : f32 to vector<2x256xf32>
    %183 = arith.addf %182, %181 : vector<2x256xf32>
    %184 = arith.divf %182, %183 : vector<2x256xf32>
    %185 = vector.extract_strided_slice %184 {offsets = [0, 0], sizes = [2, 128], strides = [1, 1]} : vector<2x256xf32> to vector<2x128xf32>
    %186 = vector.extract_strided_slice %184 {offsets = [0, 128], sizes = [2, 128], strides = [1, 1]} : vector<2x256xf32> to vector<2x128xf32>
    %187 = vector.extract_strided_slice %172 {offsets = [0, 256], sizes = [2, 128], strides = [1, 1]} : vector<2x384xf32> to vector<2x128xf32>
    %188 = vector.extract_strided_slice %176 {offsets = [0, 256], sizes = [2, 128], strides = [1, 1]} : vector<2x384xf32> to vector<2x128xf32>
    %189 = arith.mulf %185, %188 : vector<2x128xf32>
    %190 = arith.addf %187, %189 : vector<2x128xf32>
    %191 = math.tanh %190 : vector<2x128xf32>
    %cst_76 = arith.constant 1.000000e+00 : f32
    %192 = vector.broadcast %cst_76 : f32 to vector<2x128xf32>
    %193 = arith.subf %192, %186 : vector<2x128xf32>
    %194 = arith.mulf %193, %191 : vector<2x128xf32>
    %195 = arith.mulf %186, %170 : vector<2x128xf32>
    %196 = arith.addf %194, %195 : vector<2x128xf32>
    %c10_77 = arith.constant 10 : index
    %c0_78 = arith.constant 0 : index
    %197 = vector.load %arg13[%c10_77, %c0_78] : memref<32x128xf32, #tpu.memory_space<vmem>>, vector<2x128xf32>
    tpu.vector_store %arg13[%c10_77, %c0_78], %196 {strides = array<i32>} : memref<32x128xf32, #tpu.memory_space<vmem>>, vector<2x128xf32>,
    %c12 = arith.constant 12 : index
    %c0_79 = arith.constant 0 : index
    %198 = vector.load %arg12[%c12, %c0_79] : memref<32x384xf32, #tpu.memory_space<vmem>>, vector<2x384xf32>
    %199 = arith.truncf %196 : vector<2x128xf32> to vector<2x128xbf16>
    %c0_80 = arith.constant 0 : index
    %c0_81 = arith.constant 0 : index
    %200 = vector.load %arg7[%c0_80, %c0_81] : memref<128x384xbf16, #tpu.memory_space<vmem>>, vector<128x384xbf16>
    %cst_82 = arith.constant dense<0.000000e+00> : vector<2x384xf32>
    %201 = tpu.matmul %199, %200, %cst_82 {dimension_numbers = #tpu.dot_dimension_numbers<[1], [0], [0], [1], [0, 0, 1, 1], [], []>} : vector<2x128xbf16>, vector<128x384xbf16>, vector<2x384xf32> -> vector<2x384xf32>
    %202 = arith.addf %201, %40 : vector<2x384xf32>
    %203 = vector.extract_strided_slice %198 {offsets = [0, 0], sizes = [2, 256], strides = [1, 1]} : vector<2x384xf32> to vector<2x256xf32>
    %204 = vector.extract_strided_slice %202 {offsets = [0, 0], sizes = [2, 256], strides = [1, 1]} : vector<2x384xf32> to vector<2x256xf32>
    %205 = arith.addf %203, %204 : vector<2x256xf32>
    %206 = arith.negf %205 : vector<2x256xf32>
    %207 = math.exp %206 : vector<2x256xf32>
    %cst_83 = arith.constant 1.000000e+00 : f32
    %208 = vector.broadcast %cst_83 : f32 to vector<2x256xf32>
    %209 = arith.addf %208, %207 : vector<2x256xf32>
    %210 = arith.divf %208, %209 : vector<2x256xf32>
    %211 = vector.extract_strided_slice %210 {offsets = [0, 0], sizes = [2, 128], strides = [1, 1]} : vector<2x256xf32> to vector<2x128xf32>
    %212 = vector.extract_strided_slice %210 {offsets = [0, 128], sizes = [2, 128], strides = [1, 1]} : vector<2x256xf32> to vector<2x128xf32>
    %213 = vector.extract_strided_slice %198 {offsets = [0, 256], sizes = [2, 128], strides = [1, 1]} : vector<2x384xf32> to vector<2x128xf32>
    %214 = vector.extract_strided_slice %202 {offsets = [0, 256], sizes = [2, 128], strides = [1, 1]} : vector<2x384xf32> to vector<2x128xf32>
    %215 = arith.mulf %211, %214 : vector<2x128xf32>
    %216 = arith.addf %213, %215 : vector<2x128xf32>
    %217 = math.tanh %216 : vector<2x128xf32>
    %cst_84 = arith.constant 1.000000e+00 : f32
    %218 = vector.broadcast %cst_84 : f32 to vector<2x128xf32>
    %219 = arith.subf %218, %212 : vector<2x128xf32>
    %220 = arith.mulf %219, %217 : vector<2x128xf32>
    %221 = arith.mulf %212, %196 : vector<2x128xf32>
    %222 = arith.addf %220, %221 : vector<2x128xf32>
    %c12_85 = arith.constant 12 : index
    %c0_86 = arith.constant 0 : index
    %223 = vector.load %arg13[%c12_85, %c0_86] : memref<32x128xf32, #tpu.memory_space<vmem>>, vector<2x128xf32>
    tpu.vector_store %arg13[%c12_85, %c0_86], %222 {strides = array<i32>} : memref<32x128xf32, #tpu.memory_space<vmem>>, vector<2x128xf32>,
    %c14 = arith.constant 14 : index
    %c0_87 = arith.constant 0 : index
    %224 = vector.load %arg12[%c14, %c0_87] : memref<32x384xf32, #tpu.memory_space<vmem>>, vector<2x384xf32>
    %225 = arith.truncf %222 : vector<2x128xf32> to vector<2x128xbf16>
    %c0_88 = arith.constant 0 : index
    %c0_89 = arith.constant 0 : index
    %226 = vector.load %arg7[%c0_88, %c0_89] : memref<128x384xbf16, #tpu.memory_space<vmem>>, vector<128x384xbf16>
    %cst_90 = arith.constant dense<0.000000e+00> : vector<2x384xf32>
    %227 = tpu.matmul %225, %226, %cst_90 {dimension_numbers = #tpu.dot_dimension_numbers<[1], [0], [0], [1], [0, 0, 1, 1], [], []>} : vector<2x128xbf16>, vector<128x384xbf16>, vector<2x384xf32> -> vector<2x384xf32>
    %228 = arith.addf %227, %40 : vector<2x384xf32>
    %229 = vector.extract_strided_slice %224 {offsets = [0, 0], sizes = [2, 256], strides = [1, 1]} : vector<2x384xf32> to vector<2x256xf32>
    %230 = vector.extract_strided_slice %228 {offsets = [0, 0], sizes = [2, 256], strides = [1, 1]} : vector<2x384xf32> to vector<2x256xf32>
    %231 = arith.addf %229, %230 : vector<2x256xf32>
    %232 = arith.negf %231 : vector<2x256xf32>
    %233 = math.exp %232 : vector<2x256xf32>
    %cst_91 = arith.constant 1.000000e+00 : f32
    %234 = vector.broadcast %cst_91 : f32 to vector<2x256xf32>
    %235 = arith.addf %234, %233 : vector<2x256xf32>
    %236 = arith.divf %234, %235 : vector<2x256xf32>
    %237 = vector.extract_strided_slice %236 {offsets = [0, 0], sizes = [2, 128], strides = [1, 1]} : vector<2x256xf32> to vector<2x128xf32>
    %238 = vector.extract_strided_slice %236 {offsets = [0, 128], sizes = [2, 128], strides = [1, 1]} : vector<2x256xf32> to vector<2x128xf32>
    %239 = vector.extract_strided_slice %224 {offsets = [0, 256], sizes = [2, 128], strides = [1, 1]} : vector<2x384xf32> to vector<2x128xf32>
    %240 = vector.extract_strided_slice %228 {offsets = [0, 256], sizes = [2, 128], strides = [1, 1]} : vector<2x384xf32> to vector<2x128xf32>
    %241 = arith.mulf %237, %240 : vector<2x128xf32>
    %242 = arith.addf %239, %241 : vector<2x128xf32>
    %243 = math.tanh %242 : vector<2x128xf32>
    %cst_92 = arith.constant 1.000000e+00 : f32
    %244 = vector.broadcast %cst_92 : f32 to vector<2x128xf32>
    %245 = arith.subf %244, %238 : vector<2x128xf32>
    %246 = arith.mulf %245, %243 : vector<2x128xf32>
    %247 = arith.mulf %238, %222 : vector<2x128xf32>
    %248 = arith.addf %246, %247 : vector<2x128xf32>
    %c14_93 = arith.constant 14 : index
    %c0_94 = arith.constant 0 : index
    %249 = vector.load %arg13[%c14_93, %c0_94] : memref<32x128xf32, #tpu.memory_space<vmem>>, vector<2x128xf32>
    tpu.vector_store %arg13[%c14_93, %c0_94], %248 {strides = array<i32>} : memref<32x128xf32, #tpu.memory_space<vmem>>, vector<2x128xf32>,
    %c16 = arith.constant 16 : index
    %c0_95 = arith.constant 0 : index
    %250 = vector.load %arg12[%c16, %c0_95] : memref<32x384xf32, #tpu.memory_space<vmem>>, vector<2x384xf32>
    %251 = arith.truncf %248 : vector<2x128xf32> to vector<2x128xbf16>
    %c0_96 = arith.constant 0 : index
    %c0_97 = arith.constant 0 : index
    %252 = vector.load %arg7[%c0_96, %c0_97] : memref<128x384xbf16, #tpu.memory_space<vmem>>, vector<128x384xbf16>
    %cst_98 = arith.constant dense<0.000000e+00> : vector<2x384xf32>
    %253 = tpu.matmul %251, %252, %cst_98 {dimension_numbers = #tpu.dot_dimension_numbers<[1], [0], [0], [1], [0, 0, 1, 1], [], []>} : vector<2x128xbf16>, vector<128x384xbf16>, vector<2x384xf32> -> vector<2x384xf32>
    %254 = arith.addf %253, %40 : vector<2x384xf32>
    %255 = vector.extract_strided_slice %250 {offsets = [0, 0], sizes = [2, 256], strides = [1, 1]} : vector<2x384xf32> to vector<2x256xf32>
    %256 = vector.extract_strided_slice %254 {offsets = [0, 0], sizes = [2, 256], strides = [1, 1]} : vector<2x384xf32> to vector<2x256xf32>
    %257 = arith.addf %255, %256 : vector<2x256xf32>
    %258 = arith.negf %257 : vector<2x256xf32>
    %259 = math.exp %258 : vector<2x256xf32>
    %cst_99 = arith.constant 1.000000e+00 : f32
    %260 = vector.broadcast %cst_99 : f32 to vector<2x256xf32>
    %261 = arith.addf %260, %259 : vector<2x256xf32>
    %262 = arith.divf %260, %261 : vector<2x256xf32>
    %263 = vector.extract_strided_slice %262 {offsets = [0, 0], sizes = [2, 128], strides = [1, 1]} : vector<2x256xf32> to vector<2x128xf32>
    %264 = vector.extract_strided_slice %262 {offsets = [0, 128], sizes = [2, 128], strides = [1, 1]} : vector<2x256xf32> to vector<2x128xf32>
    %265 = vector.extract_strided_slice %250 {offsets = [0, 256], sizes = [2, 128], strides = [1, 1]} : vector<2x384xf32> to vector<2x128xf32>
    %266 = vector.extract_strided_slice %254 {offsets = [0, 256], sizes = [2, 128], strides = [1, 1]} : vector<2x384xf32> to vector<2x128xf32>
    %267 = arith.mulf %263, %266 : vector<2x128xf32>
    %268 = arith.addf %265, %267 : vector<2x128xf32>
    %269 = math.tanh %268 : vector<2x128xf32>
    %cst_100 = arith.constant 1.000000e+00 : f32
    %270 = vector.broadcast %cst_100 : f32 to vector<2x128xf32>
    %271 = arith.subf %270, %264 : vector<2x128xf32>
    %272 = arith.mulf %271, %269 : vector<2x128xf32>
    %273 = arith.mulf %264, %248 : vector<2x128xf32>
    %274 = arith.addf %272, %273 : vector<2x128xf32>
    %c16_101 = arith.constant 16 : index
    %c0_102 = arith.constant 0 : index
    %275 = vector.load %arg13[%c16_101, %c0_102] : memref<32x128xf32, #tpu.memory_space<vmem>>, vector<2x128xf32>
    tpu.vector_store %arg13[%c16_101, %c0_102], %274 {strides = array<i32>} : memref<32x128xf32, #tpu.memory_space<vmem>>, vector<2x128xf32>,
    %c18 = arith.constant 18 : index
    %c0_103 = arith.constant 0 : index
    %276 = vector.load %arg12[%c18, %c0_103] : memref<32x384xf32, #tpu.memory_space<vmem>>, vector<2x384xf32>
    %277 = arith.truncf %274 : vector<2x128xf32> to vector<2x128xbf16>
    %c0_104 = arith.constant 0 : index
    %c0_105 = arith.constant 0 : index
    %278 = vector.load %arg7[%c0_104, %c0_105] : memref<128x384xbf16, #tpu.memory_space<vmem>>, vector<128x384xbf16>
    %cst_106 = arith.constant dense<0.000000e+00> : vector<2x384xf32>
    %279 = tpu.matmul %277, %278, %cst_106 {dimension_numbers = #tpu.dot_dimension_numbers<[1], [0], [0], [1], [0, 0, 1, 1], [], []>} : vector<2x128xbf16>, vector<128x384xbf16>, vector<2x384xf32> -> vector<2x384xf32>
    %280 = arith.addf %279, %40 : vector<2x384xf32>
    %281 = vector.extract_strided_slice %276 {offsets = [0, 0], sizes = [2, 256], strides = [1, 1]} : vector<2x384xf32> to vector<2x256xf32>
    %282 = vector.extract_strided_slice %280 {offsets = [0, 0], sizes = [2, 256], strides = [1, 1]} : vector<2x384xf32> to vector<2x256xf32>
    %283 = arith.addf %281, %282 : vector<2x256xf32>
    %284 = arith.negf %283 : vector<2x256xf32>
    %285 = math.exp %284 : vector<2x256xf32>
    %cst_107 = arith.constant 1.000000e+00 : f32
    %286 = vector.broadcast %cst_107 : f32 to vector<2x256xf32>
    %287 = arith.addf %286, %285 : vector<2x256xf32>
    %288 = arith.divf %286, %287 : vector<2x256xf32>
    %289 = vector.extract_strided_slice %288 {offsets = [0, 0], sizes = [2, 128], strides = [1, 1]} : vector<2x256xf32> to vector<2x128xf32>
    %290 = vector.extract_strided_slice %288 {offsets = [0, 128], sizes = [2, 128], strides = [1, 1]} : vector<2x256xf32> to vector<2x128xf32>
    %291 = vector.extract_strided_slice %276 {offsets = [0, 256], sizes = [2, 128], strides = [1, 1]} : vector<2x384xf32> to vector<2x128xf32>
    %292 = vector.extract_strided_slice %280 {offsets = [0, 256], sizes = [2, 128], strides = [1, 1]} : vector<2x384xf32> to vector<2x128xf32>
    %293 = arith.mulf %289, %292 : vector<2x128xf32>
    %294 = arith.addf %291, %293 : vector<2x128xf32>
    %295 = math.tanh %294 : vector<2x128xf32>
    %cst_108 = arith.constant 1.000000e+00 : f32
    %296 = vector.broadcast %cst_108 : f32 to vector<2x128xf32>
    %297 = arith.subf %296, %290 : vector<2x128xf32>
    %298 = arith.mulf %297, %295 : vector<2x128xf32>
    %299 = arith.mulf %290, %274 : vector<2x128xf32>
    %300 = arith.addf %298, %299 : vector<2x128xf32>
    %c18_109 = arith.constant 18 : index
    %c0_110 = arith.constant 0 : index
    %301 = vector.load %arg13[%c18_109, %c0_110] : memref<32x128xf32, #tpu.memory_space<vmem>>, vector<2x128xf32>
    tpu.vector_store %arg13[%c18_109, %c0_110], %300 {strides = array<i32>} : memref<32x128xf32, #tpu.memory_space<vmem>>, vector<2x128xf32>,
    %c20 = arith.constant 20 : index
    %c0_111 = arith.constant 0 : index
    %302 = vector.load %arg12[%c20, %c0_111] : memref<32x384xf32, #tpu.memory_space<vmem>>, vector<2x384xf32>
    %303 = arith.truncf %300 : vector<2x128xf32> to vector<2x128xbf16>
    %c0_112 = arith.constant 0 : index
    %c0_113 = arith.constant 0 : index
    %304 = vector.load %arg7[%c0_112, %c0_113] : memref<128x384xbf16, #tpu.memory_space<vmem>>, vector<128x384xbf16>
    %cst_114 = arith.constant dense<0.000000e+00> : vector<2x384xf32>
    %305 = tpu.matmul %303, %304, %cst_114 {dimension_numbers = #tpu.dot_dimension_numbers<[1], [0], [0], [1], [0, 0, 1, 1], [], []>} : vector<2x128xbf16>, vector<128x384xbf16>, vector<2x384xf32> -> vector<2x384xf32>
    %306 = arith.addf %305, %40 : vector<2x384xf32>
    %307 = vector.extract_strided_slice %302 {offsets = [0, 0], sizes = [2, 256], strides = [1, 1]} : vector<2x384xf32> to vector<2x256xf32>
    %308 = vector.extract_strided_slice %306 {offsets = [0, 0], sizes = [2, 256], strides = [1, 1]} : vector<2x384xf32> to vector<2x256xf32>
    %309 = arith.addf %307, %308 : vector<2x256xf32>
    %310 = arith.negf %309 : vector<2x256xf32>
    %311 = math.exp %310 : vector<2x256xf32>
    %cst_115 = arith.constant 1.000000e+00 : f32
    %312 = vector.broadcast %cst_115 : f32 to vector<2x256xf32>
    %313 = arith.addf %312, %311 : vector<2x256xf32>
    %314 = arith.divf %312, %313 : vector<2x256xf32>
    %315 = vector.extract_strided_slice %314 {offsets = [0, 0], sizes = [2, 128], strides = [1, 1]} : vector<2x256xf32> to vector<2x128xf32>
    %316 = vector.extract_strided_slice %314 {offsets = [0, 128], sizes = [2, 128], strides = [1, 1]} : vector<2x256xf32> to vector<2x128xf32>
    %317 = vector.extract_strided_slice %302 {offsets = [0, 256], sizes = [2, 128], strides = [1, 1]} : vector<2x384xf32> to vector<2x128xf32>
    %318 = vector.extract_strided_slice %306 {offsets = [0, 256], sizes = [2, 128], strides = [1, 1]} : vector<2x384xf32> to vector<2x128xf32>
    %319 = arith.mulf %315, %318 : vector<2x128xf32>
    %320 = arith.addf %317, %319 : vector<2x128xf32>
    %321 = math.tanh %320 : vector<2x128xf32>
    %cst_116 = arith.constant 1.000000e+00 : f32
    %322 = vector.broadcast %cst_116 : f32 to vector<2x128xf32>
    %323 = arith.subf %322, %316 : vector<2x128xf32>
    %324 = arith.mulf %323, %321 : vector<2x128xf32>
    %325 = arith.mulf %316, %300 : vector<2x128xf32>
    %326 = arith.addf %324, %325 : vector<2x128xf32>
    %c20_117 = arith.constant 20 : index
    %c0_118 = arith.constant 0 : index
    %327 = vector.load %arg13[%c20_117, %c0_118] : memref<32x128xf32, #tpu.memory_space<vmem>>, vector<2x128xf32>
    tpu.vector_store %arg13[%c20_117, %c0_118], %326 {strides = array<i32>} : memref<32x128xf32, #tpu.memory_space<vmem>>, vector<2x128xf32>,
    %c22 = arith.constant 22 : index
    %c0_119 = arith.constant 0 : index
    %328 = vector.load %arg12[%c22, %c0_119] : memref<32x384xf32, #tpu.memory_space<vmem>>, vector<2x384xf32>
    %329 = arith.truncf %326 : vector<2x128xf32> to vector<2x128xbf16>
    %c0_120 = arith.constant 0 : index
    %c0_121 = arith.constant 0 : index
    %330 = vector.load %arg7[%c0_120, %c0_121] : memref<128x384xbf16, #tpu.memory_space<vmem>>, vector<128x384xbf16>
    %cst_122 = arith.constant dense<0.000000e+00> : vector<2x384xf32>
    %331 = tpu.matmul %329, %330, %cst_122 {dimension_numbers = #tpu.dot_dimension_numbers<[1], [0], [0], [1], [0, 0, 1, 1], [], []>} : vector<2x128xbf16>, vector<128x384xbf16>, vector<2x384xf32> -> vector<2x384xf32>
    %332 = arith.addf %331, %40 : vector<2x384xf32>
    %333 = vector.extract_strided_slice %328 {offsets = [0, 0], sizes = [2, 256], strides = [1, 1]} : vector<2x384xf32> to vector<2x256xf32>
    %334 = vector.extract_strided_slice %332 {offsets = [0, 0], sizes = [2, 256], strides = [1, 1]} : vector<2x384xf32> to vector<2x256xf32>
    %335 = arith.addf %333, %334 : vector<2x256xf32>
    %336 = arith.negf %335 : vector<2x256xf32>
    %337 = math.exp %336 : vector<2x256xf32>
    %cst_123 = arith.constant 1.000000e+00 : f32
    %338 = vector.broadcast %cst_123 : f32 to vector<2x256xf32>
    %339 = arith.addf %338, %337 : vector<2x256xf32>
    %340 = arith.divf %338, %339 : vector<2x256xf32>
    %341 = vector.extract_strided_slice %340 {offsets = [0, 0], sizes = [2, 128], strides = [1, 1]} : vector<2x256xf32> to vector<2x128xf32>
    %342 = vector.extract_strided_slice %340 {offsets = [0, 128], sizes = [2, 128], strides = [1, 1]} : vector<2x256xf32> to vector<2x128xf32>
    %343 = vector.extract_strided_slice %328 {offsets = [0, 256], sizes = [2, 128], strides = [1, 1]} : vector<2x384xf32> to vector<2x128xf32>
    %344 = vector.extract_strided_slice %332 {offsets = [0, 256], sizes = [2, 128], strides = [1, 1]} : vector<2x384xf32> to vector<2x128xf32>
    %345 = arith.mulf %341, %344 : vector<2x128xf32>
    %346 = arith.addf %343, %345 : vector<2x128xf32>
    %347 = math.tanh %346 : vector<2x128xf32>
    %cst_124 = arith.constant 1.000000e+00 : f32
    %348 = vector.broadcast %cst_124 : f32 to vector<2x128xf32>
    %349 = arith.subf %348, %342 : vector<2x128xf32>
    %350 = arith.mulf %349, %347 : vector<2x128xf32>
    %351 = arith.mulf %342, %326 : vector<2x128xf32>
    %352 = arith.addf %350, %351 : vector<2x128xf32>
    %c22_125 = arith.constant 22 : index
    %c0_126 = arith.constant 0 : index
    %353 = vector.load %arg13[%c22_125, %c0_126] : memref<32x128xf32, #tpu.memory_space<vmem>>, vector<2x128xf32>
    tpu.vector_store %arg13[%c22_125, %c0_126], %352 {strides = array<i32>} : memref<32x128xf32, #tpu.memory_space<vmem>>, vector<2x128xf32>,
    %c24 = arith.constant 24 : index
    %c0_127 = arith.constant 0 : index
    %354 = vector.load %arg12[%c24, %c0_127] : memref<32x384xf32, #tpu.memory_space<vmem>>, vector<2x384xf32>
    %355 = arith.truncf %352 : vector<2x128xf32> to vector<2x128xbf16>
    %c0_128 = arith.constant 0 : index
    %c0_129 = arith.constant 0 : index
    %356 = vector.load %arg7[%c0_128, %c0_129] : memref<128x384xbf16, #tpu.memory_space<vmem>>, vector<128x384xbf16>
    %cst_130 = arith.constant dense<0.000000e+00> : vector<2x384xf32>
    %357 = tpu.matmul %355, %356, %cst_130 {dimension_numbers = #tpu.dot_dimension_numbers<[1], [0], [0], [1], [0, 0, 1, 1], [], []>} : vector<2x128xbf16>, vector<128x384xbf16>, vector<2x384xf32> -> vector<2x384xf32>
    %358 = arith.addf %357, %40 : vector<2x384xf32>
    %359 = vector.extract_strided_slice %354 {offsets = [0, 0], sizes = [2, 256], strides = [1, 1]} : vector<2x384xf32> to vector<2x256xf32>
    %360 = vector.extract_strided_slice %358 {offsets = [0, 0], sizes = [2, 256], strides = [1, 1]} : vector<2x384xf32> to vector<2x256xf32>
    %361 = arith.addf %359, %360 : vector<2x256xf32>
    %362 = arith.negf %361 : vector<2x256xf32>
    %363 = math.exp %362 : vector<2x256xf32>
    %cst_131 = arith.constant 1.000000e+00 : f32
    %364 = vector.broadcast %cst_131 : f32 to vector<2x256xf32>
    %365 = arith.addf %364, %363 : vector<2x256xf32>
    %366 = arith.divf %364, %365 : vector<2x256xf32>
    %367 = vector.extract_strided_slice %366 {offsets = [0, 0], sizes = [2, 128], strides = [1, 1]} : vector<2x256xf32> to vector<2x128xf32>
    %368 = vector.extract_strided_slice %366 {offsets = [0, 128], sizes = [2, 128], strides = [1, 1]} : vector<2x256xf32> to vector<2x128xf32>
    %369 = vector.extract_strided_slice %354 {offsets = [0, 256], sizes = [2, 128], strides = [1, 1]} : vector<2x384xf32> to vector<2x128xf32>
    %370 = vector.extract_strided_slice %358 {offsets = [0, 256], sizes = [2, 128], strides = [1, 1]} : vector<2x384xf32> to vector<2x128xf32>
    %371 = arith.mulf %367, %370 : vector<2x128xf32>
    %372 = arith.addf %369, %371 : vector<2x128xf32>
    %373 = math.tanh %372 : vector<2x128xf32>
    %cst_132 = arith.constant 1.000000e+00 : f32
    %374 = vector.broadcast %cst_132 : f32 to vector<2x128xf32>
    %375 = arith.subf %374, %368 : vector<2x128xf32>
    %376 = arith.mulf %375, %373 : vector<2x128xf32>
    %377 = arith.mulf %368, %352 : vector<2x128xf32>
    %378 = arith.addf %376, %377 : vector<2x128xf32>
    %c24_133 = arith.constant 24 : index
    %c0_134 = arith.constant 0 : index
    %379 = vector.load %arg13[%c24_133, %c0_134] : memref<32x128xf32, #tpu.memory_space<vmem>>, vector<2x128xf32>
    tpu.vector_store %arg13[%c24_133, %c0_134], %378 {strides = array<i32>} : memref<32x128xf32, #tpu.memory_space<vmem>>, vector<2x128xf32>,
    %c26 = arith.constant 26 : index
    %c0_135 = arith.constant 0 : index
    %380 = vector.load %arg12[%c26, %c0_135] : memref<32x384xf32, #tpu.memory_space<vmem>>, vector<2x384xf32>
    %381 = arith.truncf %378 : vector<2x128xf32> to vector<2x128xbf16>
    %c0_136 = arith.constant 0 : index
    %c0_137 = arith.constant 0 : index
    %382 = vector.load %arg7[%c0_136, %c0_137] : memref<128x384xbf16, #tpu.memory_space<vmem>>, vector<128x384xbf16>
    %cst_138 = arith.constant dense<0.000000e+00> : vector<2x384xf32>
    %383 = tpu.matmul %381, %382, %cst_138 {dimension_numbers = #tpu.dot_dimension_numbers<[1], [0], [0], [1], [0, 0, 1, 1], [], []>} : vector<2x128xbf16>, vector<128x384xbf16>, vector<2x384xf32> -> vector<2x384xf32>
    %384 = arith.addf %383, %40 : vector<2x384xf32>
    %385 = vector.extract_strided_slice %380 {offsets = [0, 0], sizes = [2, 256], strides = [1, 1]} : vector<2x384xf32> to vector<2x256xf32>
    %386 = vector.extract_strided_slice %384 {offsets = [0, 0], sizes = [2, 256], strides = [1, 1]} : vector<2x384xf32> to vector<2x256xf32>
    %387 = arith.addf %385, %386 : vector<2x256xf32>
    %388 = arith.negf %387 : vector<2x256xf32>
    %389 = math.exp %388 : vector<2x256xf32>
    %cst_139 = arith.constant 1.000000e+00 : f32
    %390 = vector.broadcast %cst_139 : f32 to vector<2x256xf32>
    %391 = arith.addf %390, %389 : vector<2x256xf32>
    %392 = arith.divf %390, %391 : vector<2x256xf32>
    %393 = vector.extract_strided_slice %392 {offsets = [0, 0], sizes = [2, 128], strides = [1, 1]} : vector<2x256xf32> to vector<2x128xf32>
    %394 = vector.extract_strided_slice %392 {offsets = [0, 128], sizes = [2, 128], strides = [1, 1]} : vector<2x256xf32> to vector<2x128xf32>
    %395 = vector.extract_strided_slice %380 {offsets = [0, 256], sizes = [2, 128], strides = [1, 1]} : vector<2x384xf32> to vector<2x128xf32>
    %396 = vector.extract_strided_slice %384 {offsets = [0, 256], sizes = [2, 128], strides = [1, 1]} : vector<2x384xf32> to vector<2x128xf32>
    %397 = arith.mulf %393, %396 : vector<2x128xf32>
    %398 = arith.addf %395, %397 : vector<2x128xf32>
    %399 = math.tanh %398 : vector<2x128xf32>
    %cst_140 = arith.constant 1.000000e+00 : f32
    %400 = vector.broadcast %cst_140 : f32 to vector<2x128xf32>
    %401 = arith.subf %400, %394 : vector<2x128xf32>
    %402 = arith.mulf %401, %399 : vector<2x128xf32>
    %403 = arith.mulf %394, %378 : vector<2x128xf32>
    %404 = arith.addf %402, %403 : vector<2x128xf32>
    %c26_141 = arith.constant 26 : index
    %c0_142 = arith.constant 0 : index
    %405 = vector.load %arg13[%c26_141, %c0_142] : memref<32x128xf32, #tpu.memory_space<vmem>>, vector<2x128xf32>
    tpu.vector_store %arg13[%c26_141, %c0_142], %404 {strides = array<i32>} : memref<32x128xf32, #tpu.memory_space<vmem>>, vector<2x128xf32>,
    %c28 = arith.constant 28 : index
    %c0_143 = arith.constant 0 : index
    %406 = vector.load %arg12[%c28, %c0_143] : memref<32x384xf32, #tpu.memory_space<vmem>>, vector<2x384xf32>
    %407 = arith.truncf %404 : vector<2x128xf32> to vector<2x128xbf16>
    %c0_144 = arith.constant 0 : index
    %c0_145 = arith.constant 0 : index
    %408 = vector.load %arg7[%c0_144, %c0_145] : memref<128x384xbf16, #tpu.memory_space<vmem>>, vector<128x384xbf16>
    %cst_146 = arith.constant dense<0.000000e+00> : vector<2x384xf32>
    %409 = tpu.matmul %407, %408, %cst_146 {dimension_numbers = #tpu.dot_dimension_numbers<[1], [0], [0], [1], [0, 0, 1, 1], [], []>} : vector<2x128xbf16>, vector<128x384xbf16>, vector<2x384xf32> -> vector<2x384xf32>
    %410 = arith.addf %409, %40 : vector<2x384xf32>
    %411 = vector.extract_strided_slice %406 {offsets = [0, 0], sizes = [2, 256], strides = [1, 1]} : vector<2x384xf32> to vector<2x256xf32>
    %412 = vector.extract_strided_slice %410 {offsets = [0, 0], sizes = [2, 256], strides = [1, 1]} : vector<2x384xf32> to vector<2x256xf32>
    %413 = arith.addf %411, %412 : vector<2x256xf32>
    %414 = arith.negf %413 : vector<2x256xf32>
    %415 = math.exp %414 : vector<2x256xf32>
    %cst_147 = arith.constant 1.000000e+00 : f32
    %416 = vector.broadcast %cst_147 : f32 to vector<2x256xf32>
    %417 = arith.addf %416, %415 : vector<2x256xf32>
    %418 = arith.divf %416, %417 : vector<2x256xf32>
    %419 = vector.extract_strided_slice %418 {offsets = [0, 0], sizes = [2, 128], strides = [1, 1]} : vector<2x256xf32> to vector<2x128xf32>
    %420 = vector.extract_strided_slice %418 {offsets = [0, 128], sizes = [2, 128], strides = [1, 1]} : vector<2x256xf32> to vector<2x128xf32>
    %421 = vector.extract_strided_slice %406 {offsets = [0, 256], sizes = [2, 128], strides = [1, 1]} : vector<2x384xf32> to vector<2x128xf32>
    %422 = vector.extract_strided_slice %410 {offsets = [0, 256], sizes = [2, 128], strides = [1, 1]} : vector<2x384xf32> to vector<2x128xf32>
    %423 = arith.mulf %419, %422 : vector<2x128xf32>
    %424 = arith.addf %421, %423 : vector<2x128xf32>
    %425 = math.tanh %424 : vector<2x128xf32>
    %cst_148 = arith.constant 1.000000e+00 : f32
    %426 = vector.broadcast %cst_148 : f32 to vector<2x128xf32>
    %427 = arith.subf %426, %420 : vector<2x128xf32>
    %428 = arith.mulf %427, %425 : vector<2x128xf32>
    %429 = arith.mulf %420, %404 : vector<2x128xf32>
    %430 = arith.addf %428, %429 : vector<2x128xf32>
    %c28_149 = arith.constant 28 : index
    %c0_150 = arith.constant 0 : index
    %431 = vector.load %arg13[%c28_149, %c0_150] : memref<32x128xf32, #tpu.memory_space<vmem>>, vector<2x128xf32>
    tpu.vector_store %arg13[%c28_149, %c0_150], %430 {strides = array<i32>} : memref<32x128xf32, #tpu.memory_space<vmem>>, vector<2x128xf32>,
    %c30 = arith.constant 30 : index
    %c0_151 = arith.constant 0 : index
    %432 = vector.load %arg12[%c30, %c0_151] : memref<32x384xf32, #tpu.memory_space<vmem>>, vector<2x384xf32>
    %433 = arith.truncf %430 : vector<2x128xf32> to vector<2x128xbf16>
    %c0_152 = arith.constant 0 : index
    %c0_153 = arith.constant 0 : index
    %434 = vector.load %arg7[%c0_152, %c0_153] : memref<128x384xbf16, #tpu.memory_space<vmem>>, vector<128x384xbf16>
    %cst_154 = arith.constant dense<0.000000e+00> : vector<2x384xf32>
    %435 = tpu.matmul %433, %434, %cst_154 {dimension_numbers = #tpu.dot_dimension_numbers<[1], [0], [0], [1], [0, 0, 1, 1], [], []>} : vector<2x128xbf16>, vector<128x384xbf16>, vector<2x384xf32> -> vector<2x384xf32>
    %436 = arith.addf %435, %40 : vector<2x384xf32>
    %437 = vector.extract_strided_slice %432 {offsets = [0, 0], sizes = [2, 256], strides = [1, 1]} : vector<2x384xf32> to vector<2x256xf32>
    %438 = vector.extract_strided_slice %436 {offsets = [0, 0], sizes = [2, 256], strides = [1, 1]} : vector<2x384xf32> to vector<2x256xf32>
    %439 = arith.addf %437, %438 : vector<2x256xf32>
    %440 = arith.negf %439 : vector<2x256xf32>
    %441 = math.exp %440 : vector<2x256xf32>
    %cst_155 = arith.constant 1.000000e+00 : f32
    %442 = vector.broadcast %cst_155 : f32 to vector<2x256xf32>
    %443 = arith.addf %442, %441 : vector<2x256xf32>
    %444 = arith.divf %442, %443 : vector<2x256xf32>
    %445 = vector.extract_strided_slice %444 {offsets = [0, 0], sizes = [2, 128], strides = [1, 1]} : vector<2x256xf32> to vector<2x128xf32>
    %446 = vector.extract_strided_slice %444 {offsets = [0, 128], sizes = [2, 128], strides = [1, 1]} : vector<2x256xf32> to vector<2x128xf32>
    %447 = vector.extract_strided_slice %432 {offsets = [0, 256], sizes = [2, 128], strides = [1, 1]} : vector<2x384xf32> to vector<2x128xf32>
    %448 = vector.extract_strided_slice %436 {offsets = [0, 256], sizes = [2, 128], strides = [1, 1]} : vector<2x384xf32> to vector<2x128xf32>
    %449 = arith.mulf %445, %448 : vector<2x128xf32>
    %450 = arith.addf %447, %449 : vector<2x128xf32>
    %451 = math.tanh %450 : vector<2x128xf32>
    %cst_156 = arith.constant 1.000000e+00 : f32
    %452 = vector.broadcast %cst_156 : f32 to vector<2x128xf32>
    %453 = arith.subf %452, %446 : vector<2x128xf32>
    %454 = arith.mulf %453, %451 : vector<2x128xf32>
    %455 = arith.mulf %446, %430 : vector<2x128xf32>
    %456 = arith.addf %454, %455 : vector<2x128xf32>
    %c30_157 = arith.constant 30 : index
    %c0_158 = arith.constant 0 : index
    %457 = vector.load %arg13[%c30_157, %c0_158] : memref<32x128xf32, #tpu.memory_space<vmem>>, vector<2x128xf32>
    tpu.vector_store %arg13[%c30_157, %c0_158], %456 {strides = array<i32>} : memref<32x128xf32, #tpu.memory_space<vmem>>, vector<2x128xf32>,
    %c0_159 = arith.constant 0 : index
    %c0_160 = arith.constant 0 : index
    %458 = vector.load %arg10[%c0_159, %c0_160] : memref<1x128xf32, #tpu.memory_space<vmem>>, vector<1x128xf32>
    %459 = vector.shape_cast %458 : vector<1x128xf32> to vector<1x128xf32>
    %460 = vector.broadcast %459 : vector<1x128xf32> to vector<32x128xf32>
    %c0_161 = arith.constant 0 : index
    %c0_162 = arith.constant 0 : index
    %461 = vector.load %arg13[%c0_161, %c0_162] : memref<32x128xf32, #tpu.memory_space<vmem>>, vector<32x128xf32>
    %462 = arith.truncf %461 : vector<32x128xf32> to vector<32x128xbf16>
    %c0_163 = arith.constant 0 : index
    %c0_164 = arith.constant 0 : index
    %463 = vector.load %arg9[%c0_163, %c0_164] : memref<128x128xbf16, #tpu.memory_space<vmem>>, vector<128x128xbf16>
    %cst_165 = arith.constant dense<0.000000e+00> : vector<32x128xf32>
    %464 = tpu.matmul %462, %463, %cst_165 {dimension_numbers = #tpu.dot_dimension_numbers<[1], [0], [0], [1], [0, 0, 1, 1], [], []>} : vector<32x128xbf16>, vector<128x128xbf16>, vector<32x128xf32> -> vector<32x128xf32>
    %465 = arith.addf %464, %460 : vector<32x128xf32>
    %c0_166 = arith.constant 0 : index
    %c0_167 = arith.constant 0 : index
    %466 = vector.load %arg11[%c0_166, %c0_167] : memref<32x128xf32, #tpu.memory_space<vmem>>, vector<32x128xf32>
    tpu.vector_store %arg11[%c0_166, %c0_167], %465 {strides = array<i32>} : memref<32x128xf32, #tpu.memory_space<vmem>>, vector<32x128xf32>,
    return
  }
  func.func @transform_0(%arg0: i32) -> (i32, i32) {
    %c0_i32 = arith.constant 0 : i32
    %c0_i32_0 = arith.constant 0 : i32
    %c0_i32_1 = arith.constant 0 : i32
    return %c0_i32, %c0_i32_0 : i32, i32
  }
  func.func @transform_1(%arg0: i32) -> (i32, i32, i32) {
    %c0_i32 = arith.constant 0 : i32
    %c0_i32_0 = arith.constant 0 : i32
    %c0_i32_1 = arith.constant 0 : i32
    %c0_i32_2 = arith.constant 0 : i32
    return %c0_i32, %c0_i32_0, %c0_i32_1 : i32, i32, i32
  }
  func.func @transform_2(%arg0: i32) -> (i32, i32) {
    %c0_i32 = arith.constant 0 : i32
    %c0_i32_0 = arith.constant 0 : i32
    %c0_i32_1 = arith.constant 0 : i32
    return %c0_i32, %c0_i32_0 : i32, i32
  }
  func.func @transform_3(%arg0: i32) -> (i32, i32) {
    %c0_i32 = arith.constant 0 : i32
    %c0_i32_0 = arith.constant 0 : i32
    %c0_i32_1 = arith.constant 0 : i32
    return %c0_i32, %c0_i32_0 : i32, i32
  }
  func.func @transform_4(%arg0: i32) -> (i32, i32) {
    %c0_i32 = arith.constant 0 : i32
    %c0_i32_0 = arith.constant 0 : i32
    %c0_i32_1 = arith.constant 0 : i32
    return %c0_i32, %c0_i32_0 : i32, i32
  }
  func.func @transform_5(%arg0: i32) -> (i32, i32) {
    %c0_i32 = arith.constant 0 : i32
    %c0_i32_0 = arith.constant 0 : i32
    %c0_i32_1 = arith.constant 0 : i32
    return %c0_i32, %c0_i32_0 : i32, i32
  }
  func.func @transform_6(%arg0: i32) -> (i32, i32) {
    %c0_i32 = arith.constant 0 : i32
    %c0_i32_0 = arith.constant 0 : i32
    %c0_i32_1 = arith.constant 0 : i32
    return %c0_i32, %c0_i32_0 : i32, i32
  }
  func.func @transform_7(%arg0: i32) -> (i32, i32) {
    %c0_i32 = arith.constant 0 : i32
    %c0_i32_0 = arith.constant 0 : i32
    %c0_i32_1 = arith.constant 0 : i32
    return %c0_i32, %c0_i32_0 : i32, i32
  }
  func.func @transform_8(%arg0: i32) -> (i32, i32) {
    %c0_i32 = arith.constant 0 : i32
    %c0_i32_0 = arith.constant 0 : i32
    %c0_i32_1 = arith.constant 0 : i32
    return %c0_i32, %c0_i32_0 : i32, i32
  }
  func.func @transform_9(%arg0: i32) -> (i32, i32) {
    %c0_i32 = arith.constant 0 : i32
    %c0_i32_0 = arith.constant 0 : i32
    %c0_i32_1 = arith.constant 0 : i32
    return %c0_i32, %c0_i32_0 : i32, i32
  }
  func.func @transform_10(%arg0: i32) -> (i32, i32) {
    %c0_i32 = arith.constant 0 : i32
    %c0_i32_0 = arith.constant 0 : i32
    %c0_i32_1 = arith.constant 0 : i32
    return %c0_i32, %c0_i32_0 : i32, i32
  }
}

</mosaic_0001>

<bundles_post_ra>
// kernel: nn_forward.1
= control target key start
LH: loop header
LB: loop body
LE: loop exit
PB: predicated region body
PF: predicated region fallthrough
CT: control target
= control target key end

     0   :  { %vm208_vm0 = vcmask 588800   ;;  %vm215_vm1 = vcmask 1043456   ;;  %vm7602_vm5 = vmmov 0   ;;  %s9472_s1 = inlined_call_operand.vmem [shape: bf16[3,200,256], index: 1, kind: input, shape index: {}]   ;;  %s9473_s0 = inlined_call_operand.vmem [shape: bf16[32,200], index: 0, kind: input, shape index: {}]   ;;  %s9474_s4 = inlined_call_operand.vmem [shape: bf16[256,384], index: 4, kind: input, shape index: {}]   ;;  %s9475_s6 = inlined_call_operand.vmem [shape: bf16[128,384], index: 6, kind: input, shape index: {}]   ;;  %s9476_s2 = inlined_call_operand.vmem [shape: f32[1,256], index: 2, kind: input, shape index: {}]   ;;  %s9477_s3 = inlined_call_operand.vmem [shape: f32[1,256], index: 3, kind: input, shape index: {}]   ;;  %s9478_s5 = inlined_call_operand.vmem [shape: f32[1,384], index: 5, kind: input, shape index: {}]   ;;  %s9479_s7 = inlined_call_operand.vmem [shape: f32[1,384], index: 7, kind: input, shape index: {}]   ;;  %s9480_s8 = inlined_call_operand.vmem [shape: bf16[128,128], index: 8, kind: input, shape index: {}]   ;;  %s9481_s9 = inlined_call_operand.vmem [shape: f32[1,128], index: 9, kind: input, shape index: {}]   ;;  %s9482_s10 = inlined_call_operand.vmem [shape: f32[32,128], index: 10, kind: output, shape index: {}]  }
   0x1   :  { %v7023_v0 = vld [vmem:[%s9472_s1 + $0x4] ss:$8 sps:$4 sm:$0xff]   ;;  %v7025_v1 = vld [vmem:[%s9472_s1] ss:$8 sps:$4 sm:$0xff]   ;;  %v7028_v3 = vld [vmem:[%s9472_s1 + $0x14] ss:$8 sps:$4 sm:$0xff]  }
   0x2   :  { %222 = vmatprep.subr.bf16.mxu0 %v7023_v0  ;;  %v7026_v2 = vld [vmem:[%s9472_s1 + $0xcc] ss:$8 sps:$4 sm:$0xff]   ;;  %v7030_v4 = vld [vmem:[%s9472_s1 + $0xc8] ss:$8 sps:$4 sm:$0xff]   ;;  %v7032_v6 = vld [vmem:[%s9472_s1 + $0xdc] ss:$8 sps:$4 sm:$0xff]  }
   0x3   :  { %223 = vmatpush1.bf16.msra.mxu0 %v7025_v1  ;;  %v7031_v5 = vld [vmem:[%s9472_s1 + $0x10] ss:$8 sps:$4 sm:$0xff]   ;;  %432 = vmatprep.subr.bf16.mxu1 %v7026_v2  ;;  %v7034_v7 = vld [vmem:[%s9472_s1 + $0x24] ss:$8 sps:$4 sm:$0xff]   ;;  %v7037_v9 = vld [vmem:[%s9472_s1 + $0x20] ss:$8 sps:$4 sm:$0xff]  }
   0x4   :  { %224 = vmatprep.subr.bf16.mxu0 %v7028_v3  ;;  %433 = vmatpush1.bf16.msra.mxu1 %v7030_v4  ;;  %v7036_v8 = vld [vmem:[%s9472_s1 + $0xd8] ss:$8 sps:$4 sm:$0xff]   ;;  %v7038_v10 = vld [vmem:[%s9472_s1 + $0xec] ss:$8 sps:$4 sm:$0xff]   ;;  %v7042_v12 = vld [vmem:[%s9472_s1 + $0xe8] ss:$8 sps:$4 sm:$0xff]  }
   0x5   :  { %434 = vmatprep.subr.bf16.mxu1 %v7032_v6  ;;  %v7040_v11 = vld [vmem:[%s9472_s1 + $0x34] ss:$8 sps:$4 sm:$0xff]   ;;  %v7043_v14 = vld [vmem:[%s9472_s1 + $0x30] ss:$8 sps:$4 sm:$0xff]   ;;  %v7046_v15 = vld [vmem:[%s9472_s1 + $0x44] ss:$8 sps:$4 sm:$0xff]  }
   0x6   :  { %v7044_v13 = vld [vmem:[%s9472_s1 + $0xfc] ss:$8 sps:$4 sm:$0xff]   ;;  %v7048_v16 = vld [vmem:[%s9472_s1 + $0xf8] ss:$8 sps:$4 sm:$0xff]   ;;  %v7050_v17 = vld [vmem:[%s9472_s1 + $0x10c] ss:$8 sps:$4 sm:$0xff]  }
   0x7   :  { %225 = vmatpush1.bf16.msra.mxu0 %v7031_v5  ;;  %v7049_v18 = vld [vmem:[%s9472_s1 + $0x40] ss:$8 sps:$4 sm:$0xff]   ;;  %v7052_v19 = vld [vmem:[%s9472_s1 + $0x54] ss:$8 sps:$4 sm:$0xff]   ;;  %v7055_v22 = vld [vmem:[%s9472_s1 + $0x50] ss:$8 sps:$4 sm:$0xff]  }
   0x8   :  { %226 = vmatprep.subr.bf16.mxu0 %v7034_v7  ;;  %435 = vmatpush1.bf16.msra.mxu1 %v7036_v8  ;;  %v7054_v20 = vld [vmem:[%s9472_s1 + $0x108] ss:$8 sps:$4 sm:$0xff]   ;;  %v7056_v21 = vld [vmem:[%s9472_s1 + $0x11c] ss:$8 sps:$4 sm:$0xff]   ;;  %v7060_v24 = vld [vmem:[%s9472_s1 + $0x118] ss:$8 sps:$4 sm:$0xff]  }
   0x9   :  { %436 = vmatprep.subr.bf16.mxu1 %v7038_v10  ;;  %v7058_v23 = vld [vmem:[%s9472_s1 + $0x64] ss:$8 sps:$4 sm:$0xff]   ;;  %v7061_v26 = vld [vmem:[%s9472_s1 + $0x60] ss:$8 sps:$4 sm:$0xff]   ;;  %v7064_v27 = vld [vmem:[%s9472_s1 + $0x74] ss:$8 sps:$4 sm:$0xff]  }
   0xa   :  { %v7062_v25 = vld [vmem:[%s9472_s1 + $0x12c] ss:$8 sps:$4 sm:$0xff]   ;;  %v7066_v28 = vld [vmem:[%s9472_s1 + $0x128] ss:$8 sps:$4 sm:$0xff]   ;;  %v7068_v29 = vld [vmem:[%s9472_s1 + $0x13c] ss:$8 sps:$4 sm:$0xff]  }
   0xb   :  { %227 = vmatpush1.bf16.msra.mxu0 %v7037_v9  ;;  %v7067_v30 = vld [vmem:[%s9472_s1 + $0x70] ss:$8 sps:$4 sm:$0xff]   ;;  %v7070_v31 = vld [vmem:[%s9472_s1 + $0x84] ss:$8 sps:$4 sm:$0xff]   ;;  %v7073_v34 = vld [vmem:[%s9472_s1 + $0x80] ss:$8 sps:$4 sm:$0xff]  }
   0xc   :  { %228 = vmatprep.subr.bf16.mxu0 %v7040_v11  ;;  %437 = vmatpush1.bf16.msra.mxu1 %v7042_v12  ;;  %v7072_v32 = vld [vmem:[%s9472_s1 + $0x138] ss:$8 sps:$4 sm:$0xff]   ;;  %v7074_v33 = vld [vmem:[%s9472_s1 + $0x14c] ss:$8 sps:$4 sm:$0xff]   ;;  %v7078_v36 = vld [vmem:[%s9472_s1 + $0x148] ss:$8 sps:$4 sm:$0xff]  }
   0xd   :  { %438 = vmatprep.subr.bf16.mxu1 %v7044_v13  ;;  %v7076_v35 = vld [vmem:[%s9472_s1 + $0x94] ss:$8 sps:$4 sm:$0xff]   ;;  %v7772_v37 = vld [vmem:[%s9473_s0 + $0x4] ss:$8 sps:$4 sm:$0xff]   ;;  %v7079_v39 = vld [vmem:[%s9472_s1 + $0x90] ss:$8 sps:$4 sm:$0xff]  }
   0xe   :  { %v7080_v38 = vld [vmem:[%s9472_s1 + $0x15c] ss:$8 sps:$4 sm:$0xff]   ;;  %5915 = vmatprep.mubr.msk.bf16.mxu0 %vm208_vm0, %v7772_v37  ;;  %5969 = vmatprep.mubr.msk.bf16.mxu1 %vm208_vm0, %v7772_v37  ;;  %v7084_v41 = vld [vmem:[%s9472_s1 + $0x158] ss:$8 sps:$4 sm:$0xff]   ;;  %v7086_v42 = vld [vmem:[%s9472_s1 + $0x16c] ss:$8 sps:$4 sm:$0xff]  }
   0xf   :  { %229 = vmatpush1.bf16.msra.mxu0 %v7043_v14  ;;  %v7082_v40 = vld [vmem:[%s9472_s1 + $0xa4] ss:$8 sps:$4 sm:$0xff]   ;;  %v7085_v43 = vld [vmem:[%s9472_s1 + $0xa0] ss:$8 sps:$4 sm:$0xff]   ;;  %v7088_v44 = vld [vmem:[%s9472_s1 + $0xb4] ss:$8 sps:$4 sm:$0xff]  }
  0x10   :  { %230 = vmatprep.subr.bf16.mxu0 %v7046_v15  ;;  %439 = vmatpush1.bf16.msra.mxu1 %v7048_v16  ;;  %v7090_v45 = vld [vmem:[%s9472_s1 + $0x168] ss:$8 sps:$4 sm:$0xff]   ;;  %v64_v47 = vld [vmem:[%s9472_s1 + $0xc0] sm:$0xff]  ;;  %v7104_v56 = vld [vmem:[%s9472_s1 + $0x194] ss:$8 sps:$4 sm:$0xff]  }
  0x11   :  { %440 = vmatprep.subr.bf16.mxu1 %v7050_v17  ;;  %v7091_v46 = vld [vmem:[%s9472_s1 + $0xb0] ss:$8 sps:$4 sm:$0xff]   ;;  %v7092_v48 = vld [vmem:[%s9472_s1 + $0x17c] ss:$8 sps:$4 sm:$0xff]   ;;  %v5941_v49 = vld [vmem:[%s9472_s1 + $0x188] sm:$0xff]  ;;  %v5913_v50 = vcombine.high %v64_v47, %v64_v47  ;;  %v5912_v51 = vcombine.low %v64_v47, %v64_v47 }
  0x12   :  { %v7095_v52 = vld [vmem:[%s9472_s1 + $0x178] ss:$8 sps:$4 sm:$0xff]   ;;  %v5967_v53 = vcombine.high %v5941_v49, %v5941_v49  ;;  %v5966_v54 = vcombine.low %v5941_v49, %v5941_v49  ;;  %v7835_v60 = vld [vmem:[%s9473_s0 + $0x14] ss:$8 sps:$4 sm:$0xff]   ;;  %v7107_v61 = vld [vmem:[%s9472_s1 + $0x1a4] ss:$8 sps:$4 sm:$0xff]  }
  0x13   :  { %231 = vmatpush1.bf16.msra.mxu0 %v7049_v18  ;;  %v217_v55 = vsel %vm215_vm1, %v5912_v51, 0  ;;  %v7826_v57 = vld [vmem:[%s9473_s0] ss:$8 sps:$4 sm:$0xff]   ;;  %v7102_v59 = vld [vmem:[%s9472_s1 + $0x190] ss:$8 sps:$4 sm:$0xff]  }
  0x14   :  { %232 = vmatprep.subr.bf16.mxu0 %v7052_v19  ;;  %441 = vmatpush1.bf16.msra.mxu1 %v7054_v20  ;;  %v427_v58 = vsel %vm215_vm1, %v5966_v54, 0  ;;  %v7105_v62 = vld [vmem:[%s9472_s1 + $0x1a0] ss:$8 sps:$4 sm:$0xff]   ;;  %v7113_v63 = vld [vmem:[%s9472_s1 + $0x1b4] ss:$8 sps:$4 sm:$0xff]  }
  0x15   :  { %442 = vmatprep.subr.bf16.mxu1 %v7056_v21  ;;  %v7110_v0 = vld [vmem:[%s9473_s0 + $0x10] ss:$8 sps:$4 sm:$0xff]   ;;  %v7116_v2 = vld [vmem:[%s9472_s1 + $0x1c4] ss:$8 sps:$4 sm:$0xff]   ;;  %v7114_v3 = vld [vmem:[%s9472_s1 + $0x1c0] ss:$8 sps:$4 sm:$0xff]  }
  0x16   :  { %v7111_v1 = vld [vmem:[%s9472_s1 + $0x1b0] ss:$8 sps:$4 sm:$0xff]   ;;  %v7119_v4 = vld [vmem:[%s9472_s1 + $0x1d4] ss:$8 sps:$4 sm:$0xff]   ;;  %v7122_v6 = vld [vmem:[%s9472_s1 + $0x1e4] ss:$8 sps:$4 sm:$0xff]  }
  0x17   :  { %233 = vmatpush1.bf16.msra.mxu0 %v7055_v22  ;;  %v7117_v5 = vld [vmem:[%s9472_s1 + $0x1d0] ss:$8 sps:$4 sm:$0xff]   ;;  %v7120_v7 = vld [vmem:[%s9472_s1 + $0x1e0] ss:$8 sps:$4 sm:$0xff]   ;;  %v7125_v8 = vld [vmem:[%s9472_s1 + $0x1f4] ss:$8 sps:$4 sm:$0xff]  }
  0x18   :  { %234 = vmatprep.subr.bf16.mxu0 %v7058_v23  ;;  %443 = vmatpush1.bf16.msra.mxu1 %v7060_v24  ;;  %v7123_v9 = vld [vmem:[%s9472_s1 + $0x1f0] ss:$8 sps:$4 sm:$0xff]   ;;  %v7128_v10 = vld [vmem:[%s9472_s1 + $0x204] ss:$8 sps:$4 sm:$0xff]   ;;  %v7126_v11 = vld [vmem:[%s9472_s1 + $0x200] ss:$8 sps:$4 sm:$0xff]  }
  0x19   :  { %444 = vmatprep.subr.bf16.mxu1 %v7062_v25  ;;  %v7131_v12 = vld [vmem:[%s9472_s1 + $0x214] ss:$8 sps:$4 sm:$0xff]   ;;  %v7129_v13 = vld [vmem:[%s9472_s1 + $0x210] ss:$8 sps:$4 sm:$0xff]   ;;  %v7134_v14 = vld [vmem:[%s9472_s1 + $0x224] ss:$8 sps:$4 sm:$0xff]  }
  0x1a   :  { %v7132_v15 = vld [vmem:[%s9472_s1 + $0x220] ss:$8 sps:$4 sm:$0xff]   ;;  %v7137_v16 = vld [vmem:[%s9472_s1 + $0x234] ss:$8 sps:$4 sm:$0xff]   ;;  %v7135_v17 = vld [vmem:[%s9472_s1 + $0x230] ss:$8 sps:$4 sm:$0xff]  }
  0x1b   :  { %235 = vmatpush1.bf16.msra.mxu0 %v7061_v26  ;;  %v7140_v18 = vld [vmem:[%s9472_s1 + $0x244] ss:$8 sps:$4 sm:$0xff]   ;;  %v5995_v19 = vld [vmem:[%s9472_s1 + $0x250] sm:$0xff]  ;;  %v7138_v20 = vld [vmem:[%s9472_s1 + $0x240] ss:$8 sps:$4 sm:$0xff]  }
  0x1c   :  { %236 = vmatprep.subr.bf16.mxu0 %v7064_v27  ;;  %445 = vmatpush1.bf16.msra.mxu1 %v7066_v28  ;;  %v6021_v21 = vcombine.high %v5995_v19, %v5995_v19  ;;  %v6020_v22 = vcombine.low %v5995_v19, %v5995_v19  ;;  %v7145_v24 = vld [vmem:[%s9474_s4 + $0x4] ss:$12 sps:$4 sm:$0xff]   ;;  %v7143_v25 = vld [vmem:[%s9474_s4] ss:$12 sps:$4 sm:$0xff]   ;;  %v7148_v26 = vld [vmem:[%s9474_s4 + $0x1c] ss:$12 sps:$4 sm:$0xff]  }
  0x1d   :  { %446 = vmatprep.subr.bf16.mxu1 %v7068_v29  ;;  %v7146_v27 = vld [vmem:[%s9474_s4 + $0x18] ss:$12 sps:$4 sm:$0xff]   ;;  %v7149_v28 = vld [vmem:[%s9474_s4 + $0x30] ss:$12 sps:$4 sm:$0xff]   ;;  %v7151_v29 = vld [vmem:[%s9474_s4 + $0x34] ss:$12 sps:$4 sm:$0xff]  }
  0x1e   :  { %v637_v23 = vsel %vm215_vm1, %v6020_v22, 0  ;;  %v7172_v47 = vld [vmem:[%s9474_s4 + $0xd8] ss:$12 sps:$4 sm:$0xff]   ;;  %v7177_v49 = vld [vmem:[%s9474_s4 + $0xf0] ss:$12 sps:$4 sm:$0xff]  }
  0x1f   :  { %237 = vmatpush1.bf16.msra.mxu0 %v7067_v30  ;;  %v7154_v30 = vld [vmem:[%s9474_s4 + $0x4c] ss:$12 sps:$4 sm:$0xff]   ;;  %v7185_v54 = vld [vmem:[%s9474_s4 + $0x110] ss:$12 sps:$4 sm:$0xff]  }
  0x20   :  { %238 = vmatprep.subr.bf16.mxu0 %v7070_v31  ;;  %447 = vmatpush1.bf16.msra.mxu1 %v7072_v32  ;;  %v7152_v31 = vld [vmem:[%s9474_s4 + $0x48] ss:$12 sps:$4 sm:$0xff]   ;;  %v7157_v32 = vld [vmem:[%s9474_s4 + $0x64] ss:$12 sps:$4 sm:$0xff]  }
  0x21   :  { %448 = vmatprep.subr.bf16.mxu1 %v7074_v33  ;;  %v7170_v33 = vld [vmem:[%s9474_s4 + $0xc8] ss:$12 sps:$4 sm:$0xff]   ;;  %v7181_v51 = vld [vmem:[%s9474_s4 + $0x38] ss:$12 sps:$4 sm:$0xff]  }
  0x23   :  { %239 = vmatpush1.bf16.msra.mxu0 %v7073_v34  ;;  %v7171_v34 = vld [vmem:[%s9474_s4 + $0x8] ss:$12 sps:$4 sm:$0xff]  }
  0x24   :  { %240 = vmatprep.subr.bf16.mxu0 %v7076_v35  ;;  %449 = vmatpush1.bf16.msra.mxu1 %v7078_v36  ;;  %v7155_v35 = vld [vmem:[%s9474_s4 + $0x60] ss:$12 sps:$4 sm:$0xff]   ;;  %v7160_v36 = vld [vmem:[%s9474_s4 + $0x7c] ss:$12 sps:$4 sm:$0xff]  }
  0x25   :  { %450 = vmatprep.subr.bf16.mxu1 %v7080_v38  ;;  %v7176_v38 = vld [vmem:[%s9474_s4 + $0x20] ss:$12 sps:$4 sm:$0xff]  }
  0x27   :  { %241 = vmatpush1.bf16.msra.mxu0 %v7079_v39  ;;  %v7158_v39 = vld [vmem:[%s9474_s4 + $0x78] ss:$12 sps:$4 sm:$0xff]  }
  0x28   :  { %242 = vmatprep.subr.bf16.mxu0 %v7082_v40  ;;  %451 = vmatpush1.bf16.msra.mxu1 %v7084_v41  ;;  %v7163_v40 = vld [vmem:[%s9474_s4 + $0x94] ss:$12 sps:$4 sm:$0xff]   ;;  %v7161_v41 = vld [vmem:[%s9474_s4 + $0x90] ss:$12 sps:$4 sm:$0xff]  }
  0x29   :  { %452 = vmatprep.subr.bf16.mxu1 %v7086_v42  ;;  %v7166_v42 = vld [vmem:[%s9474_s4 + $0xac] ss:$12 sps:$4 sm:$0xff]  }
  0x2b   :  { %243 = vmatpush1.bf16.msra.mxu0 %v7085_v43  ;;  %v7164_v43 = vld [vmem:[%s9474_s4 + $0xa8] ss:$12 sps:$4 sm:$0xff]  }
  0x2c   :  { %244 = vmatprep.subr.bf16.mxu0 %v7088_v44  ;;  %453 = vmatpush1.bf16.msra.mxu1 %v7090_v45  ;;  %v7169_v44 = vld [vmem:[%s9474_s4 + $0xc4] ss:$12 sps:$4 sm:$0xff]   ;;  %v7167_v45 = vld [vmem:[%s9474_s4 + $0xc0] ss:$12 sps:$4 sm:$0xff]  }
  0x2d   :  { %454 = vmatprep.subr.bf16.mxu1 %v7092_v48  ;;  %v7179_v48 = vld [vmem:[%s9474_s4 + $0xf4] ss:$12 sps:$4 sm:$0xff]  }
  0x2f   :  { %245 = vmatpush1.bf16.msra.mxu0 %v7091_v46  ;;  %v7174_v46 = vld [vmem:[%s9474_s4 + $0xdc] ss:$12 sps:$4 sm:$0xff]  }
  0x30   :  { %5914 = vmatprep.subr.msk.bf16.mxu0 %vm215_vm1, %v5913_v50  ;;  %455 = vmatpush1.bf16.msra.mxu1 %v7095_v52  ;;  %v7180_v50 = vld [vmem:[%s9474_s4 + $0xf8] ss:$12 sps:$4 sm:$0xff]  }
  0x31   :  { %5968 = vmatprep.subr.msk.bf16.mxu1 %vm215_vm1, %v5967_v53  ;;  %v7184_v52 = vld [vmem:[%s9474_s4 + $0x10c] ss:$12 sps:$4 sm:$0xff]   ;;  %v7182_v53 = vld [vmem:[%s9474_s4 + $0x108] ss:$12 sps:$4 sm:$0xff]  }
  0x33   :  { %247 = vmatpush1.bf16.msra.mxu0 %v217_v55  ;;  %v7186_v55 = vld [vmem:[%s9474_s4 + $0x50] ss:$12 sps:$4 sm:$0xff]  }
  0x34   :  { %642 = vmatprep.subr.bf16.mxu0 %v7104_v56  ;;  %457 = vmatpush1.bf16.msra.mxu1 %v427_v58  ;;  %v7189_v56 = vld [vmem:[%s9474_s4 + $0x124] ss:$12 sps:$4 sm:$0xff]   ;;  %v7190_v58 = vld [vmem:[%s9474_s4 + $0x128] ss:$12 sps:$4 sm:$0xff]  }
  0x35   :  { %1162 = vmatprep.subr.bf16.mxu1 %v7145_v24 }
  0x36   :  { %255 = vmatmul.mubr.bf16.vlgmr.msra.gmra.mrb[0].mxu0 %v7826_v57 }
  0x37   :  { %643 = vmatpush1.bf16.msra.mxu0 %v7102_v59  ;;  %5916 = vmatprep.mubr.msk.bf16.mxu0 %vm208_vm0, %v7835_v60  ;;  %v7191_v59 = vld [vmem:[%s9474_s4 + $0x68] ss:$12 sps:$4 sm:$0xff]  }
  0x38   :  { %465 = vmatmul.mubr.bf16.vlgmr.msra.gmra.mrb[0].mxu1 %v7826_v57  ;;  %644 = vmatprep.subr.bf16.mxu0 %v7107_v61  ;;  %v7192_v61 = vld [vmem:[%s9474_s4 + $0x138] ss:$12 sps:$4 sm:$0xff]  }
  0x39   :  { %5970 = vmatprep.mubr.msk.bf16.mxu1 %vm208_vm0, %v7835_v60  ;;  %1163 = vmatpush1.bf16.msra.mxu1 %v7143_v25 }
  0x3a   :  { %1164 = vmatprep.subr.bf16.mxu1 %v7148_v26 }
  0x3b   :  { %645 = vmatpush1.bf16.msra.mxu0 %v7105_v62  ;;  %v7195_v62 = vld [vmem:[%s9474_s4 + $0x140] ss:$12 sps:$4 sm:$0xff]  }
  0x3c   :  { %646 = vmatprep.subr.bf16.mxu0 %v7113_v63  ;;  %v7196_v63 = vld [vmem:[%s9474_s4 + $0x80] ss:$12 sps:$4 sm:$0xff]  }
  0x3d   :  { %1165 = vmatpush1.bf16.msra.mxu1 %v7146_v27 }
  0x3e   :  { %265 = vmatmul.mubr.bf16.gmra.mrb[4].mxu0 %v7110_v0  ;;  %1166 = vmatprep.subr.bf16.mxu1 %v7151_v29 }
  0x3f   :  { %647 = vmatpush1.bf16.msra.mxu0 %v7111_v1  ;;  %6023 = vmatprep.mubr.msk.bf16.mxu0 %vm208_vm0, %v7772_v37  ;;  %v7175_v37 = vld [vmem:[%s9474_s4 + $0xe0] ss:$12 sps:$4 sm:$0xff]   ;;  %v7197_v1 = vld [vmem:[%s9474_s4 + $0x150] ss:$12 sps:$4 sm:$0xff]  }
  0x40   :  { %475 = vmatmul.mubr.bf16.gmra.mrb[4].mxu1 %v7110_v0  ;;  %648 = vmatprep.subr.bf16.mxu0 %v7116_v2  ;;  %v7200_v2 = vld [vmem:[%s9474_s4 + $0x158] ss:$12 sps:$4 sm:$0xff]  }
  0x41   :  { %1167 = vmatpush1.bf16.msra.mxu1 %v7149_v28 }
  0x42   :  { %1168 = vmatprep.subr.bf16.mxu1 %v7154_v30 }
  0x43   :  { %649 = vmatpush1.bf16.msra.mxu0 %v7114_v3  ;;  %v7201_v3 = vld [vmem:[%s9474_s4 + $0x98] ss:$12 sps:$4 sm:$0xff]  }
  0x44   :  { %650 = vmatprep.subr.bf16.mxu0 %v7119_v4  ;;  %v7202_v4 = vld [vmem:[%s9474_s4 + $0x168] ss:$12 sps:$4 sm:$0xff]  }
  0x45   :  { %1169 = vmatpush1.bf16.msra.mxu1 %v7152_v31 }
  0x46   :  { %1170 = vmatprep.subr.bf16.mxu1 %v7157_v32 }
  0x47   :  { %651 = vmatpush1.bf16.msra.mxu0 %v7117_v5  ;;  %v7204_v5 = vld [vmem:[%s9474_s4 + $0x16c] ss:$12 sps:$4 sm:$0xff]  }
  0x48   :  { %652 = vmatprep.subr.bf16.mxu0 %v7122_v6  ;;  %v7205_v6 = vld [vmem:[%s9474_s4 + $0x170] ss:$12 sps:$4 sm:$0xff]  }
  0x49   :  { %1171 = vmatpush1.bf16.msra.mxu1 %v7155_v35 }
  0x4a   :  { %1172 = vmatprep.subr.bf16.mxu1 %v7160_v36 }
  0x4b   :  { %653 = vmatpush1.bf16.msra.mxu0 %v7120_v7  ;;  %v7206_v7 = vld [vmem:[%s9474_s4 + $0xb0] ss:$12 sps:$4 sm:$0xff]  }
  0x4c   :  { %654 = vmatprep.subr.bf16.mxu0 %v7125_v8  ;;  %v8069_v8 = vld [vmem:[%s9475_s6 + $0x4] ss:$12 sps:$4 sm:$0xff]  }
  0x4d   :  { %1173 = vmatpush1.bf16.msra.mxu1 %v7158_v39 }
  0x4e   :  { %1174 = vmatprep.subr.bf16.mxu1 %v7163_v40 }
  0x4f   :  { %655 = vmatpush1.bf16.msra.mxu0 %v7123_v9  ;;  %v7600_v9 = vmov 0.0  }
  0x50   :  { %656 = vmatprep.subr.bf16.mxu0 %v7128_v10  ;;  %v695_v10 = vlaneseq }
  0x51   :  { %1175 = vmatpush1.bf16.msra.mxu1 %v7161_v41 }
  0x52   :  { %1176 = vmatprep.subr.bf16.mxu1 %v7166_v42 }
  0x53   :  { %657 = vmatpush1.bf16.msra.mxu0 %v7126_v11  ;;  %v8073_v11 = vshrl.u32 %v695_v10, 7 }
  0x54   :  { %658 = vmatprep.subr.bf16.mxu0 %v7131_v12 }
  0x55   :  { %1177 = vmatpush1.bf16.msra.mxu1 %v7164_v43  ;;  %vm700_vm2 = vcmp.lt.s32.totalorder %v8073_v11, 2  ;;  %vm740_vm3 = vcmp.lt.s32.totalorder %v8073_v11, 6 }
  0x56   :  { %1178 = vmatprep.subr.bf16.mxu1 %v7169_v44 }
  0x57   :  { %659 = vmatpush1.bf16.msra.mxu0 %v7129_v13 }
  0x58   :  { %660 = vmatprep.subr.bf16.mxu0 %v7134_v14 }
  0x59   :  { %1179 = vmatpush1.bf16.msra.mxu1 %v7167_v45 }
  0x5a   :  { %1180 = vmatprep.subr.bf16.mxu1 %v7174_v46 }
  0x5b   :  { %661 = vmatpush1.bf16.msra.mxu0 %v7132_v15 }
  0x5c   :  { %662 = vmatprep.subr.bf16.mxu0 %v7137_v16 }
  0x5d   :  { %1181 = vmatpush1.bf16.msra.mxu1 %v7172_v47 }
  0x5e   :  { %1182 = vmatprep.subr.bf16.mxu1 %v7179_v48 }
  0x5f   :  { %663 = vmatpush1.bf16.msra.mxu0 %v7135_v17 }
  0x60   :  { %664 = vmatprep.subr.bf16.mxu0 %v7140_v18 }
  0x61   :  { %1183 = vmatpush1.bf16.msra.mxu1 %v7177_v49 }
  0x62   :  { %1184 = vmatprep.subr.bf16.mxu1 %v7184_v52 }
  0x63   :  { %665 = vmatpush1.bf16.msra.mxu0 %v7138_v20 }
  0x64   :  { %6022 = vmatprep.subr.msk.bf16.mxu0 %vm215_vm1, %v6021_v21 }
  0x65   :  { %1185 = vmatpush1.bf16.msra.mxu1 %v7182_v53 }
  0x66   :  { %1186 = vmatprep.subr.bf16.mxu1 %v7189_v56 }
  0x67   :  { %667 = vmatpush1.bf16.msra.mxu0 %v637_v23 }
  0x68   :  { %6498 = vmatprep.subr.bf16.mxu0 %v7170_v33 }
  0x6a   :  { %675 = vmatmul.mubr.bf16.vlgmr.msra.gmra.mrb[8].mxu0 %v7826_v57  ;;  %v7187_v57 = vld [vmem:[%s9474_s4 + $0x120] ss:$12 sps:$4 sm:$0xff]  }
  0x6b   :  { %6024 = vmatprep.mubr.msk.bf16.mxu0 %vm208_vm0, %v7835_v60  ;;  %6499 = vmatpush3.bf16.msra.mxu0 %v7171_v34  ;;  %v7194_v60 = vld [vmem:[%s9474_s4 + $0x13c] ss:$12 sps:$4 sm:$0xff]  }
  0x6c   :  { %6500 = vmatprep.subr.bf16.mxu0 %v7175_v37  ;;  %1187 = vmatpush1.bf16.msra.mxu1 %v7187_v57  ;;  %v8108_v57 = vsub.s32 1, %v8073_v11 }
  0x6d   :  { %1188 = vmatprep.subr.bf16.mxu1 %v7194_v60 }
  0x6f   :  { %6501 = vmatpush3.bf16.msra.mxu0 %v7176_v38 }
  0x70   :  { %6502 = vmatprep.subr.bf16.mxu0 %v7180_v50  ;;  %1189 = vmatpush1.bf16.msra.mxu1 %v7192_v61 }
  0x72   :  { %685 = vmatmul.mubr.bf16.gmra.mrb[12].mxu0 %v7110_v0  ;;  %v7199_v0 = vld [vmem:[%s9474_s4 + $0x154] ss:$12 sps:$4 sm:$0xff]  }
  0x73   :  { %6503 = vmatpush3.bf16.msra.mxu0 %v7181_v51  ;;  %1190 = vmatprep.subr.bf16.mxu1 %v7199_v0 }
  0x74   :  { %6504 = vmatprep.subr.bf16.mxu0 %v7185_v54  ;;  %1191 = vmatpush1.bf16.msra.mxu1 %v7197_v1  ;;  %v8102_v54 = vsub.s32 0, %v8073_v11 }
  0x75   :  { %1192 = vmatprep.subr.bf16.mxu1 %v7204_v5 }
  0x77   :  { %6505 = vmatpush3.bf16.msra.mxu0 %v7186_v55  ;;  %v773_v55 = vld [vmem:[%s9476_s2] sm:$0x3] }
  0x78   :  { %6506 = vmatprep.subr.bf16.mxu0 %v7190_v58  ;;  %1193 = vmatpush1.bf16.msra.mxu1 %v7202_v4  ;;  %v782_v5 = vrot.slane %v773_v55, %v8108_v57 }
  0x79   :  { %1456 = vmatprep.subr.bf16.mxu1 %v8069_v8 }
  0x7b   :  { %6507 = vmatpush3.bf16.msra.mxu0 %v7191_v59  ;;  %v699_v59 = vadd.s32 24, %v8073_v11 }
  0x7c   :  { %6508 = vmatprep.subr.bf16.mxu0 %v7195_v62 }
  0x7d   :  { %vm731_vm4 = vcmp.ge.s32.totalorder %v699_v59, 30 }
  0x7f   :  { %6509 = vmatpush3.bf16.msra.mxu0 %v7196_v63  ;;  %v793_v63 = vld [vmem:[%s9477_s3] sm:$0x3] }
  0x80   :  { %6510 = vmatprep.subr.bf16.mxu0 %v7200_v2  ;;  %v778_v2 = vrot.slane %v773_v55, %v8102_v54 }
  0x83   :  { %6511 = vmatpush3.bf16.msra.mxu0 %v7201_v3 }
  0x84   :  { %6512 = vmatprep.subr.bf16.mxu0 %v7205_v6 }
  0x87   :  { %6513 = vmatpush3.bf16.msra.mxu0 %v7206_v7 }
  0x88   :  { %6680 = vmatprep.subr.bf16.mxu0 %v7600_v9 }
 0x109   :  { %v256_v12 = vpop.f32.mrb[0].mxu0 }
 0x10a   :  { %v704_v13 = vrot.slane %v256_v12, 6  ;;  %v258_v14 = vpop.f32.mrb[1].mxu0 }
 0x10b   :  { %v705_v15 = vrot.slane %v258_v14, 6  ;;  %v260_v16 = vpop.f32.mrb[2].mxu0  ;;  %v466_v17 = vpop.f32.mrb[0].mxu1 }
 0x10c   :  { %v706_v18 = vrot.slane %v260_v16, 6  ;;  %v262_v19 = vpop.f32.mrb[3].mxu0  ;;  %v468_v20 = vpop.f32.mrb[1].mxu1 }
 0x10d   :  { %v707_v21 = vrot.slane %v262_v19, 6  ;;  %v470_v22 = vpop.f32.mrb[2].mxu1 }
 0x10e   :  { %v716_v23 = vsel %vm700_vm2, %v704_v13, %v706_v18  ;;  %v472_v24 = vpop.f32.mrb[3].mxu1 }
 0x10f   :  { %v8078_v25 = vadd.f32 %v716_v23, %v470_v22  ;;  %v717_v26 = vsel %vm700_vm2, %v705_v15, %v707_v21 }
 0x110   :  { %v8082_v27 = vadd.f32 %v717_v26, %v472_v24 }
 0x111   :  { %v266_v28 = vpop.f32.mrb[4].mxu0 }
 0x112   :  { %v708_v29 = vrot.slane %v266_v28, 6  ;;  %v268_v30 = vpop.f32.mrb[5].mxu0 }
 0x113   :  { %v709_v31 = vrot.slane %v268_v30, 6  ;;  %v270_v32 = vpop.f32.mrb[6].mxu0  ;;  %v476_v33 = vpop.f32.mrb[4].mxu1 }
 0x114   :  { %v710_v34 = vrot.slane %v270_v32, 6  ;;  %v272_v35 = vpop.f32.mrb[7].mxu0  ;;  %v714_v36 = vsel %vm700_vm2, %v706_v18, %v708_v29  ;;  %v478_v37 = vpop.f32.mrb[5].mxu1  ;;  %v802_v18 = vrot.slane %v793_v63, %v8108_v57 }
 0x115   :  { %v711_v38 = vrot.slane %v272_v35, 6  ;;  %v761_v39 = vadd.f32 %v714_v36, %v476_v33  ;;  %v715_v40 = vsel %vm700_vm2, %v707_v21, %v709_v31  ;;  %v480_v41 = vpop.f32.mrb[6].mxu1 }
 0x116   :  { %v718_v42 = vsel %vm700_vm2, %v710_v34, %v704_v13  ;;  %v762_v43 = vadd.f32 %v715_v40, %v478_v37  ;;  %v712_v44 = vsel %vm700_vm2, %v708_v29, %v710_v34  ;;  %v482_v45 = vpop.f32.mrb[7].mxu1  ;;  %v798_v13 = vrot.slane %v793_v63, %v8102_v54 }
 0x117   :  { %v720_v46 = vsel %vm700_vm2, 0.0, %v718_v42  ;;  %v719_v47 = vsel %vm700_vm2, %v711_v38, %v705_v15  ;;  %v763_v48 = vadd.f32 %v712_v44, %v480_v41  ;;  %v713_v49 = vsel %vm700_vm2, %v709_v31, %v711_v38 }
 0x118   :  { %v757_v50 = vadd.f32 %v720_v46, %v466_v17  ;;  %v721_v51 = vsel %vm700_vm2, 0.0, %v719_v47  ;;  %v764_v52 = vadd.f32 %v713_v49, %v482_v45 }
 0x119   :  { %v758_v53 = vadd.f32 %v721_v51, %v468_v20 }
 0x13d   :  { %v676_v56 = vpop.f32.mrb[8].mxu0 }
 0x13e   :  { %v678_v58 = vpop.f32.mrb[9].mxu0  ;;  %v732_v60 = vrot.slane %v676_v56, 2 }
 0x13f   :  { %v680_v61 = vpop.f32.mrb[10].mxu0  ;;  %v733_v1 = vrot.slane %v678_v58, 2 }
 0x140   :  { %v734_v62 = vrot.slane %v680_v61, 2  ;;  %v682_v0 = vpop.f32.mrb[11].mxu0 }
 0x141   :  { %v735_v3 = vrot.slane %v682_v0, 2  ;;  %v7228_v0 = vld [vmem:[%s9475_s6 + $0x8] ss:$12 sps:$4 sm:$0xff]  }
 0x142   :  { %v745_v4 = vsel %vm740_vm3, %v732_v60, %v734_v62 }
 0x143   :  { %v765_v6 = vadd.f32 %v757_v50, %v745_v4  ;;  %v746_v7 = vsel %vm740_vm3, %v733_v1, %v735_v3 }
 0x144   :  { %v766_v10 = vadd.f32 %v758_v53, %v746_v7  ;;  %v8164_v7 = vld [vmem:[%s9475_s6 + $0x34] ss:$12 sps:$4 sm:$0xff]  }
 0x145   :  { %v785_v12 = vmul.f32 %v778_v2, %v765_v6  ;;  %v686_v14 = vpop.f32.mrb[12].mxu0  ;;  %v7232_v6 = vld [vmem:[%s9475_s6 + $0x20] ss:$12 sps:$4 sm:$0xff]  }
 0x146   :  { %v786_v15 = vmul.f32 %v782_v5, %v766_v10  ;;  %v736_v16 = vrot.slane %v686_v14, 2  ;;  %v688_v17 = vpop.f32.mrb[13].mxu0  ;;  %v8171_v10 = vld [vmem:[%s9475_s6 + $0x30] ss:$12 sps:$4 sm:$0xff]   ;;  %v8187_v14 = vld [vmem:[%s9475_s6 + $0x48] ss:$12 sps:$4 sm:$0xff]  }
 0x147   :  { %v737_v19 = vrot.slane %v688_v17, 2  ;;  %v690_v20 = vpop.f32.mrb[14].mxu0  ;;  %v805_v24 = vadd.f32 %v798_v13, %v785_v12  ;;  %v8177_v12 = vld [vmem:[%s9475_s6 + $0x4c] ss:$12 sps:$4 sm:$0xff]   ;;  %v7234_v17 = vld [vmem:[%s9475_s6 + $0x50] ss:$12 sps:$4 sm:$0xff]  }
 0x148   :  { %v743_v21 = vsel %vm740_vm3, %v734_v62, %v736_v16  ;;  %v738_v22 = vrot.slane %v690_v20, 2  ;;  %v692_v23 = vpop.f32.mrb[15].mxu0  ;;  %v806_v33 = vadd.f32 %v802_v18, %v786_v15  ;;  %v7601_v15 = vmov 0   ;;  %v7235_v20 = vld [vmem:[%s9475_s6 + $0x68] ss:$12 sps:$4 sm:$0xff]  }
 0x149   :  { %v767_v26 = vadd.f32 %v8078_v25, %v743_v21  ;;  %v744_v28 = vsel %vm740_vm3, %v735_v3, %v737_v19  ;;  %v739_v29 = vrot.slane %v692_v23, 2  ;;  %v813_v50 = vmax.f32 %v805_v24, 0.0  ;;  %v8222_v21 = vld [vmem:[%s9475_s6 + $0x78] ss:$12 sps:$4 sm:$0xff]   ;;  %v7236_v23 = vld [vmem:[%s9475_s6 + $0x80] ss:$12 sps:$4 sm:$0xff]  }
 0x14a   :  { %v768_v30 = vadd.f32 %v8082_v27, %v744_v28  ;;  %v741_v31 = vsel %vm740_vm3, %v736_v16, %v738_v22  ;;  %v747_v32 = vsel %vm740_vm3, %v738_v22, %v732_v60  ;;  %v8194_v16 = vld [vmem:[%s9475_s6 + $0x64] ss:$12 sps:$4 sm:$0xff]   ;;  %v8228_v22 = vld [vmem:[%s9475_s6 + $0x94] ss:$12 sps:$4 sm:$0xff]  }
 0x14b   :  { %v787_v34 = vmul.f32 %v778_v2, %v767_v26  ;;  %v755_v35 = vsel %vm731_vm4, 0.0, %v747_v32  ;;  %v769_v36 = vadd.f32 %v761_v39, %v741_v31  ;;  %v742_v25 = vsel %vm740_vm3, %v737_v19, %v739_v29  ;;  %v8212_v19 = vld [vmem:[%s9475_s6 + $0x7c] ss:$12 sps:$4 sm:$0xff]   ;;  %v8244_v26 = vld [vmem:[%s9475_s6 + $0xac] ss:$12 sps:$4 sm:$0xff]  }
 0x14c   :  { %v788_v37 = vmul.f32 %v782_v5, %v768_v30  ;;  %v771_v38 = vadd.f32 %v763_v48, %v755_v35  ;;  %v748_v40 = vsel %vm740_vm3, %v739_v29, %v733_v1  ;;  %v770_v27 = vadd.f32 %v762_v43, %v742_v25  ;;  %v8141_v43 = vld [vmem:[%s9475_s6] ss:$12 sps:$4 sm:$0xff]   ;;  %v8149_v1 = vld [vmem:[%s9475_s6 + $0x1c] ss:$12 sps:$4 sm:$0xff]   ;;  %v7237_v28 = vld [vmem:[%s9475_s6 + $0x98] ss:$12 sps:$4 sm:$0xff]  }
 0x14d   :  { %v807_v41 = vadd.f32 %v798_v13, %v787_v34  ;;  %v789_v42 = vmul.f32 %v778_v2, %v769_v36  ;;  %v756_v44 = vsel %vm731_vm4, 0.0, %v748_v40  ;;  %v814_v39 = vmax.f32 %v806_v33, 0.0  ;;  %v8238_v24 = vld [vmem:[%s9475_s6 + $0x90] ss:$12 sps:$4 sm:$0xff]   ;;  %v8254_v29 = vld [vmem:[%s9475_s6 + $0xa8] ss:$12 sps:$4 sm:$0xff]  }
 0x14e   :  { %v772_v45 = vadd.f32 %v764_v52, %v756_v44  ;;  %v790_v46 = vmul.f32 %v782_v5, %v770_v27  ;;  %v808_v47 = vadd.f32 %v802_v18, %v788_v37  ;;  %v791_v49 = vmul.f32 %v778_v2, %v771_v38  ;;  %v7238_v30 = vld [vmem:[%s9475_s6 + $0xb0] ss:$12 sps:$4 sm:$0xff]   ;;  %v7239_v31 = vld [vmem:[%s9475_s6 + $0x8] ss:$12 sps:$4 sm:$0xff]   ;;  %v7240_v32 = vld [vmem:[%s9475_s6 + $0x20] ss:$12 sps:$4 sm:$0xff]  }
 0x14f   :  { %v815_v51 = vmax.f32 %v807_v41, 0.0  ;;  %v809_v53 = vadd.f32 %v798_v13, %v789_v42  ;;  %v7241_v33 = vld [vmem:[%s9475_s6 + $0x38] ss:$12 sps:$4 sm:$0xff]   ;;  %v7242_v34 = vld [vmem:[%s9475_s6 + $0x50] ss:$12 sps:$4 sm:$0xff]   ;;  %v901_v40 = vsub.s32 2, %v8073_v11 }
 0x150   :  { %v816_v55 = vmax.f32 %v808_v47, 0.0  ;;  %v792_v56 = vmul.f32 %v782_v5, %v772_v45  ;;  %v810_v58 = vadd.f32 %v802_v18, %v790_v46  ;;  %v811_v48 = vadd.f32 %v798_v13, %v791_v49  ;;  %v8155_v5 = vld [vmem:[%s9475_s6 + $0x18] ss:$12 sps:$4 sm:$0xff]   ;;  %v7243_v35 = vld [vmem:[%s9475_s6 + $0x68] ss:$12 sps:$4 sm:$0xff]  }
 0x151   :  { %v821_v60 = vpack.c.bf16 %v815_v51, %v813_v50  ;;  %v817_v61 = vmax.f32 %v809_v53, 0.0  ;;  %v7233_v13 = vld [vmem:[%s9475_s6 + $0x38] ss:$12 sps:$4 sm:$0xff]   ;;  %v7244_v36 = vld [vmem:[%s9475_s6 + $0x80] ss:$12 sps:$4 sm:$0xff]  }
 0x152   :  { %v822_v62 = vpack.c.bf16 %v816_v55, %v814_v39  ;;  %v812_v52 = vadd.f32 %v802_v18, %v792_v56  ;;  %v818_v59 = vmax.f32 %v810_v58, 0.0  ;;  %v819_v63 = vmax.f32 %v811_v48, 0.0  ;;  %v8206_v18 = vld [vmem:[%s9475_s6 + $0x60] ss:$12 sps:$4 sm:$0xff]   ;;  %v7245_v25 = vld [vmem:[%s9475_s6 + $0x98] ss:$12 sps:$4 sm:$0xff]  }
 0x153   :  { %v7246_v37 = vld [vmem:[%s9475_s6 + $0xb0] ss:$12 sps:$4 sm:$0xff]   ;;  %v889_v38 = vld [vmem:[%s9478_s5] sm:$0x7] }
 0x154   :  { %1194 = vmatprep.mubr.bf16.mxu1 %v822_v62  ;;  %1247 = vmatprep.mubr.bf16.mxu0 %v822_v62  ;;  %v820_v2 = vmax.f32 %v812_v52, 0.0  ;;  %v823_v3 = vpack.c.bf16 %v819_v63, %v817_v61  ;;  %v894_v27 = vrot.slane %v889_v38, %v8102_v54  ;;  %v898_v41 = vrot.slane %v889_v38, %v8108_v57 }
 0x155   :  { %1195 = vmatmul.mubr.bf16.vlgmr.msra.gmra.mrb[8].mxu1 %v821_v60  ;;  %1248 = vmatmul.mubr.bf16.vlgmr.msra.gmra.mrb[16].mxu0 %v821_v60  ;;  %v902_v45 = vrot.slane %v889_v38, %v901_v40 }
 0x156   :  { %1457 = vmatpush1.bf16.msra.mxu1 %v8141_v43  ;;  %v824_v4 = vpack.c.bf16 %v820_v2, %v818_v59  ;;  %6681 = vmatpush3.bf16.msra.mxu0 %v7228_v0 }
 0x157   :  { %1458 = vmatprep.subr.bf16.mxu1 %v8149_v1  ;;  %6682 = vmatprep.subr.bf16.mxu0 %v7600_v9 }
 0x158   :  { %1204 = vmatprep.mubr.bf16.mxu1 %v824_v4  ;;  %1255 = vmatprep.mubr.bf16.mxu0 %v824_v4 }
 0x15a   :  { %1459 = vmatpush1.bf16.msra.mxu1 %v8155_v5  ;;  %6683 = vmatpush3.bf16.msra.mxu0 %v7232_v6 }
 0x15b   :  { %1460 = vmatprep.subr.bf16.mxu1 %v8164_v7  ;;  %6684 = vmatprep.subr.bf16.mxu0 %v7600_v9 }
 0x15d   :  { %1205 = vmatmul.mubr.bf16.gmra.mrb[12].mxu1 %v823_v3  ;;  %1256 = vmatmul.mubr.bf16.gmra.mrb[20].mxu0 %v823_v3 }
 0x15e   :  { %1461 = vmatpush1.bf16.msra.mxu1 %v8171_v10  ;;  %1488 = vmatprep.mubr.bf16.mxu1 %v7601_v15 }
 0x15f   :  { %1462 = vmatprep.subr.bf16.mxu1 %v8177_v12  ;;  %6685 = vmatpush3.bf16.msra.mxu0 %v7233_v13 }
 0x160   :  { %6686 = vmatprep.subr.bf16.mxu0 %v7600_v9  ;;  %6696 = vmatprep.mubr.msk.bf16.mxu0 %vm7602_vm5, %v7600_v9 }
 0x162   :  { %1463 = vmatpush1.bf16.msra.mxu1 %v8187_v14 }
 0x163   :  { %1464 = vmatprep.subr.bf16.mxu1 %v8194_v16  ;;  %6687 = vmatpush3.bf16.msra.mxu0 %v7234_v17 }
 0x164   :  { %6688 = vmatprep.subr.bf16.mxu0 %v7600_v9 }
 0x166   :  { %1465 = vmatpush1.bf16.msra.mxu1 %v8206_v18 }
 0x167   :  { %1466 = vmatprep.subr.bf16.mxu1 %v8212_v19  ;;  %6689 = vmatpush3.bf16.msra.mxu0 %v7235_v20 }
 0x168   :  { %6690 = vmatprep.subr.bf16.mxu0 %v7600_v9 }
 0x16a   :  { %1467 = vmatpush1.bf16.msra.mxu1 %v8222_v21 }
 0x16b   :  { %1468 = vmatprep.subr.bf16.mxu1 %v8228_v22  ;;  %6691 = vmatpush3.bf16.msra.mxu0 %v7236_v23 }
 0x16c   :  { %6692 = vmatprep.subr.bf16.mxu0 %v7600_v9 }
 0x16e   :  { %1469 = vmatpush1.bf16.msra.mxu1 %v8238_v24 }
 0x16f   :  { %1470 = vmatprep.subr.bf16.mxu1 %v8244_v26  ;;  %6693 = vmatpush3.bf16.msra.mxu0 %v7237_v28 }
 0x170   :  { %6694 = vmatprep.subr.bf16.mxu0 %v7600_v9 }
 0x172   :  { %1471 = vmatpush1.bf16.msra.mxu1 %v8254_v29 }
 0x173   :  { %6695 = vmatpush3.bf16.msra.mxu0 %v7238_v30  ;;  %1723 = vmatprep.subr.bf16.mxu1 %v8069_v8  ;;  %v8287_v8 = vld [vmem:[%s9475_s6 + $0x4] ss:$12 sps:$4 sm:$0xff]  }
 0x174   :  { %6700 = vmatprep.subr.bf16.mxu0 %v7600_v9 }
 0x175   :  { %1489 = vmatmul.mubr.bf16.vlgmr.msra.gmra.mrb[16].mxu1 %v7601_v15 }
 0x176   :  { %6697 = vmatmul.mubr.bf16.vlgmr.msra.gmra.mrb[24].mxu0 %v7601_v15  ;;  %1724 = vmatpush1.bf16.msra.mxu1 %v8141_v43 }
 0x177   :  { %1725 = vmatprep.subr.bf16.mxu1 %v8149_v1  ;;  %1755 = vmatprep.mubr.bf16.mxu1 %v7601_v15 }
 0x178   :  { %6716 = vmatprep.mubr.msk.bf16.mxu0 %vm7602_vm5, %v7600_v9  ;;  %6701 = vmatpush3.bf16.msra.mxu0 %v7239_v31 }
 0x179   :  { %6702 = vmatprep.subr.bf16.mxu0 %v7600_v9 }
 0x17a   :  { %1726 = vmatpush1.bf16.msra.mxu1 %v8155_v5 }
 0x17b   :  { %1727 = vmatprep.subr.bf16.mxu1 %v8164_v7 }
 0x17c   :  { %6703 = vmatpush3.bf16.msra.mxu0 %v7240_v32 }
 0x17d   :  { %6704 = vmatprep.subr.bf16.mxu0 %v7600_v9 }
 0x17e   :  { %1728 = vmatpush1.bf16.msra.mxu1 %v8171_v10 }
 0x17f   :  { %1729 = vmatprep.subr.bf16.mxu1 %v8177_v12 }
 0x180   :  { %6705 = vmatpush3.bf16.msra.mxu0 %v7241_v33  ;;  %v1276_v33 = vld [vmem:[%s9479_s7] sm:$0x7] }
 0x181   :  { %6706 = vmatprep.subr.bf16.mxu0 %v7600_v9 }
 0x182   :  { %1730 = vmatpush1.bf16.msra.mxu1 %v8187_v14 }
 0x183   :  { %1731 = vmatprep.subr.bf16.mxu1 %v8194_v16 }
 0x184   :  { %6707 = vmatpush3.bf16.msra.mxu0 %v7242_v34  ;;  %v8334_v34 = vrot.slane %v1276_v33, %v8102_v54 }
 0x185   :  { %6708 = vmatprep.subr.bf16.mxu0 %v7600_v9 }
 0x186   :  { %1732 = vmatpush1.bf16.msra.mxu1 %v8206_v18 }
 0x187   :  { %1733 = vmatprep.subr.bf16.mxu1 %v8212_v19 }
 0x188   :  { %6709 = vmatpush3.bf16.msra.mxu0 %v7243_v35  ;;  %v8337_v35 = vrot.slane %v1276_v33, %v8108_v57 }
 0x189   :  { %6710 = vmatprep.subr.bf16.mxu0 %v7600_v9 }
 0x18a   :  { %1734 = vmatpush1.bf16.msra.mxu1 %v8222_v21 }
 0x18b   :  { %1735 = vmatprep.subr.bf16.mxu1 %v8228_v22 }
 0x18c   :  { %6711 = vmatpush3.bf16.msra.mxu0 %v7244_v36 }
 0x18d   :  { %6712 = vmatprep.subr.bf16.mxu0 %v7600_v9 }
 0x18e   :  { %1736 = vmatpush1.bf16.msra.mxu1 %v8238_v24 }
 0x18f   :  { %1737 = vmatprep.subr.bf16.mxu1 %v8244_v26 }
 0x190   :  { %6713 = vmatpush3.bf16.msra.mxu0 %v7245_v25 }
 0x191   :  { %6714 = vmatprep.subr.bf16.mxu0 %v7600_v9 }
 0x192   :  { %1738 = vmatpush1.bf16.msra.mxu1 %v8254_v29 }
 0x193   :  { %2005 = vmatprep.subr.bf16.mxu1 %v8287_v8 }
 0x194   :  { %6715 = vmatpush3.bf16.msra.mxu0 %v7246_v37 }
 0x195   :  { %6720 = vmatprep.subr.bf16.mxu0 %v7600_v9 }
 0x228   :  { %v1196_v42 = vpop.f32.mrb[8].mxu1  ;;  %v6514_v44 = vpop.f32.mrb[16].mxu0 }
 0x229   :  { %v1197_v46 = vadd.f32 %v1196_v42, %v894_v27  ;;  %v1198_v47 = vpop.f32.mrb[9].mxu1  ;;  %v6515_v49 = vpop.f32.mrb[17].mxu0 }
 0x22a   :  { %v1199_v50 = vadd.f32 %v1198_v47, %v898_v41  ;;  %v6516_v51 = vadd.f32 %v6515_v49, %v6514_v44  ;;  %v1200_v39 = vpop.f32.mrb[10].mxu1  ;;  %v6517_v53 = vpop.f32.mrb[18].mxu0 }
 0x22b   :  { %1264 = vst [vmem:[#allocation2] sm:$0xff] %v1197_v46  ;;  %v1201_v55 = vadd.f32 %v1200_v39, %v894_v27  ;;  %v1202_v56 = vpop.f32.mrb[11].mxu1  ;;  %v6518_v58 = vpop.f32.mrb[19].mxu0 }
 0x22c   :  { %1265 = vst [vmem:[#allocation2 + $0x8] sm:$0xff] %v1199_v50  ;;  %v1250_v48 = vadd.f32 %v6516_v51, %v902_v45  ;;  %v1203_v60 = vadd.f32 %v1202_v56, %v898_v41  ;;  %v6519_v61 = vadd.f32 %v6518_v58, %v6517_v53 }
 0x22d   :  { %1267 = vst [vmem:[#allocation2 + $0x18] sm:$0xff] %v1201_v55  ;;  %v8343_v55 = vrot.slane %v1276_v33, %v901_v40  ;;  %v7247_v40 = vld [vmem:[%s9475_s6 + $0x8] ss:$12 sps:$4 sm:$0xff]  }
 0x22e   :  { %1266 = vst [vmem:[#allocation2 + $0x10] sm:$0xff] %v1250_v48  ;;  %1268 = vst [vmem:[#allocation2 + $0x20] sm:$0xff] %v1203_v60  ;;  %v1253_v62 = vadd.f32 %v6519_v61, %v902_v45 }
 0x230   :  { %1269 = vst [vmem:[#allocation2 + $0x28] sm:$0xff] %v1253_v62  ;;  %v1206_v52 = vpop.f32.mrb[12].mxu1  ;;  %v6520_v59 = vpop.f32.mrb[20].mxu0 }
 0x231   :  { %v1207_v63 = vadd.f32 %v1206_v52, %v894_v27  ;;  %v1208_v0 = vpop.f32.mrb[13].mxu1  ;;  %v6521_v2 = vpop.f32.mrb[21].mxu0 }
 0x232   :  { %v1209_v3 = vadd.f32 %v1208_v0, %v898_v41  ;;  %v6522_v4 = vadd.f32 %v6521_v2, %v6520_v59  ;;  %v1210_v6 = vpop.f32.mrb[14].mxu1  ;;  %v6523_v13 = vpop.f32.mrb[22].mxu0 }
 0x233   :  { %1270 = vst [vmem:[#allocation2 + $0x30] sm:$0xff] %v1207_v63  ;;  %v1211_v17 = vadd.f32 %v1210_v6, %v894_v27  ;;  %v1212_v20 = vpop.f32.mrb[15].mxu1  ;;  %v6524_v23 = vpop.f32.mrb[23].mxu0  ;;  %v1293_v27 = vld [vmem:[#allocation2] sm:$0x3] }
 0x234   :  { %1271 = vst [vmem:[#allocation2 + $0x38] sm:$0xff] %v1209_v3  ;;  %v1258_v28 = vadd.f32 %v6522_v4, %v902_v45  ;;  %v1213_v30 = vadd.f32 %v1212_v20, %v898_v41  ;;  %v6525_v31 = vadd.f32 %v6524_v23, %v6523_v13  ;;  %v1294_v54 = vld [vmem:[#allocation2 + $0x8] sm:$0x3]  ;;  %v7248_v6 = vld [vmem:[%s9475_s6 + $0x20] ss:$12 sps:$4 sm:$0xff]  }
 0x235   :  { %1273 = vst [vmem:[#allocation2 + $0x48] sm:$0xff] %v1211_v17  ;;  %v1295_v62 = vld [vmem:[#allocation2 + $0x10] sm:$0x3]  ;;  %v7249_v13 = vld [vmem:[%s9475_s6 + $0x38] ss:$12 sps:$4 sm:$0xff]  }
 0x236   :  { %1272 = vst [vmem:[#allocation2 + $0x40] sm:$0xff] %v1258_v28  ;;  %1274 = vst [vmem:[#allocation2 + $0x50] sm:$0xff] %v1213_v30  ;;  %v1261_v32 = vadd.f32 %v6525_v31, %v902_v45  ;;  %v7251_v17 = vld [vmem:[%s9475_s6 + $0x68] ss:$12 sps:$4 sm:$0xff]   ;;  %v7252_v20 = vld [vmem:[%s9475_s6 + $0x80] ss:$12 sps:$4 sm:$0xff]  }
 0x237   :  { %v7253_v23 = vld [vmem:[%s9475_s6 + $0x98] ss:$12 sps:$4 sm:$0xff]   ;;  %v7254_v28 = vld [vmem:[%s9475_s6 + $0xb0] ss:$12 sps:$4 sm:$0xff]  }
 0x238   :  { %1275 = vst [vmem:[#allocation2 + $0x58] sm:$0xff] %v1261_v32 }
 0x248   :  { %v1490_v36 = vpop.f32.mrb[16].mxu1 }
 0x249   :  { %v1491_v25 = vadd.f32 %v1490_v36, %v8334_v34  ;;  %v1492_v37 = vpop.f32.mrb[17].mxu1  ;;  %v1531_v38 = vpop.f32.mrb[24].mxu0 }
 0x24a   :  { %v1493_v41 = vadd.f32 %v1492_v37, %v8337_v35  ;;  %v1494_v42 = vpop.f32.mrb[18].mxu1  ;;  %v6698_v44 = vpop.f32.mrb[25].mxu0  ;;  %v1532_v48 = vadd.f32 %v1531_v38, %v8343_v55 }
 0x24b   :  { %v1537_v45 = vadd.f32 %v1491_v25, %v1293_v27  ;;  %v1495_v46 = vpop.f32.mrb[19].mxu1  ;;  %v1534_v47 = vpop.f32.mrb[26].mxu0  ;;  %v1559_v44 = vld [vmem:[#allocation2] sm:$0xc] }
 0x24c   :  { %v6699_v49 = vpop.f32.mrb[27].mxu0  ;;  %v1538_v51 = vadd.f32 %v1493_v41, %v1294_v54  ;;  %v1560_v47 = vld [vmem:[#allocation2 + $0x8] sm:$0xc] }
 0x24d   :  { %v6097_v50 = vmul.f32 -1.442695, %v1537_v45 }
 0x24e   :  { %v6098_v57 = vmul.f32 -1.442695, %v1538_v51 }
 0x24f   :  { %7439 = vpow2.f32 %v6097_v50 }
 0x250   :  { %7441 = vpow2.f32 %v6098_v57 }
 0x259   :  { %v7440_v39 = vpop.eup %7439 }
 0x25a   :  { %v1545_v53 = vadd.f32 1.0, %v7440_v39  ;;  %v7442_v56 = vpop.eup %7441 }
 0x25b   :  { %v1546_v58 = vadd.f32 1.0, %v7442_v56 }
 0x25c   :  { %7443 = vrcp.f32 %v1545_v53 }
 0x25d   :  { %7445 = vrcp.f32 %v1546_v58 }
 0x266   :  { %v7444_v60 = vpop.eup %7443 }
 0x267   :  { %v1551_v61 = vmul.f32 %v7444_v60, %v1532_v48  ;;  %v7446_v59 = vpop.eup %7445 }
 0x268   :  { %v1554_v63 = vsub.f32 1.0, %v7446_v59  ;;  %v1556_v3 = vmul.f32 0.0, %v7446_v59 }
 0x269   :  { %v1552_v52 = vadd.f32 %v1551_v61, %v1295_v62 }
 0x26b   :  { %7447 = vtanh.f32 %v1552_v52  ;;  %v1561_v52 = vld [vmem:[#allocation2 + $0x10] sm:$0xc] }
 0x275   :  { %v7448_v0 = vpop.eup %7447 }
 0x276   :  { %v1555_v2 = vmul.f32 %v7448_v0, %v1554_v63 }
 0x278   :  { %v8346_v4 = vadd.f32 %v1556_v3, %v1555_v2 }
 0x27a   :  { %1558 = vst [vmem:[#allocation3] sm:$0x3] %v8346_v4  ;;  %v1562_v11 = vpack.c.bf16 %v8346_v4, %v8346_v4  ;;  %v1833_v60 = vrot.slane %v8346_v4, 6 }
 0x27c   :  { %1756 = vmatmul.mubr.bf16.vlgmr.msra.gmra.mrb[20].mxu1 %v1562_v11  ;;  %6717 = vmatmul.mubr.bf16.vlgmr.msra.gmra.mrb[28].mxu0 %v1562_v11 }
 0x27d   :  { %2006 = vmatpush1.bf16.msra.mxu1 %v8141_v43  ;;  %2037 = vmatprep.mubr.bf16.mxu1 %v7601_v15 }
 0x27e   :  { %2007 = vmatprep.subr.bf16.mxu1 %v8149_v1  ;;  %6736 = vmatprep.mubr.msk.bf16.mxu0 %vm7602_vm5, %v7600_v9 }
 0x27f   :  { %6721 = vmatpush3.bf16.msra.mxu0 %v7247_v40 }
 0x280   :  { %6722 = vmatprep.subr.bf16.mxu0 %v7600_v9 }
 0x281   :  { %2008 = vmatpush1.bf16.msra.mxu1 %v8155_v5 }
 0x282   :  { %2009 = vmatprep.subr.bf16.mxu1 %v8164_v7 }
 0x283   :  { %6723 = vmatpush3.bf16.msra.mxu0 %v7248_v6 }
 0x284   :  { %6724 = vmatprep.subr.bf16.mxu0 %v7600_v9 }
 0x285   :  { %2010 = vmatpush1.bf16.msra.mxu1 %v8171_v10 }
 0x286   :  { %2011 = vmatprep.subr.bf16.mxu1 %v8177_v12 }
 0x287   :  { %6725 = vmatpush3.bf16.msra.mxu0 %v7249_v13 }
 0x288   :  { %6726 = vmatprep.subr.bf16.mxu0 %v7600_v9 }
 0x289   :  { %2012 = vmatpush1.bf16.msra.mxu1 %v8187_v14 }
 0x28a   :  { %2013 = vmatprep.subr.bf16.mxu1 %v8194_v16 }
 0x28d   :  { %2014 = vmatpush1.bf16.msra.mxu1 %v8206_v18 }
 0x28e   :  { %2015 = vmatprep.subr.bf16.mxu1 %v8212_v19 }
 0x291   :  { %2016 = vmatpush1.bf16.msra.mxu1 %v8222_v21 }
 0x292   :  { %2017 = vmatprep.subr.bf16.mxu1 %v8228_v22 }
 0x295   :  { %2018 = vmatpush1.bf16.msra.mxu1 %v8238_v24 }
 0x296   :  { %2019 = vmatprep.subr.bf16.mxu1 %v8244_v26 }
 0x299   :  { %2020 = vmatpush1.bf16.msra.mxu1 %v8254_v29 }
 0x29a   :  { %2287 = vmatprep.subr.bf16.mxu1 %v8287_v8  ;;  %v7250_v8 = vld [vmem:[%s9475_s6 + $0x50] ss:$12 sps:$4 sm:$0xff]  }
 0x29b   :  { %6727 = vmatpush3.bf16.msra.mxu0 %v7250_v8 }
 0x29c   :  { %6728 = vmatprep.subr.bf16.mxu0 %v7600_v9 }
 0x29f   :  { %6729 = vmatpush3.bf16.msra.mxu0 %v7251_v17 }
 0x2a0   :  { %6730 = vmatprep.subr.bf16.mxu0 %v7600_v9 }
 0x2a3   :  { %6731 = vmatpush3.bf16.msra.mxu0 %v7252_v20  ;;  %v1838_v20 = vld [vmem:[#allocation2] sm:$0x30] }
 0x2a4   :  { %6732 = vmatprep.subr.bf16.mxu0 %v7600_v9 }
 0x2a7   :  { %6733 = vmatpush3.bf16.msra.mxu0 %v7253_v23 }
 0x2a8   :  { %6734 = vmatprep.subr.bf16.mxu0 %v7600_v9 }
 0x2ab   :  { %6735 = vmatpush3.bf16.msra.mxu0 %v7254_v28 }
 0x2ac   :  { %6740 = vmatprep.subr.bf16.mxu0 %v7600_v9 }
 0x34f   :  { %v1757_v30 = vpop.f32.mrb[20].mxu1  ;;  %v1798_v31 = vpop.f32.mrb[28].mxu0 }
 0x350   :  { %v1758_v32 = vadd.f32 %v1757_v30, %v8334_v34  ;;  %v1759_v33 = vpop.f32.mrb[21].mxu1  ;;  %v6718_v36 = vpop.f32.mrb[29].mxu0  ;;  %v1799_v56 = vadd.f32 %v1798_v31, %v8343_v55  ;;  %v1839_v30 = vld [vmem:[#allocation2 + $0x8] sm:$0x30] }
 0x351   :  { %v1760_v25 = vadd.f32 %v1759_v33, %v8337_v35  ;;  %v1761_v37 = vpop.f32.mrb[22].mxu1  ;;  %v1801_v38 = vpop.f32.mrb[30].mxu0 }
 0x352   :  { %v1806_v27 = vrot.slane %v1758_v32, 6  ;;  %v1762_v41 = vpop.f32.mrb[23].mxu1  ;;  %v6719_v42 = vpop.f32.mrb[31].mxu0  ;;  %v1825_v58 = vrot.slane %v1799_v56, 6 }
 0x353   :  { %v1807_v45 = vrot.slane %v1760_v25, 6 }
 0x354   :  { %v1810_v46 = vadd.f32 %v1806_v27, %v1559_v44 }
 0x355   :  { %v1811_v49 = vadd.f32 %v1807_v45, %v1560_v47  ;;  %v1840_v47 = vld [vmem:[#allocation2 + $0x10] sm:$0x30] }
 0x356   :  { %v6123_v50 = vmul.f32 -1.442695, %v1810_v46 }
 0x357   :  { %v6124_v54 = vmul.f32 -1.442695, %v1811_v49 }
 0x358   :  { %7449 = vpow2.f32 %v6123_v50 }
 0x359   :  { %7451 = vpow2.f32 %v6124_v54 }
 0x362   :  { %v7450_v51 = vpop.eup %7449 }
 0x363   :  { %v7452_v57 = vpop.eup %7451  ;;  %v1818_v39 = vadd.f32 1.0, %v7450_v51 }
 0x364   :  { %v1819_v53 = vadd.f32 1.0, %v7452_v57 }
 0x365   :  { %7453 = vrcp.f32 %v1818_v39 }
 0x366   :  { %7455 = vrcp.f32 %v1819_v53 }
 0x36f   :  { %v7454_v48 = vpop.eup %7453 }
 0x370   :  { %v7456_v61 = vpop.eup %7455  ;;  %v1827_v62 = vmul.f32 %v7454_v48, %v1825_v58  ;;  %v8476_v58 = vld [vmem:[%s9475_s6 + $0x4] ss:$12 sps:$4 sm:$0xff]   ;;  %v8481_v48 = vld [vmem:[%s9475_s6] ss:$12 sps:$4 sm:$0xff]  }
 0x371   :  { %v1835_v59 = vmul.f32 %v7456_v61, %v1833_v60  ;;  %v1830_v0 = vsub.f32 1.0, %v7456_v61  ;;  %v7266_v60 = vld [vmem:[%s9475_s6 + $0x8] ss:$12 sps:$4 sm:$0xff]  }
 0x372   :  { %v1828_v63 = vadd.f32 %v1827_v62, %v1561_v52  ;;  %v8491_v61 = vld [vmem:[%s9475_s6 + $0x1c] ss:$12 sps:$4 sm:$0xff]   ;;  %v8497_v62 = vld [vmem:[%s9475_s6 + $0x18] ss:$12 sps:$4 sm:$0xff]   ;;  %v7270_v52 = vld [vmem:[%s9475_s6 + $0x20] ss:$12 sps:$4 sm:$0xff]  }
 0x374   :  { %7457 = vtanh.f32 %v1828_v63  ;;  %v8513_v63 = vld [vmem:[%s9475_s6 + $0x30] ss:$12 sps:$4 sm:$0xff]  }
 0x37e   :  { %v7458_v2 = vpop.eup %7457 }
 0x37f   :  { %v1831_v3 = vmul.f32 %v7458_v2, %v1830_v0  ;;  %v7274_v0 = vld [vmem:[%s9475_s6 + $0x38] ss:$12 sps:$4 sm:$0xff]  }
 0x380   :  { %v8523_v2 = vld [vmem:[%s9475_s6 + $0x4c] ss:$12 sps:$4 sm:$0xff]  }
 0x381   :  { %v8406_v11 = vadd.f32 %v1835_v59, %v1831_v3  ;;  %v8507_v59 = vld [vmem:[%s9475_s6 + $0x34] ss:$12 sps:$4 sm:$0xff]  }
 0x382   :  { %v8529_v3 = vld [vmem:[%s9475_s6 + $0x48] ss:$12 sps:$4 sm:$0xff]  }
 0x383   :  { %1837 = vst [vmem:[#allocation3] sm:$0xc] %v8406_v11  ;;  %v1841_v40 = vpack.c.bf16 %v8406_v11, %v8406_v11  ;;  %v2115_v44 = vrot.slane %v8406_v11, 6  ;;  %v7278_v11 = vld [vmem:[%s9475_s6 + $0x50] ss:$12 sps:$4 sm:$0xff]  }
 0x385   :  { %v1875_v6 = vrot.slane %v1841_v40, 1  ;;  %v8538_v40 = vld [vmem:[%s9475_s6 + $0x64] ss:$12 sps:$4 sm:$0xff]  }
 0x387   :  { %2038 = vmatmul.mubr.bf16.vlgmr.msra.gmra.mrb[24].mxu1 %v1875_v6  ;;  %6737 = vmatmul.mubr.bf16.vlgmr.msra.gmra.mrb[32].mxu0 %v1875_v6  ;;  %v8544_v6 = vld [vmem:[%s9475_s6 + $0x60] ss:$12 sps:$4 sm:$0xff]  }
 0x388   :  { %2288 = vmatpush1.bf16.msra.mxu1 %v8141_v43  ;;  %2319 = vmatprep.mubr.bf16.mxu1 %v7601_v15  ;;  %v7255_v43 = vld [vmem:[%s9475_s6 + $0x8] ss:$12 sps:$4 sm:$0xff]  }
 0x389   :  { %2289 = vmatprep.subr.bf16.mxu1 %v8149_v1  ;;  %6756 = vmatprep.mubr.msk.bf16.mxu0 %vm7602_vm5, %v7600_v9  ;;  %v7256_v1 = vld [vmem:[%s9475_s6 + $0x20] ss:$12 sps:$4 sm:$0xff]  }
 0x38a   :  { %6741 = vmatpush3.bf16.msra.mxu0 %v7255_v43  ;;  %v7282_v43 = vld [vmem:[%s9475_s6 + $0x68] ss:$12 sps:$4 sm:$0xff]  }
 0x38b   :  { %6742 = vmatprep.subr.bf16.mxu0 %v7600_v9 }
 0x38c   :  { %2290 = vmatpush1.bf16.msra.mxu1 %v8155_v5  ;;  %v7257_v5 = vld [vmem:[%s9475_s6 + $0x38] ss:$12 sps:$4 sm:$0xff]  }
 0x38d   :  { %2291 = vmatprep.subr.bf16.mxu1 %v8164_v7  ;;  %v7258_v7 = vld [vmem:[%s9475_s6 + $0x50] ss:$12 sps:$4 sm:$0xff]  }
 0x38e   :  { %6743 = vmatpush3.bf16.msra.mxu0 %v7256_v1  ;;  %v8554_v1 = vld [vmem:[%s9475_s6 + $0x7c] ss:$12 sps:$4 sm:$0xff]  }
 0x38f   :  { %6744 = vmatprep.subr.bf16.mxu0 %v7600_v9 }
 0x390   :  { %2292 = vmatpush1.bf16.msra.mxu1 %v8171_v10  ;;  %v7259_v10 = vld [vmem:[%s9475_s6 + $0x68] ss:$12 sps:$4 sm:$0xff]  }
 0x391   :  { %2293 = vmatprep.subr.bf16.mxu1 %v8177_v12  ;;  %v7260_v12 = vld [vmem:[%s9475_s6 + $0x80] ss:$12 sps:$4 sm:$0xff]  }
 0x392   :  { %6745 = vmatpush3.bf16.msra.mxu0 %v7257_v5  ;;  %v8560_v5 = vld [vmem:[%s9475_s6 + $0x78] ss:$12 sps:$4 sm:$0xff]  }
 0x393   :  { %6746 = vmatprep.subr.bf16.mxu0 %v7600_v9 }
 0x394   :  { %2294 = vmatpush1.bf16.msra.mxu1 %v8187_v14  ;;  %v7261_v14 = vld [vmem:[%s9475_s6 + $0x98] ss:$12 sps:$4 sm:$0xff]  }
 0x395   :  { %2295 = vmatprep.subr.bf16.mxu1 %v8194_v16  ;;  %v7262_v16 = vld [vmem:[%s9475_s6 + $0xb0] ss:$12 sps:$4 sm:$0xff]  }
 0x396   :  { %6747 = vmatpush3.bf16.msra.mxu0 %v7258_v7  ;;  %v7286_v7 = vld [vmem:[%s9475_s6 + $0x80] ss:$12 sps:$4 sm:$0xff]  }
 0x397   :  { %6748 = vmatprep.subr.bf16.mxu0 %v7600_v9 }
 0x398   :  { %2296 = vmatpush1.bf16.msra.mxu1 %v8206_v18 }
 0x399   :  { %2297 = vmatprep.subr.bf16.mxu1 %v8212_v19 }
 0x39a   :  { %6749 = vmatpush3.bf16.msra.mxu0 %v7259_v10  ;;  %v8570_v10 = vld [vmem:[%s9475_s6 + $0x94] ss:$12 sps:$4 sm:$0xff]  }
 0x39b   :  { %6750 = vmatprep.subr.bf16.mxu0 %v7600_v9 }
 0x39c   :  { %2298 = vmatpush1.bf16.msra.mxu1 %v8222_v21 }
 0x39d   :  { %2299 = vmatprep.subr.bf16.mxu1 %v8228_v22 }
 0x39e   :  { %6751 = vmatpush3.bf16.msra.mxu0 %v7260_v12  ;;  %v8576_v12 = vld [vmem:[%s9475_s6 + $0x90] ss:$12 sps:$4 sm:$0xff]  }
 0x39f   :  { %6752 = vmatprep.subr.bf16.mxu0 %v7600_v9 }
 0x3a0   :  { %2300 = vmatpush1.bf16.msra.mxu1 %v8238_v24 }
 0x3a1   :  { %2301 = vmatprep.subr.bf16.mxu1 %v8244_v26 }
 0x3a2   :  { %6753 = vmatpush3.bf16.msra.mxu0 %v7261_v14  ;;  %v7290_v14 = vld [vmem:[%s9475_s6 + $0x98] ss:$12 sps:$4 sm:$0xff]  }
 0x3a3   :  { %6754 = vmatprep.subr.bf16.mxu0 %v7600_v9 }
 0x3a4   :  { %2302 = vmatpush1.bf16.msra.mxu1 %v8254_v29 }
 0x3a5   :  { %2569 = vmatprep.subr.bf16.mxu1 %v8476_v58 }
 0x3a6   :  { %6755 = vmatpush3.bf16.msra.mxu0 %v7262_v16  ;;  %v8586_v16 = vld [vmem:[%s9475_s6 + $0xac] ss:$12 sps:$4 sm:$0xff]  }
 0x3a7   :  { %6760 = vmatprep.subr.bf16.mxu0 %v7600_v9 }
 0x45a   :  { %v2039_v18 = vpop.f32.mrb[24].mxu1  ;;  %v2080_v19 = vpop.f32.mrb[32].mxu0 }
 0x45b   :  { %v2040_v21 = vadd.f32 %v2039_v18, %v8334_v34  ;;  %v2041_v22 = vpop.f32.mrb[25].mxu1  ;;  %v6738_v24 = vpop.f32.mrb[33].mxu0  ;;  %v2081_v27 = vadd.f32 %v2080_v19, %v8343_v55  ;;  %v8592_v18 = vld [vmem:[%s9475_s6 + $0xa8] ss:$12 sps:$4 sm:$0xff]   ;;  %v7294_v19 = vld [vmem:[%s9475_s6 + $0xb0] ss:$12 sps:$4 sm:$0xff]  }
 0x45c   :  { %v2042_v26 = vadd.f32 %v2041_v22, %v8337_v35  ;;  %v2043_v29 = vpop.f32.mrb[26].mxu1  ;;  %v2083_v4 = vpop.f32.mrb[34].mxu0 }
 0x45d   :  { %v2088_v13 = vrot.slane %v2040_v21, 4  ;;  %v2044_v8 = vpop.f32.mrb[27].mxu1  ;;  %v6739_v17 = vpop.f32.mrb[35].mxu0  ;;  %v2107_v41 = vrot.slane %v2081_v27, 4 }
 0x45e   :  { %v2089_v23 = vrot.slane %v2042_v26, 4 }
 0x45f   :  { %v2092_v28 = vadd.f32 %v2088_v13, %v1838_v20 }
 0x460   :  { %v2093_v31 = vadd.f32 %v2089_v23, %v1839_v30 }
 0x461   :  { %v6149_v32 = vmul.f32 -1.442695, %v2092_v28  ;;  %v2120_v28 = vld [vmem:[#allocation2] sm:$0xc0] }
 0x462   :  { %v6150_v33 = vmul.f32 -1.442695, %v2093_v31 }
 0x463   :  { %7459 = vpow2.f32 %v6149_v32  ;;  %v2121_v32 = vld [vmem:[#allocation2 + $0x8] sm:$0xc0] }
 0x464   :  { %7461 = vpow2.f32 %v6150_v33 }
 0x46d   :  { %v7460_v36 = vpop.eup %7459 }
 0x46e   :  { %v7462_v25 = vpop.eup %7461  ;;  %v2100_v37 = vadd.f32 1.0, %v7460_v36 }
 0x46f   :  { %v2101_v38 = vadd.f32 1.0, %v7462_v25 }
 0x470   :  { %7463 = vrcp.f32 %v2100_v37 }
 0x471   :  { %7465 = vrcp.f32 %v2101_v38 }
 0x47a   :  { %v7464_v42 = vpop.eup %7463 }
 0x47b   :  { %v7466_v45 = vpop.eup %7465  ;;  %v2109_v46 = vmul.f32 %v7464_v42, %v2107_v41 }
 0x47c   :  { %v2117_v49 = vmul.f32 %v7466_v45, %v2115_v44  ;;  %v2112_v54 = vsub.f32 1.0, %v7466_v45 }
 0x47d   :  { %v2110_v50 = vadd.f32 %v2109_v46, %v1840_v47 }
 0x47f   :  { %7467 = vtanh.f32 %v2110_v50  ;;  %v2122_v50 = vld [vmem:[#allocation2 + $0x10] sm:$0xc0] }
 0x489   :  { %v7468_v51 = vpop.eup %7467 }
 0x48a   :  { %v2113_v57 = vmul.f32 %v7468_v51, %v2112_v54 }
 0x48c   :  { %v8465_v39 = vadd.f32 %v2117_v49, %v2113_v57 }
 0x48e   :  { %2119 = vst [vmem:[#allocation3] sm:$0x30] %v8465_v39  ;;  %v2123_v53 = vpack.c.bf16 %v8465_v39, %v8465_v39  ;;  %v2397_v46 = vrot.slane %v8465_v39, 6  ;;  %v7295_v39 = vld [vmem:[%s9475_s6 + $0x8] ss:$12 sps:$4 sm:$0xff]  }
 0x490   :  { %v2157_v56 = vrot.slane %v2123_v53, 2 }
 0x492   :  { %2320 = vmatmul.mubr.bf16.vlgmr.msra.gmra.mrb[28].mxu1 %v2157_v56  ;;  %6757 = vmatmul.mubr.bf16.vlgmr.msra.gmra.mrb[36].mxu0 %v2157_v56 }
 0x493   :  { %2601 = vmatprep.mubr.bf16.mxu1 %v7601_v15  ;;  %6776 = vmatprep.mubr.msk.bf16.mxu0 %vm7602_vm5, %v7600_v9 }
 0x494   :  { %2570 = vmatpush1.bf16.msra.mxu1 %v8481_v48  ;;  %6761 = vmatpush3.bf16.msra.mxu0 %v7266_v60 }
 0x495   :  { %6762 = vmatprep.subr.bf16.mxu0 %v7600_v9  ;;  %2571 = vmatprep.subr.bf16.mxu1 %v8491_v61 }
 0x498   :  { %2572 = vmatpush1.bf16.msra.mxu1 %v8497_v62  ;;  %6763 = vmatpush3.bf16.msra.mxu0 %v7270_v52 }
 0x499   :  { %6764 = vmatprep.subr.bf16.mxu0 %v7600_v9  ;;  %2573 = vmatprep.subr.bf16.mxu1 %v8507_v59 }
 0x49c   :  { %2574 = vmatpush1.bf16.msra.mxu1 %v8513_v63  ;;  %6765 = vmatpush3.bf16.msra.mxu0 %v7274_v0 }
 0x49d   :  { %6766 = vmatprep.subr.bf16.mxu0 %v7600_v9  ;;  %2575 = vmatprep.subr.bf16.mxu1 %v8523_v2 }
 0x4a0   :  { %2576 = vmatpush1.bf16.msra.mxu1 %v8529_v3  ;;  %6767 = vmatpush3.bf16.msra.mxu0 %v7278_v11  ;;  %v7296_v11 = vld [vmem:[%s9475_s6 + $0x20] ss:$12 sps:$4 sm:$0xff]  }
 0x4a1   :  { %2577 = vmatprep.subr.bf16.mxu1 %v8538_v40  ;;  %6768 = vmatprep.subr.bf16.mxu0 %v7600_v9 }
 0x4a4   :  { %2578 = vmatpush1.bf16.msra.mxu1 %v8544_v6  ;;  %6769 = vmatpush3.bf16.msra.mxu0 %v7282_v43  ;;  %v7297_v43 = vld [vmem:[%s9475_s6 + $0x38] ss:$12 sps:$4 sm:$0xff]  }
 0x4a5   :  { %2579 = vmatprep.subr.bf16.mxu1 %v8554_v1  ;;  %6770 = vmatprep.subr.bf16.mxu0 %v7600_v9 }
 0x4a8   :  { %2580 = vmatpush1.bf16.msra.mxu1 %v8560_v5  ;;  %6771 = vmatpush3.bf16.msra.mxu0 %v7286_v7  ;;  %v7298_v7 = vld [vmem:[%s9475_s6 + $0x50] ss:$12 sps:$4 sm:$0xff]  }
 0x4a9   :  { %2581 = vmatprep.subr.bf16.mxu1 %v8570_v10  ;;  %6772 = vmatprep.subr.bf16.mxu0 %v7600_v9 }
 0x4ac   :  { %2582 = vmatpush1.bf16.msra.mxu1 %v8576_v12  ;;  %6773 = vmatpush3.bf16.msra.mxu0 %v7290_v14  ;;  %v7299_v14 = vld [vmem:[%s9475_s6 + $0x68] ss:$12 sps:$4 sm:$0xff]  }
 0x4ad   :  { %2583 = vmatprep.subr.bf16.mxu1 %v8586_v16  ;;  %6774 = vmatprep.subr.bf16.mxu0 %v7600_v9 }
 0x4b0   :  { %2584 = vmatpush1.bf16.msra.mxu1 %v8592_v18  ;;  %6775 = vmatpush3.bf16.msra.mxu0 %v7294_v19  ;;  %v7300_v19 = vld [vmem:[%s9475_s6 + $0x80] ss:$12 sps:$4 sm:$0xff]  }
 0x4b1   :  { %2839 = vmatprep.subr.bf16.mxu1 %v8476_v58  ;;  %6780 = vmatprep.subr.bf16.mxu0 %v7600_v9 }
 0x565   :  { %v2321_v21 = vpop.f32.mrb[28].mxu1  ;;  %v2362_v22 = vpop.f32.mrb[36].mxu0 }
 0x566   :  { %v2322_v24 = vadd.f32 %v2321_v21, %v8334_v34  ;;  %v2323_v26 = vpop.f32.mrb[29].mxu1  ;;  %v6758_v29 = vpop.f32.mrb[37].mxu0  ;;  %v2363_v42 = vadd.f32 %v2362_v22, %v8343_v55  ;;  %v7301_v21 = vld [vmem:[%s9475_s6 + $0x98] ss:$12 sps:$4 sm:$0xff]   ;;  %v7302_v22 = vld [vmem:[%s9475_s6 + $0xb0] ss:$12 sps:$4 sm:$0xff]  }
 0x567   :  { %v2324_v4 = vadd.f32 %v2323_v26, %v8337_v35  ;;  %v2325_v13 = vpop.f32.mrb[30].mxu1  ;;  %v2365_v8 = vpop.f32.mrb[38].mxu0 }
 0x568   :  { %v2370_v17 = vrot.slane %v2322_v24, 2  ;;  %v2326_v20 = vpop.f32.mrb[31].mxu1  ;;  %v6759_v23 = vpop.f32.mrb[39].mxu0  ;;  %v2389_v44 = vrot.slane %v2363_v42, 2  ;;  %v2402_v8 = vld [vmem:[#allocation2 + $0x18] sm:$0x3] }
 0x569   :  { %v2371_v30 = vrot.slane %v2324_v4, 2 }
 0x56a   :  { %v2374_v31 = vadd.f32 %v2370_v17, %v2120_v28 }
 0x56b   :  { %v2375_v33 = vadd.f32 %v2371_v30, %v2121_v32  ;;  %v2403_v30 = vld [vmem:[#allocation2 + $0x20] sm:$0x3] }
 0x56c   :  { %v6175_v36 = vmul.f32 -1.442695, %v2374_v31 }
 0x56d   :  { %v6176_v25 = vmul.f32 -1.442695, %v2375_v33 }
 0x56e   :  { %7469 = vpow2.f32 %v6175_v36 }
 0x56f   :  { %7471 = vpow2.f32 %v6176_v25 }
 0x578   :  { %v7470_v37 = vpop.eup %7469 }
 0x579   :  { %v7472_v38 = vpop.eup %7471  ;;  %v2382_v27 = vadd.f32 1.0, %v7470_v37 }
 0x57a   :  { %v2383_v41 = vadd.f32 1.0, %v7472_v38 }
 0x57b   :  { %7473 = vrcp.f32 %v2382_v27 }
 0x57c   :  { %7475 = vrcp.f32 %v2383_v41 }
 0x585   :  { %v7474_v45 = vpop.eup %7473 }
 0x586   :  { %v7476_v47 = vpop.eup %7475  ;;  %v2391_v49 = vmul.f32 %v7474_v45, %v2389_v44 }
 0x587   :  { %v2399_v54 = vmul.f32 %v7476_v47, %v2397_v46  ;;  %v2394_v57 = vsub.f32 1.0, %v7476_v47 }
 0x588   :  { %v2392_v51 = vadd.f32 %v2391_v49, %v2122_v50  ;;  %v2404_v49 = vld [vmem:[#allocation2 + $0x28] sm:$0x3] }
 0x58a   :  { %7477 = vtanh.f32 %v2392_v51 }
 0x594   :  { %v7478_v53 = vpop.eup %7477 }
 0x595   :  { %v2395_v56 = vmul.f32 %v7478_v53, %v2394_v57 }
 0x597   :  { %v8606_v60 = vadd.f32 %v2399_v54, %v2395_v56 }
 0x599   :  { %2401 = vst [vmem:[#allocation3] sm:$0xc0] %v8606_v60  ;;  %v2405_v52 = vpack.c.bf16 %v8606_v60, %v8606_v60  ;;  %v2670_v45 = vrot.slane %v8606_v60, 6  ;;  %v7303_v60 = vld [vmem:[%s9475_s6 + $0x8] ss:$12 sps:$4 sm:$0xff]  }
 0x59b   :  { %v2439_v0 = vrot.slane %v2405_v52, 3 }
 0x59d   :  { %2602 = vmatmul.mubr.bf16.vlgmr.msra.gmra.mrb[32].mxu1 %v2439_v0  ;;  %6777 = vmatmul.mubr.bf16.vlgmr.msra.gmra.mrb[40].mxu0 %v2439_v0  ;;  %v7304_v0 = vld [vmem:[%s9475_s6 + $0x20] ss:$12 sps:$4 sm:$0xff]  }
 0x59e   :  { %2840 = vmatpush1.bf16.msra.mxu1 %v8481_v48  ;;  %2871 = vmatprep.mubr.bf16.mxu1 %v7601_v15 }
 0x59f   :  { %2841 = vmatprep.subr.bf16.mxu1 %v8491_v61  ;;  %6796 = vmatprep.mubr.msk.bf16.mxu0 %vm7602_vm5, %v7600_v9 }
 0x5a0   :  { %6781 = vmatpush3.bf16.msra.mxu0 %v7295_v39  ;;  %v7305_v39 = vld [vmem:[%s9475_s6 + $0x38] ss:$12 sps:$4 sm:$0xff]  }
 0x5a1   :  { %6782 = vmatprep.subr.bf16.mxu0 %v7600_v9 }
 0x5a2   :  { %2842 = vmatpush1.bf16.msra.mxu1 %v8497_v62 }
 0x5a3   :  { %2843 = vmatprep.subr.bf16.mxu1 %v8507_v59 }
 0x5a4   :  { %6783 = vmatpush3.bf16.msra.mxu0 %v7296_v11  ;;  %v7307_v11 = vld [vmem:[%s9475_s6 + $0x68] ss:$12 sps:$4 sm:$0xff]  }
 0x5a5   :  { %6784 = vmatprep.subr.bf16.mxu0 %v7600_v9 }
 0x5a6   :  { %2844 = vmatpush1.bf16.msra.mxu1 %v8513_v63 }
 0x5a7   :  { %2845 = vmatprep.subr.bf16.mxu1 %v8523_v2 }
 0x5a8   :  { %6785 = vmatpush3.bf16.msra.mxu0 %v7297_v43  ;;  %v7308_v43 = vld [vmem:[%s9475_s6 + $0x80] ss:$12 sps:$4 sm:$0xff]  }
 0x5a9   :  { %6786 = vmatprep.subr.bf16.mxu0 %v7600_v9 }
 0x5aa   :  { %2846 = vmatpush1.bf16.msra.mxu1 %v8529_v3 }
 0x5ab   :  { %2847 = vmatprep.subr.bf16.mxu1 %v8538_v40 }
 0x5ac   :  { %6787 = vmatpush3.bf16.msra.mxu0 %v7298_v7  ;;  %v7309_v7 = vld [vmem:[%s9475_s6 + $0x98] ss:$12 sps:$4 sm:$0xff]  }
 0x5ad   :  { %6788 = vmatprep.subr.bf16.mxu0 %v7600_v9 }
 0x5ae   :  { %2848 = vmatpush1.bf16.msra.mxu1 %v8544_v6 }
 0x5af   :  { %2849 = vmatprep.subr.bf16.mxu1 %v8554_v1 }
 0x5b0   :  { %6789 = vmatpush3.bf16.msra.mxu0 %v7299_v14  ;;  %v7310_v14 = vld [vmem:[%s9475_s6 + $0xb0] ss:$12 sps:$4 sm:$0xff]  }
 0x5b1   :  { %6790 = vmatprep.subr.bf16.mxu0 %v7600_v9 }
 0x5b2   :  { %2850 = vmatpush1.bf16.msra.mxu1 %v8560_v5 }
 0x5b3   :  { %2851 = vmatprep.subr.bf16.mxu1 %v8570_v10 }
 0x5b4   :  { %6791 = vmatpush3.bf16.msra.mxu0 %v7300_v19 }
 0x5b5   :  { %6792 = vmatprep.subr.bf16.mxu0 %v7600_v9 }
 0x5b6   :  { %2852 = vmatpush1.bf16.msra.mxu1 %v8576_v12 }
 0x5b7   :  { %2853 = vmatprep.subr.bf16.mxu1 %v8586_v16 }
 0x5b8   :  { %6793 = vmatpush3.bf16.msra.mxu0 %v7301_v21 }
 0x5b9   :  { %6794 = vmatprep.subr.bf16.mxu0 %v7600_v9 }
 0x5ba   :  { %2854 = vmatpush1.bf16.msra.mxu1 %v8592_v18 }
 0x5bb   :  { %3121 = vmatprep.subr.bf16.mxu1 %v8476_v58 }
 0x5bc   :  { %6795 = vmatpush3.bf16.msra.mxu0 %v7302_v22 }
 0x5bd   :  { %6800 = vmatprep.subr.bf16.mxu0 %v7600_v9 }
 0x670   :  { %v2603_v24 = vpop.f32.mrb[32].mxu1  ;;  %v2644_v26 = vpop.f32.mrb[40].mxu0 }
 0x671   :  { %v2604_v29 = vadd.f32 %v2603_v24, %v8334_v34  ;;  %v2605_v4 = vpop.f32.mrb[33].mxu1  ;;  %v6778_v13 = vpop.f32.mrb[41].mxu0  ;;  %v2645_v42 = vadd.f32 %v2644_v26, %v8343_v55 }
 0x672   :  { %v2606_v17 = vadd.f32 %v2605_v4, %v8337_v35  ;;  %v2607_v20 = vpop.f32.mrb[34].mxu1  ;;  %v2647_v23 = vpop.f32.mrb[42].mxu0 }
 0x673   :  { %v2650_v28 = vadd.f32 %v2604_v29, %v2402_v8  ;;  %v2608_v31 = vpop.f32.mrb[35].mxu1  ;;  %v6779_v32 = vpop.f32.mrb[43].mxu0  ;;  %v2675_v23 = vld [vmem:[#allocation2 + $0x18] sm:$0xc] }
 0x674   :  { %v2651_v33 = vadd.f32 %v2606_v17, %v2403_v30  ;;  %v2676_v31 = vld [vmem:[#allocation2 + $0x20] sm:$0xc] }
 0x675   :  { %v6201_v36 = vmul.f32 -1.442695, %v2650_v28 }
 0x676   :  { %v6202_v25 = vmul.f32 -1.442695, %v2651_v33 }
 0x677   :  { %7479 = vpow2.f32 %v6201_v36 }
 0x678   :  { %7481 = vpow2.f32 %v6202_v25 }
 0x681   :  { %v7480_v37 = vpop.eup %7479 }
 0x682   :  { %v7482_v38 = vpop.eup %7481  ;;  %v2658_v27 = vadd.f32 1.0, %v7480_v37 }
 0x683   :  { %v2659_v41 = vadd.f32 1.0, %v7482_v38 }
 0x684   :  { %7483 = vrcp.f32 %v2658_v27 }
 0x685   :  { %7485 = vrcp.f32 %v2659_v41 }
 0x68e   :  { %v7484_v44 = vpop.eup %7483 }
 0x68f   :  { %v7486_v46 = vpop.eup %7485  ;;  %v2664_v47 = vmul.f32 %v7484_v44, %v2645_v42 }
 0x690   :  { %v2672_v50 = vmul.f32 %v7486_v46, %v2670_v45  ;;  %v2667_v51 = vsub.f32 1.0, %v7486_v46 }
 0x691   :  { %v2665_v54 = vadd.f32 %v2664_v47, %v2404_v49  ;;  %v2677_v49 = vld [vmem:[#allocation2 + $0x28] sm:$0xc] }
 0x693   :  { %7487 = vtanh.f32 %v2665_v54 }
 0x69d   :  { %v7488_v57 = vpop.eup %7487 }
 0x69e   :  { %v2668_v53 = vmul.f32 %v7488_v57, %v2667_v51 }
 0x6a0   :  { %v8666_v56 = vadd.f32 %v2672_v50, %v2668_v53 }
 0x6a2   :  { %2674 = vst [vmem:[#allocation3 + $0x8] sm:$0x3] %v8666_v56  ;;  %v2678_v52 = vpack.c.bf16 %v8666_v56, %v8666_v56  ;;  %v2949_v45 = vrot.slane %v8666_v56, 6 }
 0x6a4   :  { %2872 = vmatmul.mubr.bf16.vlgmr.msra.gmra.mrb[36].mxu1 %v2678_v52  ;;  %6797 = vmatmul.mubr.bf16.vlgmr.msra.gmra.mrb[44].mxu0 %v2678_v52 }
 0x6a5   :  { %3122 = vmatpush1.bf16.msra.mxu1 %v8481_v48  ;;  %3153 = vmatprep.mubr.bf16.mxu1 %v7601_v15 }
 0x6a6   :  { %3123 = vmatprep.subr.bf16.mxu1 %v8491_v61  ;;  %6816 = vmatprep.mubr.msk.bf16.mxu0 %vm7602_vm5, %v7600_v9 }
 0x6a7   :  { %6801 = vmatpush3.bf16.msra.mxu0 %v7303_v60 }
 0x6a8   :  { %6802 = vmatprep.subr.bf16.mxu0 %v7600_v9 }
 0x6a9   :  { %3124 = vmatpush1.bf16.msra.mxu1 %v8497_v62 }
 0x6aa   :  { %3125 = vmatprep.subr.bf16.mxu1 %v8507_v59 }
 0x6ab   :  { %6803 = vmatpush3.bf16.msra.mxu0 %v7304_v0 }
 0x6ac   :  { %6804 = vmatprep.subr.bf16.mxu0 %v7600_v9 }
 0x6ad   :  { %3126 = vmatpush1.bf16.msra.mxu1 %v8513_v63 }
 0x6ae   :  { %3127 = vmatprep.subr.bf16.mxu1 %v8523_v2 }
 0x6af   :  { %6805 = vmatpush3.bf16.msra.mxu0 %v7305_v39 }
 0x6b0   :  { %6806 = vmatprep.subr.bf16.mxu0 %v7600_v9 }
 0x6b1   :  { %3128 = vmatpush1.bf16.msra.mxu1 %v8529_v3 }
 0x6b2   :  { %3129 = vmatprep.subr.bf16.mxu1 %v8538_v40 }
 0x6b5   :  { %3130 = vmatpush1.bf16.msra.mxu1 %v8544_v6 }
 0x6b6   :  { %3131 = vmatprep.subr.bf16.mxu1 %v8554_v1 }
 0x6b9   :  { %3132 = vmatpush1.bf16.msra.mxu1 %v8560_v5 }
 0x6ba   :  { %3133 = vmatprep.subr.bf16.mxu1 %v8570_v10 }
 0x6bd   :  { %3134 = vmatpush1.bf16.msra.mxu1 %v8576_v12 }
 0x6be   :  { %3135 = vmatprep.subr.bf16.mxu1 %v8586_v16 }
 0x6c1   :  { %3136 = vmatpush1.bf16.msra.mxu1 %v8592_v18 }
 0x6c2   :  { %3403 = vmatprep.subr.bf16.mxu1 %v8476_v58  ;;  %v7306_v58 = vld [vmem:[%s9475_s6 + $0x50] ss:$12 sps:$4 sm:$0xff]  }
 0x6c3   :  { %6807 = vmatpush3.bf16.msra.mxu0 %v7306_v58 }
 0x6c4   :  { %6808 = vmatprep.subr.bf16.mxu0 %v7600_v9 }
 0x6c7   :  { %6809 = vmatpush3.bf16.msra.mxu0 %v7307_v11 }
 0x6c8   :  { %6810 = vmatprep.subr.bf16.mxu0 %v7600_v9 }
 0x6cb   :  { %6811 = vmatpush3.bf16.msra.mxu0 %v7308_v43  ;;  %v2954_v43 = vld [vmem:[#allocation2 + $0x18] sm:$0x30] }
 0x6cc   :  { %6812 = vmatprep.subr.bf16.mxu0 %v7600_v9 }
 0x6cf   :  { %6813 = vmatpush3.bf16.msra.mxu0 %v7309_v7 }
 0x6d0   :  { %6814 = vmatprep.subr.bf16.mxu0 %v7600_v9 }
 0x6d3   :  { %6815 = vmatpush3.bf16.msra.mxu0 %v7310_v14 }
 0x6d4   :  { %6820 = vmatprep.subr.bf16.mxu0 %v7600_v9 }
 0x777   :  { %v2873_v19 = vpop.f32.mrb[36].mxu1  ;;  %v2914_v21 = vpop.f32.mrb[44].mxu0 }
 0x778   :  { %v2874_v22 = vadd.f32 %v2873_v19, %v8334_v34  ;;  %v2875_v24 = vpop.f32.mrb[37].mxu1  ;;  %v6798_v26 = vpop.f32.mrb[45].mxu0  ;;  %v2915_v41 = vadd.f32 %v2914_v21, %v8343_v55  ;;  %v2955_v19 = vld [vmem:[#allocation2 + $0x20] sm:$0x30] }
 0x779   :  { %v2876_v29 = vadd.f32 %v2875_v24, %v8337_v35  ;;  %v2877_v4 = vpop.f32.mrb[38].mxu1  ;;  %v2917_v13 = vpop.f32.mrb[46].mxu0 }
 0x77a   :  { %v2922_v8 = vrot.slane %v2874_v22, 6  ;;  %v2878_v17 = vpop.f32.mrb[39].mxu1  ;;  %v6799_v20 = vpop.f32.mrb[47].mxu0  ;;  %v2941_v42 = vrot.slane %v2915_v41, 6 }
 0x77b   :  { %v2923_v28 = vrot.slane %v2876_v29, 6 }
 0x77c   :  { %v2926_v30 = vadd.f32 %v2922_v8, %v2675_v23 }
 0x77d   :  { %v2927_v32 = vadd.f32 %v2923_v28, %v2676_v31  ;;  %v2956_v31 = vld [vmem:[#allocation2 + $0x28] sm:$0x30] }
 0x77e   :  { %v6227_v33 = vmul.f32 -1.442695, %v2926_v30 }
 0x77f   :  { %v6228_v36 = vmul.f32 -1.442695, %v2927_v32 }
 0x780   :  { %7489 = vpow2.f32 %v6227_v33 }
 0x781   :  { %7491 = vpow2.f32 %v6228_v36 }
 0x78a   :  { %v7490_v25 = vpop.eup %7489 }
 0x78b   :  { %v7492_v37 = vpop.eup %7491  ;;  %v2934_v38 = vadd.f32 1.0, %v7490_v25 }
 0x78c   :  { %v2935_v27 = vadd.f32 1.0, %v7492_v37 }
 0x78d   :  { %7493 = vrcp.f32 %v2934_v38 }
 0x78e   :  { %7495 = vrcp.f32 %v2935_v27 }
 0x797   :  { %v7494_v44 = vpop.eup %7493 }
 0x798   :  { %v7496_v46 = vpop.eup %7495  ;;  %v2943_v47 = vmul.f32 %v7494_v44, %v2941_v42  ;;  %v8796_v42 = vld [vmem:[%s9475_s6 + $0x4] ss:$12 sps:$4 sm:$0xff]   ;;  %v8801_v44 = vld [vmem:[%s9475_s6] ss:$12 sps:$4 sm:$0xff]  }
 0x799   :  { %v2951_v50 = vmul.f32 %v7496_v46, %v2949_v45  ;;  %v2946_v51 = vsub.f32 1.0, %v7496_v46  ;;  %v7322_v45 = vld [vmem:[%s9475_s6 + $0x8] ss:$12 sps:$4 sm:$0xff]  }
 0x79a   :  { %v2944_v54 = vadd.f32 %v2943_v47, %v2677_v49  ;;  %v8811_v46 = vld [vmem:[%s9475_s6 + $0x1c] ss:$12 sps:$4 sm:$0xff]   ;;  %v8817_v47 = vld [vmem:[%s9475_s6 + $0x18] ss:$12 sps:$4 sm:$0xff]   ;;  %v7326_v49 = vld [vmem:[%s9475_s6 + $0x20] ss:$12 sps:$4 sm:$0xff]  }
 0x79c   :  { %7497 = vtanh.f32 %v2944_v54  ;;  %v8833_v54 = vld [vmem:[%s9475_s6 + $0x30] ss:$12 sps:$4 sm:$0xff]  }
 0x7a6   :  { %v7498_v57 = vpop.eup %7497 }
 0x7a7   :  { %v2947_v53 = vmul.f32 %v7498_v57, %v2946_v51  ;;  %v7330_v51 = vld [vmem:[%s9475_s6 + $0x38] ss:$12 sps:$4 sm:$0xff]   ;;  %v8843_v57 = vld [vmem:[%s9475_s6 + $0x48] ss:$12 sps:$4 sm:$0xff]  }
 0x7a9   :  { %v8726_v52 = vadd.f32 %v2951_v50, %v2947_v53  ;;  %v8827_v50 = vld [vmem:[%s9475_s6 + $0x34] ss:$12 sps:$4 sm:$0xff]   ;;  %v8848_v53 = vld [vmem:[%s9475_s6 + $0x4c] ss:$12 sps:$4 sm:$0xff]  }
 0x7ab   :  { %2953 = vst [vmem:[#allocation3 + $0x8] sm:$0xc] %v8726_v52  ;;  %v2957_v60 = vpack.c.bf16 %v8726_v52, %v8726_v52  ;;  %v3231_v23 = vrot.slane %v8726_v52, 6  ;;  %v7334_v52 = vld [vmem:[%s9475_s6 + $0x50] ss:$12 sps:$4 sm:$0xff]  }
 0x7ad   :  { %v2991_v0 = vrot.slane %v2957_v60, 1  ;;  %v8857_v60 = vld [vmem:[%s9475_s6 + $0x64] ss:$12 sps:$4 sm:$0xff]  }
 0x7af   :  { %3154 = vmatmul.mubr.bf16.vlgmr.msra.gmra.mrb[40].mxu1 %v2991_v0  ;;  %6817 = vmatmul.mubr.bf16.vlgmr.msra.gmra.mrb[48].mxu0 %v2991_v0  ;;  %v8864_v0 = vld [vmem:[%s9475_s6 + $0x60] ss:$12 sps:$4 sm:$0xff]  }
 0x7b0   :  { %3404 = vmatpush1.bf16.msra.mxu1 %v8481_v48  ;;  %3435 = vmatprep.mubr.bf16.mxu1 %v7601_v15  ;;  %v7311_v48 = vld [vmem:[%s9475_s6 + $0x8] ss:$12 sps:$4 sm:$0xff]  }
 0x7b1   :  { %3405 = vmatprep.subr.bf16.mxu1 %v8491_v61  ;;  %6836 = vmatprep.mubr.msk.bf16.mxu0 %vm7602_vm5, %v7600_v9  ;;  %v7312_v61 = vld [vmem:[%s9475_s6 + $0x20] ss:$12 sps:$4 sm:$0xff]  }
 0x7b2   :  { %6821 = vmatpush3.bf16.msra.mxu0 %v7311_v48  ;;  %v7338_v48 = vld [vmem:[%s9475_s6 + $0x68] ss:$12 sps:$4 sm:$0xff]  }
 0x7b3   :  { %6822 = vmatprep.subr.bf16.mxu0 %v7600_v9 }
 0x7b4   :  { %3406 = vmatpush1.bf16.msra.mxu1 %v8497_v62  ;;  %v7313_v62 = vld [vmem:[%s9475_s6 + $0x38] ss:$12 sps:$4 sm:$0xff]  }
 0x7b5   :  { %3407 = vmatprep.subr.bf16.mxu1 %v8507_v59  ;;  %v7314_v59 = vld [vmem:[%s9475_s6 + $0x50] ss:$12 sps:$4 sm:$0xff]  }
 0x7b6   :  { %6823 = vmatpush3.bf16.msra.mxu0 %v7312_v61  ;;  %v8874_v61 = vld [vmem:[%s9475_s6 + $0x7c] ss:$12 sps:$4 sm:$0xff]  }
 0x7b7   :  { %6824 = vmatprep.subr.bf16.mxu0 %v7600_v9 }
 0x7b8   :  { %3408 = vmatpush1.bf16.msra.mxu1 %v8513_v63  ;;  %v7315_v63 = vld [vmem:[%s9475_s6 + $0x68] ss:$12 sps:$4 sm:$0xff]  }
 0x7b9   :  { %3409 = vmatprep.subr.bf16.mxu1 %v8523_v2  ;;  %v7316_v2 = vld [vmem:[%s9475_s6 + $0x80] ss:$12 sps:$4 sm:$0xff]  }
 0x7ba   :  { %6825 = vmatpush3.bf16.msra.mxu0 %v7313_v62  ;;  %v8880_v62 = vld [vmem:[%s9475_s6 + $0x78] ss:$12 sps:$4 sm:$0xff]  }
 0x7bb   :  { %6826 = vmatprep.subr.bf16.mxu0 %v7600_v9 }
 0x7bc   :  { %3410 = vmatpush1.bf16.msra.mxu1 %v8529_v3  ;;  %v7317_v3 = vld [vmem:[%s9475_s6 + $0x98] ss:$12 sps:$4 sm:$0xff]  }
 0x7bd   :  { %3411 = vmatprep.subr.bf16.mxu1 %v8538_v40  ;;  %v7318_v40 = vld [vmem:[%s9475_s6 + $0xb0] ss:$12 sps:$4 sm:$0xff]  }
 0x7be   :  { %6827 = vmatpush3.bf16.msra.mxu0 %v7314_v59  ;;  %v7342_v59 = vld [vmem:[%s9475_s6 + $0x80] ss:$12 sps:$4 sm:$0xff]  }
 0x7bf   :  { %6828 = vmatprep.subr.bf16.mxu0 %v7600_v9 }
 0x7c0   :  { %3412 = vmatpush1.bf16.msra.mxu1 %v8544_v6 }
 0x7c1   :  { %3413 = vmatprep.subr.bf16.mxu1 %v8554_v1 }
 0x7c2   :  { %6829 = vmatpush3.bf16.msra.mxu0 %v7315_v63  ;;  %v8890_v63 = vld [vmem:[%s9475_s6 + $0x94] ss:$12 sps:$4 sm:$0xff]  }
 0x7c3   :  { %6830 = vmatprep.subr.bf16.mxu0 %v7600_v9 }
 0x7c4   :  { %3414 = vmatpush1.bf16.msra.mxu1 %v8560_v5 }
 0x7c5   :  { %3415 = vmatprep.subr.bf16.mxu1 %v8570_v10 }
 0x7c6   :  { %6831 = vmatpush3.bf16.msra.mxu0 %v7316_v2  ;;  %v8896_v2 = vld [vmem:[%s9475_s6 + $0x90] ss:$12 sps:$4 sm:$0xff]  }
 0x7c7   :  { %6832 = vmatprep.subr.bf16.mxu0 %v7600_v9 }
 0x7c8   :  { %3416 = vmatpush1.bf16.msra.mxu1 %v8576_v12 }
 0x7c9   :  { %3417 = vmatprep.subr.bf16.mxu1 %v8586_v16 }
 0x7ca   :  { %6833 = vmatpush3.bf16.msra.mxu0 %v7317_v3  ;;  %v7346_v3 = vld [vmem:[%s9475_s6 + $0x98] ss:$12 sps:$4 sm:$0xff]  }
 0x7cb   :  { %6834 = vmatprep.subr.bf16.mxu0 %v7600_v9 }
 0x7cc   :  { %3418 = vmatpush1.bf16.msra.mxu1 %v8592_v18 }
 0x7cd   :  { %3685 = vmatprep.subr.bf16.mxu1 %v8796_v42 }
 0x7ce   :  { %6835 = vmatpush3.bf16.msra.mxu0 %v7318_v40  ;;  %v8906_v40 = vld [vmem:[%s9475_s6 + $0xac] ss:$12 sps:$4 sm:$0xff]  }
 0x7cf   :  { %6840 = vmatprep.subr.bf16.mxu0 %v7600_v9 }
 0x882   :  { %v3155_v6 = vpop.f32.mrb[40].mxu1  ;;  %v3196_v1 = vpop.f32.mrb[48].mxu0 }
 0x883   :  { %v3156_v5 = vadd.f32 %v3155_v6, %v8334_v34  ;;  %v3157_v10 = vpop.f32.mrb[41].mxu1  ;;  %v6818_v12 = vpop.f32.mrb[49].mxu0  ;;  %v3197_v8 = vadd.f32 %v3196_v1, %v8343_v55  ;;  %v8912_v6 = vld [vmem:[%s9475_s6 + $0xa8] ss:$12 sps:$4 sm:$0xff]   ;;  %v7350_v1 = vld [vmem:[%s9475_s6 + $0xb0] ss:$12 sps:$4 sm:$0xff]  }
 0x884   :  { %v3158_v16 = vadd.f32 %v3157_v10, %v8337_v35  ;;  %v3159_v18 = vpop.f32.mrb[42].mxu1  ;;  %v3199_v56 = vpop.f32.mrb[50].mxu0 }
 0x885   :  { %v3204_v39 = vrot.slane %v3156_v5, 4  ;;  %v3160_v58 = vpop.f32.mrb[43].mxu1  ;;  %v6819_v11 = vpop.f32.mrb[51].mxu0  ;;  %v3223_v17 = vrot.slane %v3197_v8, 4 }
 0x886   :  { %v3205_v7 = vrot.slane %v3158_v16, 4 }
 0x887   :  { %v3208_v14 = vadd.f32 %v3204_v39, %v2954_v43 }
 0x888   :  { %v3209_v21 = vadd.f32 %v3205_v7, %v2955_v19 }
 0x889   :  { %v6253_v22 = vmul.f32 -1.442695, %v3208_v14  ;;  %v3236_v14 = vld [vmem:[#allocation2 + $0x18] sm:$0xc0] }
 0x88a   :  { %v6254_v24 = vmul.f32 -1.442695, %v3209_v21 }
 0x88b   :  { %7499 = vpow2.f32 %v6253_v22  ;;  %v3237_v22 = vld [vmem:[#allocation2 + $0x20] sm:$0xc0] }
 0x88c   :  { %7501 = vpow2.f32 %v6254_v24 }
 0x895   :  { %v7500_v26 = vpop.eup %7499 }
 0x896   :  { %v7502_v29 = vpop.eup %7501  ;;  %v3216_v4 = vadd.f32 1.0, %v7500_v26 }
 0x897   :  { %v3217_v13 = vadd.f32 1.0, %v7502_v29 }
 0x898   :  { %7503 = vrcp.f32 %v3216_v4 }
 0x899   :  { %7505 = vrcp.f32 %v3217_v13 }
 0x8a2   :  { %v7504_v20 = vpop.eup %7503 }
 0x8a3   :  { %v7506_v28 = vpop.eup %7505  ;;  %v3225_v30 = vmul.f32 %v7504_v20, %v3223_v17 }
 0x8a4   :  { %v3233_v32 = vmul.f32 %v7506_v28, %v3231_v23  ;;  %v3228_v36 = vsub.f32 1.0, %v7506_v28 }
 0x8a5   :  { %v3226_v33 = vadd.f32 %v3225_v30, %v2956_v31 }
 0x8a7   :  { %7507 = vtanh.f32 %v3226_v33  ;;  %v3238_v33 = vld [vmem:[#allocation2 + $0x28] sm:$0xc0] }
 0x8b1   :  { %v7508_v25 = vpop.eup %7507 }
 0x8b2   :  { %v3229_v37 = vmul.f32 %v7508_v25, %v3228_v36 }
 0x8b4   :  { %v8785_v38 = vadd.f32 %v3233_v32, %v3229_v37 }
 0x8b6   :  { %3235 = vst [vmem:[#allocation3 + $0x8] sm:$0x30] %v8785_v38  ;;  %v3239_v27 = vpack.c.bf16 %v8785_v38, %v8785_v38  ;;  %v3513_v30 = vrot.slane %v8785_v38, 6  ;;  %v7351_v38 = vld [vmem:[%s9475_s6 + $0x8] ss:$12 sps:$4 sm:$0xff]  }
 0x8b8   :  { %v3273_v41 = vrot.slane %v3239_v27, 2 }
 0x8ba   :  { %3436 = vmatmul.mubr.bf16.vlgmr.msra.gmra.mrb[44].mxu1 %v3273_v41  ;;  %6837 = vmatmul.mubr.bf16.vlgmr.msra.gmra.mrb[52].mxu0 %v3273_v41 }
 0x8bb   :  { %3717 = vmatprep.mubr.bf16.mxu1 %v7601_v15  ;;  %6856 = vmatprep.mubr.msk.bf16.mxu0 %vm7602_vm5, %v7600_v9 }
 0x8bc   :  { %3686 = vmatpush1.bf16.msra.mxu1 %v8801_v44  ;;  %6841 = vmatpush3.bf16.msra.mxu0 %v7322_v45 }
 0x8bd   :  { %6842 = vmatprep.subr.bf16.mxu0 %v7600_v9  ;;  %3687 = vmatprep.subr.bf16.mxu1 %v8811_v46 }
 0x8c0   :  { %3688 = vmatpush1.bf16.msra.mxu1 %v8817_v47  ;;  %6843 = vmatpush3.bf16.msra.mxu0 %v7326_v49 }
 0x8c1   :  { %6844 = vmatprep.subr.bf16.mxu0 %v7600_v9  ;;  %3689 = vmatprep.subr.bf16.mxu1 %v8827_v50 }
 0x8c4   :  { %3690 = vmatpush1.bf16.msra.mxu1 %v8833_v54  ;;  %6845 = vmatpush3.bf16.msra.mxu0 %v7330_v51 }
 0x8c5   :  { %6846 = vmatprep.subr.bf16.mxu0 %v7600_v9  ;;  %3691 = vmatprep.subr.bf16.mxu1 %v8848_v53 }
 0x8c8   :  { %3692 = vmatpush1.bf16.msra.mxu1 %v8843_v57  ;;  %6847 = vmatpush3.bf16.msra.mxu0 %v7334_v52  ;;  %v7352_v52 = vld [vmem:[%s9475_s6 + $0x20] ss:$12 sps:$4 sm:$0xff]  }
 0x8c9   :  { %3693 = vmatprep.subr.bf16.mxu1 %v8857_v60  ;;  %6848 = vmatprep.subr.bf16.mxu0 %v7600_v9 }
 0x8cc   :  { %3694 = vmatpush1.bf16.msra.mxu1 %v8864_v0  ;;  %6849 = vmatpush3.bf16.msra.mxu0 %v7338_v48  ;;  %v7353_v48 = vld [vmem:[%s9475_s6 + $0x38] ss:$12 sps:$4 sm:$0xff]  }
 0x8cd   :  { %3695 = vmatprep.subr.bf16.mxu1 %v8874_v61  ;;  %6850 = vmatprep.subr.bf16.mxu0 %v7600_v9 }
 0x8d0   :  { %3696 = vmatpush1.bf16.msra.mxu1 %v8880_v62  ;;  %6851 = vmatpush3.bf16.msra.mxu0 %v7342_v59  ;;  %v7354_v59 = vld [vmem:[%s9475_s6 + $0x50] ss:$12 sps:$4 sm:$0xff]  }
 0x8d1   :  { %3697 = vmatprep.subr.bf16.mxu1 %v8890_v63  ;;  %6852 = vmatprep.subr.bf16.mxu0 %v7600_v9 }
 0x8d4   :  { %3698 = vmatpush1.bf16.msra.mxu1 %v8896_v2  ;;  %6853 = vmatpush3.bf16.msra.mxu0 %v7346_v3  ;;  %v7355_v3 = vld [vmem:[%s9475_s6 + $0x68] ss:$12 sps:$4 sm:$0xff]  }
 0x8d5   :  { %3699 = vmatprep.subr.bf16.mxu1 %v8906_v40  ;;  %6854 = vmatprep.subr.bf16.mxu0 %v7600_v9 }
 0x8d8   :  { %3700 = vmatpush1.bf16.msra.mxu1 %v8912_v6  ;;  %6855 = vmatpush3.bf16.msra.mxu0 %v7350_v1  ;;  %v7356_v1 = vld [vmem:[%s9475_s6 + $0x80] ss:$12 sps:$4 sm:$0xff]  }
 0x8d9   :  { %3955 = vmatprep.subr.bf16.mxu1 %v8796_v42  ;;  %6860 = vmatprep.subr.bf16.mxu0 %v7600_v9 }
 0x98d   :  { %v3437_v5 = vpop.f32.mrb[44].mxu1  ;;  %v3478_v10 = vpop.f32.mrb[52].mxu0 }
 0x98e   :  { %v3438_v12 = vadd.f32 %v3437_v5, %v8334_v34  ;;  %v3439_v16 = vpop.f32.mrb[45].mxu1  ;;  %v6838_v18 = vpop.f32.mrb[53].mxu0  ;;  %v3479_v20 = vadd.f32 %v3478_v10, %v8343_v55  ;;  %v7357_v5 = vld [vmem:[%s9475_s6 + $0x98] ss:$12 sps:$4 sm:$0xff]   ;;  %v7358_v10 = vld [vmem:[%s9475_s6 + $0xb0] ss:$12 sps:$4 sm:$0xff]  }
 0x98f   :  { %v3440_v56 = vadd.f32 %v3439_v16, %v8337_v35  ;;  %v3441_v39 = vpop.f32.mrb[46].mxu1  ;;  %v3481_v58 = vpop.f32.mrb[54].mxu0 }
 0x990   :  { %v3486_v11 = vrot.slane %v3438_v12, 2  ;;  %v3442_v43 = vpop.f32.mrb[47].mxu1  ;;  %v6839_v7 = vpop.f32.mrb[55].mxu0  ;;  %v3505_v23 = vrot.slane %v3479_v20, 2  ;;  %v3518_v58 = vld [vmem:[#allocation2 + $0x30] sm:$0x3] }
 0x991   :  { %v3487_v19 = vrot.slane %v3440_v56, 2 }
 0x992   :  { %v3490_v21 = vadd.f32 %v3486_v11, %v3236_v14 }
 0x993   :  { %v3491_v24 = vadd.f32 %v3487_v19, %v3237_v22  ;;  %v3519_v19 = vld [vmem:[#allocation2 + $0x38] sm:$0x3] }
 0x994   :  { %v6279_v26 = vmul.f32 -1.442695, %v3490_v21 }
 0x995   :  { %v6280_v29 = vmul.f32 -1.442695, %v3491_v24 }
 0x996   :  { %7509 = vpow2.f32 %v6279_v26 }
 0x997   :  { %7511 = vpow2.f32 %v6280_v29 }
 0x9a0   :  { %v7510_v4 = vpop.eup %7509 }
 0x9a1   :  { %v7512_v13 = vpop.eup %7511  ;;  %v3498_v8 = vadd.f32 1.0, %v7510_v4 }
 0x9a2   :  { %v3499_v17 = vadd.f32 1.0, %v7512_v13 }
 0x9a3   :  { %7513 = vrcp.f32 %v3498_v8 }
 0x9a4   :  { %7515 = vrcp.f32 %v3499_v17 }
 0x9ad   :  { %v7514_v28 = vpop.eup %7513 }
 0x9ae   :  { %v7516_v31 = vpop.eup %7515  ;;  %v3507_v32 = vmul.f32 %v7514_v28, %v3505_v23 }
 0x9af   :  { %v3515_v36 = vmul.f32 %v7516_v31, %v3513_v30  ;;  %v3510_v37 = vsub.f32 1.0, %v7516_v31 }
 0x9b0   :  { %v3508_v25 = vadd.f32 %v3507_v32, %v3238_v33  ;;  %v3520_v32 = vld [vmem:[#allocation2 + $0x40] sm:$0x3] }
 0x9b2   :  { %7517 = vtanh.f32 %v3508_v25 }
 0x9bc   :  { %v7518_v27 = vpop.eup %7517 }
 0x9bd   :  { %v3511_v41 = vmul.f32 %v7518_v27, %v3510_v37 }
 0x9bf   :  { %v8926_v45 = vadd.f32 %v3515_v36, %v3511_v41 }
 0x9c1   :  { %3517 = vst [vmem:[#allocation3 + $0x8] sm:$0xc0] %v8926_v45  ;;  %v3521_v49 = vpack.c.bf16 %v8926_v45, %v8926_v45  ;;  %v3786_v28 = vrot.slane %v8926_v45, 6  ;;  %v7359_v45 = vld [vmem:[%s9475_s6 + $0x8] ss:$12 sps:$4 sm:$0xff]  }
 0x9c3   :  { %v3555_v51 = vrot.slane %v3521_v49, 3 }
 0x9c5   :  { %3718 = vmatmul.mubr.bf16.vlgmr.msra.gmra.mrb[48].mxu1 %v3555_v51  ;;  %6857 = vmatmul.mubr.bf16.vlgmr.msra.gmra.mrb[56].mxu0 %v3555_v51  ;;  %v7360_v51 = vld [vmem:[%s9475_s6 + $0x20] ss:$12 sps:$4 sm:$0xff]  }
 0x9c6   :  { %3956 = vmatpush1.bf16.msra.mxu1 %v8801_v44  ;;  %3987 = vmatprep.mubr.bf16.mxu1 %v7601_v15 }
 0x9c7   :  { %3957 = vmatprep.subr.bf16.mxu1 %v8811_v46  ;;  %6876 = vmatprep.mubr.msk.bf16.mxu0 %vm7602_vm5, %v7600_v9 }
 0x9c8   :  { %6861 = vmatpush3.bf16.msra.mxu0 %v7351_v38  ;;  %v7361_v38 = vld [vmem:[%s9475_s6 + $0x38] ss:$12 sps:$4 sm:$0xff]  }
 0x9c9   :  { %6862 = vmatprep.subr.bf16.mxu0 %v7600_v9 }
 0x9ca   :  { %3958 = vmatpush1.bf16.msra.mxu1 %v8817_v47 }
 0x9cb   :  { %3959 = vmatprep.subr.bf16.mxu1 %v8827_v50 }
 0x9cc   :  { %6863 = vmatpush3.bf16.msra.mxu0 %v7352_v52  ;;  %v7363_v52 = vld [vmem:[%s9475_s6 + $0x68] ss:$12 sps:$4 sm:$0xff]  }
 0x9cd   :  { %6864 = vmatprep.subr.bf16.mxu0 %v7600_v9 }
 0x9ce   :  { %3960 = vmatpush1.bf16.msra.mxu1 %v8833_v54 }
 0x9cf   :  { %3961 = vmatprep.subr.bf16.mxu1 %v8848_v53 }
 0x9d0   :  { %6865 = vmatpush3.bf16.msra.mxu0 %v7353_v48  ;;  %v7364_v48 = vld [vmem:[%s9475_s6 + $0x80] ss:$12 sps:$4 sm:$0xff]  }
 0x9d1   :  { %6866 = vmatprep.subr.bf16.mxu0 %v7600_v9 }
 0x9d2   :  { %3962 = vmatpush1.bf16.msra.mxu1 %v8843_v57 }
 0x9d3   :  { %3963 = vmatprep.subr.bf16.mxu1 %v8857_v60 }
 0x9d4   :  { %6867 = vmatpush3.bf16.msra.mxu0 %v7354_v59  ;;  %v7365_v59 = vld [vmem:[%s9475_s6 + $0x98] ss:$12 sps:$4 sm:$0xff]  }
 0x9d5   :  { %6868 = vmatprep.subr.bf16.mxu0 %v7600_v9 }
 0x9d6   :  { %3964 = vmatpush1.bf16.msra.mxu1 %v8864_v0 }
 0x9d7   :  { %3965 = vmatprep.subr.bf16.mxu1 %v8874_v61 }
 0x9d8   :  { %6869 = vmatpush3.bf16.msra.mxu0 %v7355_v3  ;;  %v7366_v3 = vld [vmem:[%s9475_s6 + $0xb0] ss:$12 sps:$4 sm:$0xff]  }
 0x9d9   :  { %6870 = vmatprep.subr.bf16.mxu0 %v7600_v9 }
 0x9da   :  { %3966 = vmatpush1.bf16.msra.mxu1 %v8880_v62 }
 0x9db   :  { %3967 = vmatprep.subr.bf16.mxu1 %v8890_v63 }
 0x9dc   :  { %6871 = vmatpush3.bf16.msra.mxu0 %v7356_v1 }
 0x9dd   :  { %6872 = vmatprep.subr.bf16.mxu0 %v7600_v9 }
 0x9de   :  { %3968 = vmatpush1.bf16.msra.mxu1 %v8896_v2 }
 0x9df   :  { %3969 = vmatprep.subr.bf16.mxu1 %v8906_v40 }
 0x9e0   :  { %6873 = vmatpush3.bf16.msra.mxu0 %v7357_v5 }
 0x9e1   :  { %6874 = vmatprep.subr.bf16.mxu0 %v7600_v9 }
 0x9e2   :  { %3970 = vmatpush1.bf16.msra.mxu1 %v8912_v6 }
 0x9e3   :  { %4237 = vmatprep.subr.bf16.mxu1 %v8796_v42 }
 0x9e4   :  { %6875 = vmatpush3.bf16.msra.mxu0 %v7358_v10 }
 0x9e5   :  { %6880 = vmatprep.subr.bf16.mxu0 %v7600_v9 }
 0xa98   :  { %v3719_v12 = vpop.f32.mrb[48].mxu1  ;;  %v3760_v16 = vpop.f32.mrb[56].mxu0 }
 0xa99   :  { %v3720_v18 = vadd.f32 %v3719_v12, %v8334_v34  ;;  %v3721_v56 = vpop.f32.mrb[49].mxu1  ;;  %v6858_v39 = vpop.f32.mrb[57].mxu0  ;;  %v3761_v20 = vadd.f32 %v3760_v16, %v8343_v55 }
 0xa9a   :  { %v3722_v11 = vadd.f32 %v3721_v56, %v8337_v35  ;;  %v3723_v43 = vpop.f32.mrb[50].mxu1  ;;  %v3763_v7 = vpop.f32.mrb[58].mxu0 }
 0xa9b   :  { %v3766_v14 = vadd.f32 %v3720_v18, %v3518_v58  ;;  %v3724_v21 = vpop.f32.mrb[51].mxu1  ;;  %v6859_v22 = vpop.f32.mrb[59].mxu0  ;;  %v3791_v7 = vld [vmem:[#allocation2 + $0x30] sm:$0xc] }
 0xa9c   :  { %v3767_v24 = vadd.f32 %v3722_v11, %v3519_v19  ;;  %v3792_v21 = vld [vmem:[#allocation2 + $0x38] sm:$0xc] }
 0xa9d   :  { %v6305_v26 = vmul.f32 -1.442695, %v3766_v14 }
 0xa9e   :  { %v6306_v29 = vmul.f32 -1.442695, %v3767_v24 }
 0xa9f   :  { %7519 = vpow2.f32 %v6305_v26 }
 0xaa0   :  { %7521 = vpow2.f32 %v6306_v29 }
 0xaa9   :  { %v7520_v4 = vpop.eup %7519 }
 0xaaa   :  { %v7522_v13 = vpop.eup %7521  ;;  %v3774_v8 = vadd.f32 1.0, %v7520_v4 }
 0xaab   :  { %v3775_v17 = vadd.f32 1.0, %v7522_v13 }
 0xaac   :  { %7523 = vrcp.f32 %v3774_v8 }
 0xaad   :  { %7525 = vrcp.f32 %v3775_v17 }
 0xab6   :  { %v7524_v23 = vpop.eup %7523 }
 0xab7   :  { %v7526_v30 = vpop.eup %7525  ;;  %v3780_v31 = vmul.f32 %v7524_v23, %v3761_v20 }
 0xab8   :  { %v3788_v33 = vmul.f32 %v7526_v30, %v3786_v28  ;;  %v3783_v25 = vsub.f32 1.0, %v7526_v30 }
 0xab9   :  { %v3781_v36 = vadd.f32 %v3780_v31, %v3520_v32  ;;  %v3793_v32 = vld [vmem:[#allocation2 + $0x40] sm:$0xc] }
 0xabb   :  { %7527 = vtanh.f32 %v3781_v36 }
 0xac5   :  { %v7528_v37 = vpop.eup %7527 }
 0xac6   :  { %v3784_v27 = vmul.f32 %v7528_v37, %v3783_v25 }
 0xac8   :  { %v8986_v41 = vadd.f32 %v3788_v33, %v3784_v27 }
 0xaca   :  { %3790 = vst [vmem:[#allocation3 + $0x10] sm:$0x3] %v8986_v41  ;;  %v3794_v49 = vpack.c.bf16 %v8986_v41, %v8986_v41  ;;  %v4065_v28 = vrot.slane %v8986_v41, 6 }
 0xacc   :  { %3988 = vmatmul.mubr.bf16.vlgmr.msra.gmra.mrb[52].mxu1 %v3794_v49  ;;  %6877 = vmatmul.mubr.bf16.vlgmr.msra.gmra.mrb[60].mxu0 %v3794_v49 }
 0xacd   :  { %4238 = vmatpush1.bf16.msra.mxu1 %v8801_v44  ;;  %4269 = vmatprep.mubr.bf16.mxu1 %v7601_v15 }
 0xace   :  { %4239 = vmatprep.subr.bf16.mxu1 %v8811_v46  ;;  %6896 = vmatprep.mubr.msk.bf16.mxu0 %vm7602_vm5, %v7600_v9 }
 0xacf   :  { %6881 = vmatpush3.bf16.msra.mxu0 %v7359_v45 }
 0xad0   :  { %6882 = vmatprep.subr.bf16.mxu0 %v7600_v9 }
 0xad1   :  { %4240 = vmatpush1.bf16.msra.mxu1 %v8817_v47 }
 0xad2   :  { %4241 = vmatprep.subr.bf16.mxu1 %v8827_v50 }
 0xad3   :  { %6883 = vmatpush3.bf16.msra.mxu0 %v7360_v51 }
 0xad4   :  { %6884 = vmatprep.subr.bf16.mxu0 %v7600_v9 }
 0xad5   :  { %4242 = vmatpush1.bf16.msra.mxu1 %v8833_v54 }
 0xad6   :  { %4243 = vmatprep.subr.bf16.mxu1 %v8848_v53 }
 0xad7   :  { %6885 = vmatpush3.bf16.msra.mxu0 %v7361_v38 }
 0xad8   :  { %6886 = vmatprep.subr.bf16.mxu0 %v7600_v9 }
 0xad9   :  { %4244 = vmatpush1.bf16.msra.mxu1 %v8843_v57 }
 0xada   :  { %4245 = vmatprep.subr.bf16.mxu1 %v8857_v60 }
 0xadd   :  { %4246 = vmatpush1.bf16.msra.mxu1 %v8864_v0 }
 0xade   :  { %4247 = vmatprep.subr.bf16.mxu1 %v8874_v61 }
 0xae1   :  { %4248 = vmatpush1.bf16.msra.mxu1 %v8880_v62 }
 0xae2   :  { %4249 = vmatprep.subr.bf16.mxu1 %v8890_v63 }
 0xae5   :  { %4250 = vmatpush1.bf16.msra.mxu1 %v8896_v2 }
 0xae6   :  { %4251 = vmatprep.subr.bf16.mxu1 %v8906_v40 }
 0xae9   :  { %4252 = vmatpush1.bf16.msra.mxu1 %v8912_v6 }
 0xaea   :  { %4519 = vmatprep.subr.bf16.mxu1 %v8796_v42  ;;  %v7362_v42 = vld [vmem:[%s9475_s6 + $0x50] ss:$12 sps:$4 sm:$0xff]  }
 0xaeb   :  { %6887 = vmatpush3.bf16.msra.mxu0 %v7362_v42 }
 0xaec   :  { %6888 = vmatprep.subr.bf16.mxu0 %v7600_v9 }
 0xaef   :  { %6889 = vmatpush3.bf16.msra.mxu0 %v7363_v52 }
 0xaf0   :  { %6890 = vmatprep.subr.bf16.mxu0 %v7600_v9 }
 0xaf3   :  { %6891 = vmatpush3.bf16.msra.mxu0 %v7364_v48  ;;  %v4070_v48 = vld [vmem:[#allocation2 + $0x30] sm:$0x30] }
 0xaf4   :  { %6892 = vmatprep.subr.bf16.mxu0 %v7600_v9 }
 0xaf7   :  { %6893 = vmatpush3.bf16.msra.mxu0 %v7365_v59 }
 0xaf8   :  { %6894 = vmatprep.subr.bf16.mxu0 %v7600_v9 }
 0xafb   :  { %6895 = vmatpush3.bf16.msra.mxu0 %v7366_v3 }
 0xafc   :  { %6900 = vmatprep.subr.bf16.mxu0 %v7600_v9 }
 0xb9f   :  { %v3989_v1 = vpop.f32.mrb[52].mxu1  ;;  %v4030_v5 = vpop.f32.mrb[60].mxu0 }
 0xba0   :  { %v3990_v10 = vadd.f32 %v3989_v1, %v8334_v34  ;;  %v3991_v12 = vpop.f32.mrb[53].mxu1  ;;  %v6878_v16 = vpop.f32.mrb[61].mxu0  ;;  %v4031_v17 = vadd.f32 %v4030_v5, %v8343_v55  ;;  %v4071_v1 = vld [vmem:[#allocation2 + $0x38] sm:$0x30] }
 0xba1   :  { %v3992_v18 = vadd.f32 %v3991_v12, %v8337_v35  ;;  %v3993_v56 = vpop.f32.mrb[54].mxu1  ;;  %v4033_v39 = vpop.f32.mrb[62].mxu0 }
 0xba2   :  { %v4038_v58 = vrot.slane %v3990_v10, 6  ;;  %v3994_v11 = vpop.f32.mrb[55].mxu1  ;;  %v6879_v43 = vpop.f32.mrb[63].mxu0  ;;  %v4057_v20 = vrot.slane %v4031_v17, 6 }
 0xba3   :  { %v4039_v14 = vrot.slane %v3992_v18, 6 }
 0xba4   :  { %v4042_v19 = vadd.f32 %v4038_v58, %v3791_v7 }
 0xba5   :  { %v4043_v22 = vadd.f32 %v4039_v14, %v3792_v21  ;;  %v4072_v21 = vld [vmem:[#allocation2 + $0x40] sm:$0x30] }
 0xba6   :  { %v6331_v24 = vmul.f32 -1.442695, %v4042_v19 }
 0xba7   :  { %v6332_v26 = vmul.f32 -1.442695, %v4043_v22 }
 0xba8   :  { %7529 = vpow2.f32 %v6331_v24 }
 0xba9   :  { %7531 = vpow2.f32 %v6332_v26 }
 0xbb2   :  { %v7530_v29 = vpop.eup %7529 }
 0xbb3   :  { %v7532_v4 = vpop.eup %7531  ;;  %v4050_v13 = vadd.f32 1.0, %v7530_v29 }
 0xbb4   :  { %v4051_v8 = vadd.f32 1.0, %v7532_v4 }
 0xbb5   :  { %7533 = vrcp.f32 %v4050_v13 }
 0xbb6   :  { %7535 = vrcp.f32 %v4051_v8 }
 0xbbf   :  { %v7534_v23 = vpop.eup %7533 }
 0xbc0   :  { %v7536_v30 = vpop.eup %7535  ;;  %v4059_v31 = vmul.f32 %v7534_v23, %v4057_v20  ;;  %v9116_v20 = vld [vmem:[%s9475_s6 + $0x4] ss:$12 sps:$4 sm:$0xff]   ;;  %v9121_v23 = vld [vmem:[%s9475_s6] ss:$12 sps:$4 sm:$0xff]  }
 0xbc1   :  { %v4067_v33 = vmul.f32 %v7536_v30, %v4065_v28  ;;  %v4062_v25 = vsub.f32 1.0, %v7536_v30  ;;  %v7378_v28 = vld [vmem:[%s9475_s6 + $0x8] ss:$12 sps:$4 sm:$0xff]  }
 0xbc2   :  { %v4060_v36 = vadd.f32 %v4059_v31, %v3793_v32  ;;  %v9131_v30 = vld [vmem:[%s9475_s6 + $0x1c] ss:$12 sps:$4 sm:$0xff]   ;;  %v9137_v31 = vld [vmem:[%s9475_s6 + $0x18] ss:$12 sps:$4 sm:$0xff]   ;;  %v7382_v32 = vld [vmem:[%s9475_s6 + $0x20] ss:$12 sps:$4 sm:$0xff]  }
 0xbc4   :  { %7537 = vtanh.f32 %v4060_v36  ;;  %v9153_v36 = vld [vmem:[%s9475_s6 + $0x30] ss:$12 sps:$4 sm:$0xff]  }
 0xbce   :  { %v7538_v37 = vpop.eup %7537 }
 0xbcf   :  { %v4063_v27 = vmul.f32 %v7538_v37, %v4062_v25  ;;  %v7386_v25 = vld [vmem:[%s9475_s6 + $0x38] ss:$12 sps:$4 sm:$0xff]   ;;  %v9163_v37 = vld [vmem:[%s9475_s6 + $0x48] ss:$12 sps:$4 sm:$0xff]  }
 0xbd1   :  { %v9046_v49 = vadd.f32 %v4067_v33, %v4063_v27  ;;  %v9147_v33 = vld [vmem:[%s9475_s6 + $0x34] ss:$12 sps:$4 sm:$0xff]   ;;  %v9168_v27 = vld [vmem:[%s9475_s6 + $0x4c] ss:$12 sps:$4 sm:$0xff]  }
 0xbd3   :  { %4069 = vst [vmem:[#allocation3 + $0x10] sm:$0xc] %v9046_v49  ;;  %v4073_v45 = vpack.c.bf16 %v9046_v49, %v9046_v49  ;;  %v4347_v7 = vrot.slane %v9046_v49, 6  ;;  %v7390_v49 = vld [vmem:[%s9475_s6 + $0x50] ss:$12 sps:$4 sm:$0xff]  }
 0xbd5   :  { %v4107_v51 = vrot.slane %v4073_v45, 1  ;;  %v9177_v45 = vld [vmem:[%s9475_s6 + $0x64] ss:$12 sps:$4 sm:$0xff]  }
 0xbd7   :  { %4270 = vmatmul.mubr.bf16.vlgmr.msra.gmra.mrb[56].mxu1 %v4107_v51  ;;  %6897 = vmatmul.mubr.bf16.vlgmr.msra.gmra.mrb[64].mxu0 %v4107_v51  ;;  %v9184_v51 = vld [vmem:[%s9475_s6 + $0x60] ss:$12 sps:$4 sm:$0xff]  }
 0xbd8   :  { %4520 = vmatpush1.bf16.msra.mxu1 %v8801_v44  ;;  %4551 = vmatprep.mubr.bf16.mxu1 %v7601_v15  ;;  %v7367_v44 = vld [vmem:[%s9475_s6 + $0x8] ss:$12 sps:$4 sm:$0xff]  }
 0xbd9   :  { %4521 = vmatprep.subr.bf16.mxu1 %v8811_v46  ;;  %6916 = vmatprep.mubr.msk.bf16.mxu0 %vm7602_vm5, %v7600_v9  ;;  %v7368_v46 = vld [vmem:[%s9475_s6 + $0x20] ss:$12 sps:$4 sm:$0xff]  }
 0xbda   :  { %6901 = vmatpush3.bf16.msra.mxu0 %v7367_v44  ;;  %v7394_v44 = vld [vmem:[%s9475_s6 + $0x68] ss:$12 sps:$4 sm:$0xff]  }
 0xbdb   :  { %6902 = vmatprep.subr.bf16.mxu0 %v7600_v9 }
 0xbdc   :  { %4522 = vmatpush1.bf16.msra.mxu1 %v8817_v47  ;;  %v7369_v47 = vld [vmem:[%s9475_s6 + $0x38] ss:$12 sps:$4 sm:$0xff]  }
 0xbdd   :  { %4523 = vmatprep.subr.bf16.mxu1 %v8827_v50  ;;  %v7370_v50 = vld [vmem:[%s9475_s6 + $0x50] ss:$12 sps:$4 sm:$0xff]  }
 0xbde   :  { %6903 = vmatpush3.bf16.msra.mxu0 %v7368_v46  ;;  %v9194_v46 = vld [vmem:[%s9475_s6 + $0x7c] ss:$12 sps:$4 sm:$0xff]  }
 0xbdf   :  { %6904 = vmatprep.subr.bf16.mxu0 %v7600_v9 }
 0xbe0   :  { %4524 = vmatpush1.bf16.msra.mxu1 %v8833_v54  ;;  %v7371_v54 = vld [vmem:[%s9475_s6 + $0x68] ss:$12 sps:$4 sm:$0xff]  }
 0xbe1   :  { %4525 = vmatprep.subr.bf16.mxu1 %v8848_v53  ;;  %v7373_v53 = vld [vmem:[%s9475_s6 + $0x98] ss:$12 sps:$4 sm:$0xff]  }
 0xbe2   :  { %6905 = vmatpush3.bf16.msra.mxu0 %v7369_v47  ;;  %v9200_v47 = vld [vmem:[%s9475_s6 + $0x78] ss:$12 sps:$4 sm:$0xff]  }
 0xbe3   :  { %6906 = vmatprep.subr.bf16.mxu0 %v7600_v9 }
 0xbe4   :  { %4526 = vmatpush1.bf16.msra.mxu1 %v8843_v57  ;;  %v7372_v57 = vld [vmem:[%s9475_s6 + $0x80] ss:$12 sps:$4 sm:$0xff]  }
 0xbe5   :  { %4527 = vmatprep.subr.bf16.mxu1 %v8857_v60  ;;  %v7374_v60 = vld [vmem:[%s9475_s6 + $0xb0] ss:$12 sps:$4 sm:$0xff]  }
 0xbe6   :  { %6907 = vmatpush3.bf16.msra.mxu0 %v7370_v50  ;;  %v7398_v50 = vld [vmem:[%s9475_s6 + $0x80] ss:$12 sps:$4 sm:$0xff]  }
 0xbe7   :  { %6908 = vmatprep.subr.bf16.mxu0 %v7600_v9 }
 0xbe8   :  { %4528 = vmatpush1.bf16.msra.mxu1 %v8864_v0 }
 0xbe9   :  { %4529 = vmatprep.subr.bf16.mxu1 %v8874_v61 }
 0xbea   :  { %6909 = vmatpush3.bf16.msra.mxu0 %v7371_v54  ;;  %v9210_v54 = vld [vmem:[%s9475_s6 + $0x94] ss:$12 sps:$4 sm:$0xff]  }
 0xbeb   :  { %6910 = vmatprep.subr.bf16.mxu0 %v7600_v9 }
 0xbec   :  { %4530 = vmatpush1.bf16.msra.mxu1 %v8880_v62 }
 0xbed   :  { %4531 = vmatprep.subr.bf16.mxu1 %v8890_v63 }
 0xbee   :  { %6911 = vmatpush3.bf16.msra.mxu0 %v7372_v57  ;;  %v9216_v57 = vld [vmem:[%s9475_s6 + $0x90] ss:$12 sps:$4 sm:$0xff]  }
 0xbef   :  { %6912 = vmatprep.subr.bf16.mxu0 %v7600_v9 }
 0xbf0   :  { %4532 = vmatpush1.bf16.msra.mxu1 %v8896_v2 }
 0xbf1   :  { %4533 = vmatprep.subr.bf16.mxu1 %v8906_v40 }
 0xbf2   :  { %6913 = vmatpush3.bf16.msra.mxu0 %v7373_v53  ;;  %v7402_v53 = vld [vmem:[%s9475_s6 + $0x98] ss:$12 sps:$4 sm:$0xff]  }
 0xbf3   :  { %6914 = vmatprep.subr.bf16.mxu0 %v7600_v9 }
 0xbf4   :  { %4534 = vmatpush1.bf16.msra.mxu1 %v8912_v6 }
 0xbf5   :  { %4801 = vmatprep.subr.bf16.mxu1 %v9116_v20 }
 0xbf6   :  { %6915 = vmatpush3.bf16.msra.mxu0 %v7374_v60  ;;  %v9226_v60 = vld [vmem:[%s9475_s6 + $0xac] ss:$12 sps:$4 sm:$0xff]  }
 0xbf7   :  { %6920 = vmatprep.subr.bf16.mxu0 %v7600_v9 }
 0xcaa   :  { %v4271_v0 = vpop.f32.mrb[56].mxu1  ;;  %v4312_v61 = vpop.f32.mrb[64].mxu0 }
 0xcab   :  { %v4272_v62 = vadd.f32 %v4271_v0, %v8334_v34  ;;  %v4273_v63 = vpop.f32.mrb[57].mxu1  ;;  %v6898_v2 = vpop.f32.mrb[65].mxu0  ;;  %v4313_v58 = vadd.f32 %v4312_v61, %v8343_v55  ;;  %v9232_v0 = vld [vmem:[%s9475_s6 + $0xa8] ss:$12 sps:$4 sm:$0xff]   ;;  %v7406_v61 = vld [vmem:[%s9475_s6 + $0xb0] ss:$12 sps:$4 sm:$0xff]  }
 0xcac   :  { %v4274_v40 = vadd.f32 %v4273_v63, %v8337_v35  ;;  %v4275_v6 = vpop.f32.mrb[58].mxu1  ;;  %v4315_v41 = vpop.f32.mrb[66].mxu0 }
 0xcad   :  { %v4320_v38 = vrot.slane %v4272_v62, 4  ;;  %v4276_v42 = vpop.f32.mrb[59].mxu1  ;;  %v6899_v52 = vpop.f32.mrb[67].mxu0  ;;  %v4339_v11 = vrot.slane %v4313_v58, 4 }
 0xcae   :  { %v4321_v59 = vrot.slane %v4274_v40, 4 }
 0xcaf   :  { %v4324_v3 = vadd.f32 %v4320_v38, %v4070_v48 }
 0xcb0   :  { %v4325_v5 = vadd.f32 %v4321_v59, %v4071_v1 }
 0xcb1   :  { %v6357_v10 = vmul.f32 -1.442695, %v4324_v3  ;;  %v4352_v3 = vld [vmem:[#allocation2 + $0x30] sm:$0xc0] }
 0xcb2   :  { %v6358_v12 = vmul.f32 -1.442695, %v4325_v5 }
 0xcb3   :  { %7539 = vpow2.f32 %v6357_v10  ;;  %v4353_v10 = vld [vmem:[#allocation2 + $0x38] sm:$0xc0] }
 0xcb4   :  { %7541 = vpow2.f32 %v6358_v12 }
 0xcbd   :  { %v7540_v16 = vpop.eup %7539 }
 0xcbe   :  { %v7542_v18 = vpop.eup %7541  ;;  %v4332_v56 = vadd.f32 1.0, %v7540_v16 }
 0xcbf   :  { %v4333_v39 = vadd.f32 1.0, %v7542_v18 }
 0xcc0   :  { %7543 = vrcp.f32 %v4332_v56 }
 0xcc1   :  { %7545 = vrcp.f32 %v4333_v39 }
 0xcca   :  { %v7544_v43 = vpop.eup %7543 }
 0xccb   :  { %v7546_v14 = vpop.eup %7545  ;;  %v4341_v19 = vmul.f32 %v7544_v43, %v4339_v11 }
 0xccc   :  { %v4349_v22 = vmul.f32 %v7546_v14, %v4347_v7  ;;  %v4344_v26 = vsub.f32 1.0, %v7546_v14 }
 0xccd   :  { %v4342_v24 = vadd.f32 %v4341_v19, %v4072_v21 }
 0xccf   :  { %7547 = vtanh.f32 %v4342_v24  ;;  %v4354_v24 = vld [vmem:[#allocation2 + $0x40] sm:$0xc0] }
 0xcd9   :  { %v7548_v29 = vpop.eup %7547 }
 0xcda   :  { %v4345_v4 = vmul.f32 %v7548_v29, %v4344_v26 }
 0xcdc   :  { %v9105_v13 = vadd.f32 %v4349_v22, %v4345_v4 }
 0xcde   :  { %4351 = vst [vmem:[#allocation3 + $0x10] sm:$0x30] %v9105_v13  ;;  %v4355_v8 = vpack.c.bf16 %v9105_v13, %v9105_v13  ;;  %v4629_v19 = vrot.slane %v9105_v13, 6  ;;  %v7407_v13 = vld [vmem:[%s9475_s6 + $0x8] ss:$12 sps:$4 sm:$0xff]  }
 0xce0   :  { %v4389_v17 = vrot.slane %v4355_v8, 2 }
 0xce2   :  { %4552 = vmatmul.mubr.bf16.vlgmr.msra.gmra.mrb[60].mxu1 %v4389_v17  ;;  %6917 = vmatmul.mubr.bf16.vlgmr.msra.gmra.mrb[68].mxu0 %v4389_v17 }
 0xce3   :  { %4833 = vmatprep.mubr.bf16.mxu1 %v7601_v15  ;;  %6936 = vmatprep.mubr.msk.bf16.mxu0 %vm7602_vm5, %v7600_v9 }
 0xce4   :  { %4802 = vmatpush1.bf16.msra.mxu1 %v9121_v23  ;;  %6921 = vmatpush3.bf16.msra.mxu0 %v7378_v28 }
 0xce5   :  { %6922 = vmatprep.subr.bf16.mxu0 %v7600_v9  ;;  %4803 = vmatprep.subr.bf16.mxu1 %v9131_v30 }
 0xce8   :  { %4804 = vmatpush1.bf16.msra.mxu1 %v9137_v31  ;;  %6923 = vmatpush3.bf16.msra.mxu0 %v7382_v32 }
 0xce9   :  { %6924 = vmatprep.subr.bf16.mxu0 %v7600_v9  ;;  %4805 = vmatprep.subr.bf16.mxu1 %v9147_v33 }
 0xcec   :  { %4806 = vmatpush1.bf16.msra.mxu1 %v9153_v36  ;;  %6925 = vmatpush3.bf16.msra.mxu0 %v7386_v25 }
 0xced   :  { %6926 = vmatprep.subr.bf16.mxu0 %v7600_v9  ;;  %4807 = vmatprep.subr.bf16.mxu1 %v9168_v27 }
 0xcf0   :  { %4808 = vmatpush1.bf16.msra.mxu1 %v9163_v37  ;;  %6927 = vmatpush3.bf16.msra.mxu0 %v7390_v49  ;;  %v7408_v49 = vld [vmem:[%s9475_s6 + $0x20] ss:$12 sps:$4 sm:$0xff]  }
 0xcf1   :  { %4809 = vmatprep.subr.bf16.mxu1 %v9177_v45  ;;  %6928 = vmatprep.subr.bf16.mxu0 %v7600_v9 }
 0xcf4   :  { %4810 = vmatpush1.bf16.msra.mxu1 %v9184_v51  ;;  %6929 = vmatpush3.bf16.msra.mxu0 %v7394_v44  ;;  %v7409_v44 = vld [vmem:[%s9475_s6 + $0x38] ss:$12 sps:$4 sm:$0xff]  }
 0xcf5   :  { %4811 = vmatprep.subr.bf16.mxu1 %v9194_v46  ;;  %6930 = vmatprep.subr.bf16.mxu0 %v7600_v9 }
 0xcf8   :  { %4812 = vmatpush1.bf16.msra.mxu1 %v9200_v47  ;;  %6931 = vmatpush3.bf16.msra.mxu0 %v7398_v50  ;;  %v7410_v50 = vld [vmem:[%s9475_s6 + $0x50] ss:$12 sps:$4 sm:$0xff]  }
 0xcf9   :  { %4813 = vmatprep.subr.bf16.mxu1 %v9210_v54  ;;  %6932 = vmatprep.subr.bf16.mxu0 %v7600_v9 }
 0xcfc   :  { %4814 = vmatpush1.bf16.msra.mxu1 %v9216_v57  ;;  %6933 = vmatpush3.bf16.msra.mxu0 %v7402_v53  ;;  %v7411_v53 = vld [vmem:[%s9475_s6 + $0x68] ss:$12 sps:$4 sm:$0xff]  }
 0xcfd   :  { %4815 = vmatprep.subr.bf16.mxu1 %v9226_v60  ;;  %6934 = vmatprep.subr.bf16.mxu0 %v7600_v9 }
 0xd00   :  { %4816 = vmatpush1.bf16.msra.mxu1 %v9232_v0  ;;  %6935 = vmatpush3.bf16.msra.mxu0 %v7406_v61  ;;  %v7412_v61 = vld [vmem:[%s9475_s6 + $0x80] ss:$12 sps:$4 sm:$0xff]  }
 0xd01   :  { %5071 = vmatprep.subr.bf16.mxu1 %v9116_v20  ;;  %6940 = vmatprep.subr.bf16.mxu0 %v7600_v9 }
 0xdb5   :  { %v4553_v62 = vpop.f32.mrb[60].mxu1  ;;  %v4594_v63 = vpop.f32.mrb[68].mxu0 }
 0xdb6   :  { %v4554_v2 = vadd.f32 %v4553_v62, %v8334_v34  ;;  %v4555_v40 = vpop.f32.mrb[61].mxu1  ;;  %v6918_v6 = vpop.f32.mrb[69].mxu0  ;;  %v4595_v43 = vadd.f32 %v4594_v63, %v8343_v55  ;;  %v7413_v62 = vld [vmem:[%s9475_s6 + $0x98] ss:$12 sps:$4 sm:$0xff]   ;;  %v7414_v63 = vld [vmem:[%s9475_s6 + $0xb0] ss:$12 sps:$4 sm:$0xff]  }
 0xdb7   :  { %v4556_v41 = vadd.f32 %v4555_v40, %v8337_v35  ;;  %v4557_v38 = vpop.f32.mrb[62].mxu1  ;;  %v4597_v42 = vpop.f32.mrb[70].mxu0 }
 0xdb8   :  { %v4602_v52 = vrot.slane %v4554_v2, 2  ;;  %v4558_v48 = vpop.f32.mrb[63].mxu1  ;;  %v6919_v59 = vpop.f32.mrb[71].mxu0  ;;  %v4621_v7 = vrot.slane %v4595_v43, 2  ;;  %v4634_v42 = vld [vmem:[#allocation2 + $0x48] sm:$0x3] }
 0xdb9   :  { %v4603_v1 = vrot.slane %v4556_v41, 2 }
 0xdba   :  { %v4606_v5 = vadd.f32 %v4602_v52, %v4352_v3 }
 0xdbb   :  { %v4607_v12 = vadd.f32 %v4603_v1, %v4353_v10  ;;  %v4635_v1 = vld [vmem:[#allocation2 + $0x50] sm:$0x3] }
 0xdbc   :  { %v6383_v16 = vmul.f32 -1.442695, %v4606_v5 }
 0xdbd   :  { %v6384_v18 = vmul.f32 -1.442695, %v4607_v12 }
 0xdbe   :  { %7549 = vpow2.f32 %v6383_v16 }
 0xdbf   :  { %7551 = vpow2.f32 %v6384_v18 }
 0xdc8   :  { %v7550_v56 = vpop.eup %7549 }
 0xdc9   :  { %v7552_v39 = vpop.eup %7551  ;;  %v4614_v58 = vadd.f32 1.0, %v7550_v56 }
 0xdca   :  { %v4615_v11 = vadd.f32 1.0, %v7552_v39 }
 0xdcb   :  { %7553 = vrcp.f32 %v4614_v58 }
 0xdcc   :  { %7555 = vrcp.f32 %v4615_v11 }
 0xdd5   :  { %v7554_v14 = vpop.eup %7553 }
 0xdd6   :  { %v7556_v21 = vpop.eup %7555  ;;  %v4623_v22 = vmul.f32 %v7554_v14, %v4621_v7 }
 0xdd7   :  { %v4631_v26 = vmul.f32 %v7556_v21, %v4629_v19  ;;  %v4626_v4 = vsub.f32 1.0, %v7556_v21 }
 0xdd8   :  { %v4624_v29 = vadd.f32 %v4623_v22, %v4354_v24  ;;  %v4636_v22 = vld [vmem:[#allocation2 + $0x58] sm:$0x3] }
 0xdda   :  { %7557 = vtanh.f32 %v4624_v29 }
 0xde4   :  { %v7558_v8 = vpop.eup %7557 }
 0xde5   :  { %v4627_v17 = vmul.f32 %v7558_v8, %v4626_v4 }
 0xde7   :  { %v9246_v28 = vadd.f32 %v4631_v26, %v4627_v17 }
 0xde9   :  { %4633 = vst [vmem:[#allocation3 + $0x10] sm:$0xc0] %v9246_v28  ;;  %v4637_v32 = vpack.c.bf16 %v9246_v28, %v9246_v28  ;;  %v4902_v14 = vrot.slane %v9246_v28, 6  ;;  %v7415_v28 = vld [vmem:[%s9475_s6 + $0x8] ss:$12 sps:$4 sm:$0xff]  }
 0xdeb   :  { %v4671_v25 = vrot.slane %v4637_v32, 3 }
 0xded   :  { %4834 = vmatmul.mubr.bf16.vlgmr.msra.gmra.mrb[64].mxu1 %v4671_v25  ;;  %6937 = vmatmul.mubr.bf16.vlgmr.msra.gmra.mrb[72].mxu0 %v4671_v25  ;;  %v7416_v25 = vld [vmem:[%s9475_s6 + $0x20] ss:$12 sps:$4 sm:$0xff]  }
 0xdee   :  { %5072 = vmatpush1.bf16.msra.mxu1 %v9121_v23  ;;  %5103 = vmatprep.mubr.bf16.mxu1 %v7601_v15 }
 0xdef   :  { %5073 = vmatprep.subr.bf16.mxu1 %v9131_v30  ;;  %6956 = vmatprep.mubr.msk.bf16.mxu0 %vm7602_vm5, %v7600_v9 }
 0xdf0   :  { %6941 = vmatpush3.bf16.msra.mxu0 %v7407_v13  ;;  %v7417_v13 = vld [vmem:[%s9475_s6 + $0x38] ss:$12 sps:$4 sm:$0xff]  }
 0xdf1   :  { %6942 = vmatprep.subr.bf16.mxu0 %v7600_v9 }
 0xdf2   :  { %5074 = vmatpush1.bf16.msra.mxu1 %v9137_v31 }
 0xdf3   :  { %5075 = vmatprep.subr.bf16.mxu1 %v9147_v33 }
 0xdf4   :  { %6943 = vmatpush3.bf16.msra.mxu0 %v7408_v49  ;;  %v7419_v49 = vld [vmem:[%s9475_s6 + $0x68] ss:$12 sps:$4 sm:$0xff]  }
 0xdf5   :  { %6944 = vmatprep.subr.bf16.mxu0 %v7600_v9 }
 0xdf6   :  { %5076 = vmatpush1.bf16.msra.mxu1 %v9153_v36 }
 0xdf7   :  { %5077 = vmatprep.subr.bf16.mxu1 %v9168_v27 }
 0xdf8   :  { %6945 = vmatpush3.bf16.msra.mxu0 %v7409_v44  ;;  %v7420_v44 = vld [vmem:[%s9475_s6 + $0x80] ss:$12 sps:$4 sm:$0xff]  }
 0xdf9   :  { %6946 = vmatprep.subr.bf16.mxu0 %v7600_v9 }
 0xdfa   :  { %5078 = vmatpush1.bf16.msra.mxu1 %v9163_v37 }
 0xdfb   :  { %5079 = vmatprep.subr.bf16.mxu1 %v9177_v45 }
 0xdfc   :  { %6947 = vmatpush3.bf16.msra.mxu0 %v7410_v50  ;;  %v7421_v50 = vld [vmem:[%s9475_s6 + $0x98] ss:$12 sps:$4 sm:$0xff]  }
 0xdfd   :  { %6948 = vmatprep.subr.bf16.mxu0 %v7600_v9 }
 0xdfe   :  { %5080 = vmatpush1.bf16.msra.mxu1 %v9184_v51 }
 0xdff   :  { %5081 = vmatprep.subr.bf16.mxu1 %v9194_v46 }
 0xe00   :  { %6949 = vmatpush3.bf16.msra.mxu0 %v7411_v53  ;;  %v7422_v53 = vld [vmem:[%s9475_s6 + $0xb0] ss:$12 sps:$4 sm:$0xff]  }
 0xe01   :  { %6950 = vmatprep.subr.bf16.mxu0 %v7600_v9 }
 0xe02   :  { %5082 = vmatpush1.bf16.msra.mxu1 %v9200_v47 }
 0xe03   :  { %5083 = vmatprep.subr.bf16.mxu1 %v9210_v54 }
 0xe04   :  { %6951 = vmatpush3.bf16.msra.mxu0 %v7412_v61 }
 0xe05   :  { %6952 = vmatprep.subr.bf16.mxu0 %v7600_v9 }
 0xe06   :  { %5084 = vmatpush1.bf16.msra.mxu1 %v9216_v57 }
 0xe07   :  { %5085 = vmatprep.subr.bf16.mxu1 %v9226_v60 }
 0xe08   :  { %6953 = vmatpush3.bf16.msra.mxu0 %v7413_v62 }
 0xe09   :  { %6954 = vmatprep.subr.bf16.mxu0 %v7600_v9 }
 0xe0a   :  { %5086 = vmatpush1.bf16.msra.mxu1 %v9232_v0 }
 0xe0b   :  { %5353 = vmatprep.subr.bf16.mxu1 %v9116_v20 }
 0xe0c   :  { %6955 = vmatpush3.bf16.msra.mxu0 %v7414_v63 }
 0xe0d   :  { %6960 = vmatprep.subr.bf16.mxu0 %v7600_v9 }
 0xec0   :  { %v4835_v2 = vpop.f32.mrb[64].mxu1  ;;  %v4876_v40 = vpop.f32.mrb[72].mxu0 }
 0xec1   :  { %v4836_v6 = vadd.f32 %v4835_v2, %v8334_v34  ;;  %v4837_v41 = vpop.f32.mrb[65].mxu1  ;;  %v6938_v38 = vpop.f32.mrb[73].mxu0  ;;  %v4877_v43 = vadd.f32 %v4876_v40, %v8343_v55 }
 0xec2   :  { %v4838_v52 = vadd.f32 %v4837_v41, %v8337_v35  ;;  %v4839_v48 = vpop.f32.mrb[66].mxu1  ;;  %v4879_v59 = vpop.f32.mrb[74].mxu0 }
 0xec3   :  { %v4882_v3 = vadd.f32 %v4836_v6, %v4634_v42  ;;  %v4840_v5 = vpop.f32.mrb[67].mxu1  ;;  %v6939_v10 = vpop.f32.mrb[75].mxu0  ;;  %v4907_v59 = vld [vmem:[#allocation2 + $0x48] sm:$0xc] }
 0xec4   :  { %v4883_v12 = vadd.f32 %v4838_v52, %v4635_v1  ;;  %v4908_v5 = vld [vmem:[#allocation2 + $0x50] sm:$0xc] }
 0xec5   :  { %v6409_v16 = vmul.f32 -1.442695, %v4882_v3 }
 0xec6   :  { %v6410_v18 = vmul.f32 -1.442695, %v4883_v12 }
 0xec7   :  { %7559 = vpow2.f32 %v6409_v16 }
 0xec8   :  { %7561 = vpow2.f32 %v6410_v18 }
 0xed1   :  { %v7560_v56 = vpop.eup %7559 }
 0xed2   :  { %v7562_v39 = vpop.eup %7561  ;;  %v4890_v58 = vadd.f32 1.0, %v7560_v56 }
 0xed3   :  { %v4891_v11 = vadd.f32 1.0, %v7562_v39 }
 0xed4   :  { %7563 = vrcp.f32 %v4890_v58 }
 0xed5   :  { %7565 = vrcp.f32 %v4891_v11 }
 0xede   :  { %v7564_v7 = vpop.eup %7563 }
 0xedf   :  { %v7566_v19 = vpop.eup %7565  ;;  %v4896_v21 = vmul.f32 %v7564_v7, %v4877_v43 }
 0xee0   :  { %v4904_v24 = vmul.f32 %v7566_v19, %v4902_v14  ;;  %v4899_v29 = vsub.f32 1.0, %v7566_v19 }
 0xee1   :  { %v4897_v26 = vadd.f32 %v4896_v21, %v4636_v22  ;;  %v4909_v22 = vld [vmem:[#allocation2 + $0x58] sm:$0xc] }
 0xee3   :  { %7567 = vtanh.f32 %v4897_v26 }
 0xeed   :  { %v7568_v4 = vpop.eup %7567 }
 0xeee   :  { %v4900_v8 = vmul.f32 %v7568_v4, %v4899_v29 }
 0xef0   :  { %v9306_v17 = vadd.f32 %v4904_v24, %v4900_v8 }
 0xef2   :  { %4906 = vst [vmem:[#allocation3 + $0x18] sm:$0x3] %v9306_v17  ;;  %v4910_v32 = vpack.c.bf16 %v9306_v17, %v9306_v17  ;;  %v5181_v14 = vrot.slane %v9306_v17, 6 }
 0xef4   :  { %5104 = vmatmul.mubr.bf16.vlgmr.msra.gmra.mrb[68].mxu1 %v4910_v32  ;;  %6957 = vmatmul.mubr.bf16.vlgmr.msra.gmra.mrb[76].mxu0 %v4910_v32 }
 0xef5   :  { %5354 = vmatpush1.bf16.msra.mxu1 %v9121_v23  ;;  %5385 = vmatprep.mubr.bf16.mxu1 %v7601_v15 }
 0xef6   :  { %5355 = vmatprep.subr.bf16.mxu1 %v9131_v30  ;;  %6976 = vmatprep.mubr.msk.bf16.mxu0 %vm7602_vm5, %v7600_v9 }
 0xef7   :  { %6961 = vmatpush3.bf16.msra.mxu0 %v7415_v28 }
 0xef8   :  { %6962 = vmatprep.subr.bf16.mxu0 %v7600_v9 }
 0xef9   :  { %5356 = vmatpush1.bf16.msra.mxu1 %v9137_v31 }
 0xefa   :  { %5357 = vmatprep.subr.bf16.mxu1 %v9147_v33 }
 0xefb   :  { %6963 = vmatpush3.bf16.msra.mxu0 %v7416_v25 }
 0xefc   :  { %6964 = vmatprep.subr.bf16.mxu0 %v7600_v9 }
 0xefd   :  { %5358 = vmatpush1.bf16.msra.mxu1 %v9153_v36 }
 0xefe   :  { %5359 = vmatprep.subr.bf16.mxu1 %v9168_v27 }
 0xeff   :  { %6965 = vmatpush3.bf16.msra.mxu0 %v7417_v13 }
 0xf00   :  { %6966 = vmatprep.subr.bf16.mxu0 %v7600_v9 }
 0xf01   :  { %5360 = vmatpush1.bf16.msra.mxu1 %v9163_v37 }
 0xf02   :  { %5361 = vmatprep.subr.bf16.mxu1 %v9177_v45 }
 0xf05   :  { %5362 = vmatpush1.bf16.msra.mxu1 %v9184_v51 }
 0xf06   :  { %5363 = vmatprep.subr.bf16.mxu1 %v9194_v46 }
 0xf09   :  { %5364 = vmatpush1.bf16.msra.mxu1 %v9200_v47 }
 0xf0a   :  { %5365 = vmatprep.subr.bf16.mxu1 %v9210_v54 }
 0xf0d   :  { %5366 = vmatpush1.bf16.msra.mxu1 %v9216_v57 }
 0xf0e   :  { %5367 = vmatprep.subr.bf16.mxu1 %v9226_v60 }
 0xf11   :  { %5368 = vmatpush1.bf16.msra.mxu1 %v9232_v0 }
 0xf12   :  { %5635 = vmatprep.subr.bf16.mxu1 %v9116_v20  ;;  %v7418_v20 = vld [vmem:[%s9475_s6 + $0x50] ss:$12 sps:$4 sm:$0xff]  }
 0xf13   :  { %6967 = vmatpush3.bf16.msra.mxu0 %v7418_v20 }
 0xf14   :  { %6968 = vmatprep.subr.bf16.mxu0 %v7600_v9 }
 0xf17   :  { %6969 = vmatpush3.bf16.msra.mxu0 %v7419_v49  ;;  %v5186_v49 = vld [vmem:[#allocation2 + $0x48] sm:$0x30] }
 0xf18   :  { %6970 = vmatprep.subr.bf16.mxu0 %v7600_v9 }
 0xf1b   :  { %6971 = vmatpush3.bf16.msra.mxu0 %v7420_v44 }
 0xf1c   :  { %6972 = vmatprep.subr.bf16.mxu0 %v7600_v9 }
 0xf1f   :  { %6973 = vmatpush3.bf16.msra.mxu0 %v7421_v50 }
 0xf20   :  { %6974 = vmatprep.subr.bf16.mxu0 %v7600_v9 }
 0xf23   :  { %6975 = vmatpush3.bf16.msra.mxu0 %v7422_v53  ;;  %v5187_v53 = vld [vmem:[#allocation2 + $0x50] sm:$0x30] }
 0xf24   :  { %6980 = vmatprep.subr.bf16.mxu0 %v7600_v9 }
 0xfc7   :  { %v5105_v61 = vpop.f32.mrb[68].mxu1  ;;  %v5146_v62 = vpop.f32.mrb[76].mxu0 }
 0xfc8   :  { %v5106_v63 = vadd.f32 %v5105_v61, %v8334_v34  ;;  %v5107_v2 = vpop.f32.mrb[69].mxu1  ;;  %v6958_v40 = vpop.f32.mrb[77].mxu0  ;;  %v5147_v11 = vadd.f32 %v5146_v62, %v8343_v55 }
 0xfc9   :  { %v5108_v6 = vadd.f32 %v5107_v2, %v8337_v35  ;;  %v5109_v41 = vpop.f32.mrb[70].mxu1  ;;  %v5149_v38 = vpop.f32.mrb[78].mxu0 }
 0xfca   :  { %v5154_v42 = vrot.slane %v5106_v63, 6  ;;  %v5110_v52 = vpop.f32.mrb[71].mxu1  ;;  %v6959_v48 = vpop.f32.mrb[79].mxu0  ;;  %v5173_v43 = vrot.slane %v5147_v11, 6  ;;  %v5757_v11 = vld [vmem:[#allocation3] sm:$0xff] }
 0xfcb   :  { %v5155_v3 = vrot.slane %v5108_v6, 6 }
 0xfcc   :  { %v5158_v1 = vadd.f32 %v5154_v42, %v4907_v59 }
 0xfcd   :  { %v5159_v10 = vadd.f32 %v5155_v3, %v4908_v5  ;;  %v5188_v3 = vld [vmem:[#allocation2 + $0x58] sm:$0x30] }
 0xfce   :  { %v6435_v12 = vmul.f32 -1.442695, %v5158_v1 }
 0xfcf   :  { %v6436_v16 = vmul.f32 -1.442695, %v5159_v10 }
 0xfd0   :  { %7569 = vpow2.f32 %v6435_v12 }
 0xfd1   :  { %7571 = vpow2.f32 %v6436_v16 }
 0xfda   :  { %v7570_v18 = vpop.eup %7569 }
 0xfdb   :  { %v7572_v56 = vpop.eup %7571  ;;  %v5166_v39 = vadd.f32 1.0, %v7570_v18 }
 0xfdc   :  { %v5167_v58 = vadd.f32 1.0, %v7572_v56 }
 0xfdd   :  { %7573 = vrcp.f32 %v5166_v39  ;;  %v5758_v39 = vld [vmem:[#allocation3 + $0x8] sm:$0xff] }
 0xfde   :  { %7575 = vrcp.f32 %v5167_v58 }
 0xfe7   :  { %v7574_v7 = vpop.eup %7573 }
 0xfe8   :  { %v7576_v19 = vpop.eup %7575  ;;  %v5175_v21 = vmul.f32 %v7574_v7, %v5173_v43  ;;  %v5761_v43 = vpack.c.bf16 %v5758_v39, %v5757_v11  ;;  %v7431_v7 = vld [vmem:[%s9480_s8] sm:$0xff]  }
 0xfe9   :  { %v5183_v24 = vmul.f32 %v7576_v19, %v5181_v14  ;;  %v5178_v29 = vsub.f32 1.0, %v7576_v19  ;;  %v7432_v14 = vld [vmem:[%s9480_s8 + $0x8] sm:$0xff]   ;;  %v7433_v19 = vld [vmem:[%s9480_s8 + $0x10] sm:$0xff]  }
 0xfea   :  { %v5176_v26 = vadd.f32 %v5175_v21, %v4909_v22  ;;  %v7434_v21 = vld [vmem:[%s9480_s8 + $0x18] sm:$0xff]   ;;  %v7435_v22 = vld [vmem:[%s9480_s8 + $0x20] sm:$0xff]  }
 0xfec   :  { %7577 = vtanh.f32 %v5176_v26  ;;  %v7437_v26 = vld [vmem:[%s9480_s8 + $0x30] sm:$0xff]  }
 0xff6   :  { %v7578_v4 = vpop.eup %7577 }
 0xff7   :  { %v5179_v8 = vmul.f32 %v7578_v4, %v5178_v29  ;;  %v7438_v29 = vld [vmem:[%s9480_s8 + $0x38] sm:$0xff]  }
 0xff9   :  { %v9366_v32 = vadd.f32 %v5183_v24, %v5179_v8  ;;  %v7436_v24 = vld [vmem:[%s9480_s8 + $0x28] sm:$0xff]  }
 0xffb   :  { %5185 = vst [vmem:[#allocation3 + $0x18] sm:$0xc] %v9366_v32  ;;  %v5189_v28 = vpack.c.bf16 %v9366_v32, %v9366_v32  ;;  %v5463_v52 = vrot.slane %v9366_v32, 6 }
 0xffd   :  { %v5223_v25 = vrot.slane %v5189_v28, 1 }
 0xfff   :  { %5386 = vmatmul.mubr.bf16.vlgmr.msra.gmra.mrb[72].mxu1 %v5223_v25  ;;  %6977 = vmatmul.mubr.bf16.vlgmr.msra.gmra.mrb[80].mxu0 %v5223_v25 }
0x1000   :  { %5636 = vmatpush1.bf16.msra.mxu1 %v9121_v23  ;;  %5667 = vmatprep.mubr.bf16.mxu1 %v7601_v15  ;;  %v7423_v15 = vld [vmem:[%s9475_s6 + $0x8] ss:$12 sps:$4 sm:$0xff]   ;;  %v7424_v23 = vld [vmem:[%s9475_s6 + $0x20] ss:$12 sps:$4 sm:$0xff]  }
0x1001   :  { %5637 = vmatprep.subr.bf16.mxu1 %v9131_v30  ;;  %6996 = vmatprep.mubr.msk.bf16.mxu0 %vm7602_vm5, %v7600_v9  ;;  %v7425_v30 = vld [vmem:[%s9475_s6 + $0x38] ss:$12 sps:$4 sm:$0xff]  }
0x1002   :  { %6981 = vmatpush3.bf16.msra.mxu0 %v7423_v15 }
0x1003   :  { %6982 = vmatprep.subr.bf16.mxu0 %v7600_v9 }
0x1004   :  { %5638 = vmatpush1.bf16.msra.mxu1 %v9137_v31  ;;  %v7426_v31 = vld [vmem:[%s9475_s6 + $0x50] ss:$12 sps:$4 sm:$0xff]  }
0x1005   :  { %5639 = vmatprep.subr.bf16.mxu1 %v9147_v33  ;;  %v7427_v33 = vld [vmem:[%s9475_s6 + $0x68] ss:$12 sps:$4 sm:$0xff]  }
0x1006   :  { %6983 = vmatpush3.bf16.msra.mxu0 %v7424_v23 }
0x1007   :  { %6984 = vmatprep.subr.bf16.mxu0 %v7600_v9 }
0x1008   :  { %5640 = vmatpush1.bf16.msra.mxu1 %v9153_v36  ;;  %v7428_v36 = vld [vmem:[%s9475_s6 + $0x80] ss:$12 sps:$4 sm:$0xff]  }
0x1009   :  { %5641 = vmatprep.subr.bf16.mxu1 %v9168_v27  ;;  %v7430_v27 = vld [vmem:[%s9475_s6 + $0xb0] ss:$12 sps:$4 sm:$0xff]  }
0x100a   :  { %6985 = vmatpush3.bf16.msra.mxu0 %v7425_v30 }
0x100b   :  { %6986 = vmatprep.subr.bf16.mxu0 %v7600_v9 }
0x100c   :  { %5642 = vmatpush1.bf16.msra.mxu1 %v9163_v37  ;;  %v7429_v37 = vld [vmem:[%s9475_s6 + $0x98] ss:$12 sps:$4 sm:$0xff]  }
0x100d   :  { %5643 = vmatprep.subr.bf16.mxu1 %v9177_v45 }
0x100e   :  { %6987 = vmatpush3.bf16.msra.mxu0 %v7426_v31 }
0x100f   :  { %6988 = vmatprep.subr.bf16.mxu0 %v7600_v9 }
0x1010   :  { %5644 = vmatpush1.bf16.msra.mxu1 %v9184_v51 }
0x1011   :  { %5645 = vmatprep.subr.bf16.mxu1 %v9194_v46 }
0x1012   :  { %6989 = vmatpush3.bf16.msra.mxu0 %v7427_v33 }
0x1013   :  { %6990 = vmatprep.subr.bf16.mxu0 %v7600_v9 }
0x1014   :  { %5646 = vmatpush1.bf16.msra.mxu1 %v9200_v47 }
0x1015   :  { %5647 = vmatprep.subr.bf16.mxu1 %v9210_v54 }
0x1016   :  { %6991 = vmatpush3.bf16.msra.mxu0 %v7428_v36 }
0x1017   :  { %6992 = vmatprep.subr.bf16.mxu0 %v7600_v9 }
0x1018   :  { %5648 = vmatpush1.bf16.msra.mxu1 %v9216_v57 }
0x1019   :  { %5649 = vmatprep.subr.bf16.mxu1 %v9226_v60 }
0x101a   :  { %6993 = vmatpush3.bf16.msra.mxu0 %v7429_v37  ;;  %v5468_v37 = vld [vmem:[#allocation2 + $0x48] sm:$0xc0] }
0x101b   :  { %6994 = vmatprep.subr.bf16.mxu0 %v7600_v9 }
0x101c   :  { %5650 = vmatpush1.bf16.msra.mxu1 %v9232_v0 }
0x101d   :  { %7000 = vmatprep.subr.bf16.mxu1 %v7431_v7 }
0x101e   :  { %6995 = vmatpush3.bf16.msra.mxu0 %v7430_v27 }
0x10d2   :  { %v5387_v45 = vpop.f32.mrb[72].mxu1  ;;  %v5428_v51 = vpop.f32.mrb[80].mxu0 }
0x10d3   :  { %v5388_v46 = vadd.f32 %v5387_v45, %v8334_v34  ;;  %v5389_v47 = vpop.f32.mrb[73].mxu1  ;;  %v6978_v54 = vpop.f32.mrb[81].mxu0  ;;  %v5429_v41 = vadd.f32 %v5428_v51, %v8343_v55  ;;  %v5469_v51 = vld [vmem:[#allocation2 + $0x50] sm:$0xc0] }
0x10d4   :  { %v5390_v57 = vadd.f32 %v5389_v47, %v8337_v35  ;;  %v5391_v60 = vpop.f32.mrb[74].mxu1  ;;  %v5431_v0 = vpop.f32.mrb[82].mxu0 }
0x10d5   :  { %v5436_v17 = vrot.slane %v5388_v46, 4  ;;  %v5392_v13 = vpop.f32.mrb[75].mxu1  ;;  %v6979_v20 = vpop.f32.mrb[83].mxu0  ;;  %v5455_v38 = vrot.slane %v5429_v41, 4 }
0x10d6   :  { %v5437_v44 = vrot.slane %v5390_v57, 4 }
0x10d7   :  { %v5440_v50 = vadd.f32 %v5436_v17, %v5186_v49 }
0x10d8   :  { %v5441_v61 = vadd.f32 %v5437_v44, %v5187_v53 }
0x10d9   :  { %v6461_v9 = vmul.f32 -1.442695, %v5440_v50  ;;  %v5470_v50 = vld [vmem:[#allocation2 + $0x58] sm:$0xc0] }
0x10da   :  { %v6462_v62 = vmul.f32 -1.442695, %v5441_v61 }
0x10db   :  { %7579 = vpow2.f32 %v6461_v9 }
0x10dc   :  { %7581 = vpow2.f32 %v6462_v62 }
0x10e5   :  { %v7580_v63 = vpop.eup %7579 }
0x10e6   :  { %v7582_v2 = vpop.eup %7581  ;;  %v5448_v40 = vadd.f32 1.0, %v7580_v63 }
0x10e7   :  { %v5449_v6 = vadd.f32 1.0, %v7582_v2 }
0x10e8   :  { %7583 = vrcp.f32 %v5448_v40  ;;  %v5759_v40 = vld [vmem:[#allocation3 + $0x10] sm:$0xff] }
0x10e9   :  { %7585 = vrcp.f32 %v5449_v6 }
0x10f2   :  { %v7584_v42 = vpop.eup %7583 }
0x10f3   :  { %v7586_v48 = vpop.eup %7585  ;;  %v5457_v59 = vmul.f32 %v7584_v42, %v5455_v38 }
0x10f4   :  { %v5465_v1 = vmul.f32 %v7586_v48, %v5463_v52  ;;  %v5460_v10 = vsub.f32 1.0, %v7586_v48 }
0x10f5   :  { %v5458_v5 = vadd.f32 %v5457_v59, %v5188_v3 }
0x10f7   :  { %7587 = vtanh.f32 %v5458_v5 }
0x1101   :  { %v7588_v12 = vpop.eup %7587 }
0x1102   :  { %v5461_v16 = vmul.f32 %v7588_v12, %v5460_v10 }
0x1104   :  { %v9424_v18 = vadd.f32 %v5465_v1, %v5461_v16 }
0x1106   :  { %5467 = vst [vmem:[#allocation3 + $0x18] sm:$0x30] %v9424_v18  ;;  %v5471_v56 = vpack.c.bf16 %v9424_v18, %v9424_v18  ;;  %v5745_v20 = vrot.slane %v9424_v18, 6 }
0x1108   :  { %v5505_v58 = vrot.slane %v5471_v56, 2 }
0x110a   :  { %5668 = vmatmul.mubr.bf16.vlgmr.msra.gmra.mrb[76].mxu1 %v5505_v58  ;;  %6997 = vmatmul.mubr.bf16.vlgmr.msra.gmra.mrb[84].mxu0 %v5505_v58 }
0x110b   :  { %7016 = vmatprep.mubr.bf16.mxu1 %v5761_v43  ;;  %7001 = vmatpush3.bf16.msra.mxu1 %v7431_v7 }
0x110c   :  { %7002 = vmatprep.subr.bf16.mxu1 %v7432_v14 }
0x110f   :  { %7003 = vmatpush3.bf16.msra.mxu1 %v7432_v14 }
0x1110   :  { %7004 = vmatprep.subr.bf16.mxu1 %v7433_v19 }
0x1113   :  { %7005 = vmatpush3.bf16.msra.mxu1 %v7433_v19 }
0x1114   :  { %7006 = vmatprep.subr.bf16.mxu1 %v7434_v21 }
0x1117   :  { %7007 = vmatpush3.bf16.msra.mxu1 %v7434_v21 }
0x1118   :  { %7008 = vmatprep.subr.bf16.mxu1 %v7435_v22 }
0x111b   :  { %7009 = vmatpush3.bf16.msra.mxu1 %v7435_v22 }
0x111c   :  { %7010 = vmatprep.subr.bf16.mxu1 %v7436_v24 }
0x111f   :  { %7011 = vmatpush3.bf16.msra.mxu1 %v7436_v24 }
0x1120   :  { %7012 = vmatprep.subr.bf16.mxu1 %v7437_v26 }
0x1123   :  { %7013 = vmatpush3.bf16.msra.mxu1 %v7437_v26 }
0x1124   :  { %7014 = vmatprep.subr.bf16.mxu1 %v7438_v29 }
0x1127   :  { %7015 = vmatpush3.bf16.msra.mxu1 %v7438_v29 }
0x11dd   :  { %v5669_v4 = vpop.f32.mrb[76].mxu1  ;;  %v5710_v8 = vpop.f32.mrb[84].mxu0 }
0x11de   :  { %v5670_v32 = vadd.f32 %v5669_v4, %v8334_v34  ;;  %v5671_v28 = vpop.f32.mrb[77].mxu1  ;;  %v6998_v25 = vpop.f32.mrb[85].mxu0 }
0x11df   :  { %v5672_v15 = vadd.f32 %v5671_v28, %v8337_v35  ;;  %v5673_v23 = vpop.f32.mrb[78].mxu1  ;;  %v5713_v30 = vpop.f32.mrb[86].mxu0  ;;  %v5711_v35 = vadd.f32 %v5710_v8, %v8343_v55  ;;  %v6489_v55 = vld [vmem:[%s9481_s9] ss:$0 sm:$0xff] }
0x11e0   :  { %v5718_v31 = vrot.slane %v5670_v32, 2  ;;  %v5674_v33 = vpop.f32.mrb[79].mxu1  ;;  %v6999_v36 = vpop.f32.mrb[87].mxu0 }
0x11e1   :  { %v5719_v27 = vrot.slane %v5672_v15, 2  ;;  %v5737_v17 = vrot.slane %v5711_v35, 2 }
0x11e2   :  { %v5722_v45 = vadd.f32 %v5718_v31, %v5468_v37 }
0x11e3   :  { %v5723_v46 = vadd.f32 %v5719_v27, %v5469_v51 }
0x11e4   :  { %v6487_v47 = vmul.f32 -1.442695, %v5722_v45 }
0x11e5   :  { %v6488_v54 = vmul.f32 -1.442695, %v5723_v46 }
0x11e6   :  { %7589 = vpow2.f32 %v6487_v47 }
0x11e7   :  { %7591 = vpow2.f32 %v6488_v54 }
0x11f0   :  { %v7590_v57 = vpop.eup %7589 }
0x11f1   :  { %v7592_v34 = vpop.eup %7591  ;;  %v5730_v60 = vadd.f32 1.0, %v7590_v57 }
0x11f2   :  { %v5731_v0 = vadd.f32 1.0, %v7592_v34 }
0x11f3   :  { %7593 = vrcp.f32 %v5730_v60 }
0x11f4   :  { %7595 = vrcp.f32 %v5731_v0 }
0x11fd   :  { %v7594_v13 = vpop.eup %7593 }
0x11fe   :  { %v7596_v49 = vpop.eup %7595  ;;  %v5739_v44 = vmul.f32 %v7594_v13, %v5737_v17 }
0x11ff   :  { %v5747_v53 = vmul.f32 %v7596_v49, %v5745_v20  ;;  %v5742_v9 = vsub.f32 1.0, %v7596_v49 }
0x1200   :  { %v5740_v61 = vadd.f32 %v5739_v44, %v5470_v50 }
0x1202   :  { %7597 = vtanh.f32 %v5740_v61 }
0x120c   :  { %v7598_v62 = vpop.eup %7597 }
0x120d   :  { %v5743_v63 = vmul.f32 %v7598_v62, %v5742_v9 }
0x120f   :  { %v5748_v2 = vadd.f32 %v5747_v53, %v5743_v63 }
0x1211   :  { %5749 = vst [vmem:[#allocation3 + $0x18] sm:$0xc0] %v5748_v2 }
0x1218   :  { %v5760_v6 = vld [vmem:[#allocation3 + $0x18] sm:$0xff] }
0x1219   :  { %v5762_v41 = vpack.c.bf16 %v5760_v6, %v5759_v40 }
0x121b   :  { %7017 = vmatmul.mubr.bf16.vlgmr.msra.gmra.mrb[80].mxu1 %v5762_v41 }
0x12ee   :  { %v7018_v38 = vpop.f32.mrb[80].mxu1 }
0x12ef   :  { %v5870_v42 = vadd.f32 %v7018_v38, %v6489_v55  ;;  %v5861_v52 = vpop.f32.mrb[81].mxu1 }
0x12f0   :  { %v5862_v48 = vadd.f32 %v6489_v55, %v5861_v52  ;;  %v7019_v59 = vpop.f32.mrb[82].mxu1 }
0x12f1   :  { %5878 = vst [vmem:[%s9482_s10 + $0x10] sm:$0xff] %v5870_v42  ;;  %v5873_v3 = vadd.f32 %v7019_v59, %v6489_v55  ;;  %v5864_v1 = vpop.f32.mrb[83].mxu1 }
0x12f2   :  { %5876 = vst [vmem:[%s9482_s10] sm:$0xff] %v5862_v48  ;;  %v5865_v5 = vadd.f32 %v6489_v55, %v5864_v1 }
0x12f3   :  { %5879 = vst [vmem:[%s9482_s10 + $0x18] sm:$0xff] %v5873_v3 }
0x12f4   :  { %5877 = vst [vmem:[%s9482_s10 + $0x8] sm:$0xff] %v5865_v5 }

</bundles_post_ra>
